<compile_context>
chip_gen: v7x
topology: tpu7x:2x2x1
jax: 0.10.0
libtpu: 0.0.40
codegen_flags: <defaults>
</compile_context>

<pallas_src>
import functools
import math

import jax
import jax.numpy as jnp
from jax.experimental import pallas as pl
from jax.experimental.pallas import tpu as pltpu

# ----------------------------- configuration -------------------------------
HIDDEN_DIM = 32          # transformer.d_model
NHEAD = 4
HEAD_DIM = HIDDEN_DIM // NHEAD
FFN_DIM = 64
NUM_QUERIES = 8
NUM_CLASSES = 5          # class_embed outputs NUM_CLASSES + 1 = 6
BACKBONE_CHANNELS = 8    # backbone.num_channels (input channels zero-padded to this)
OUT_SLAB = 128           # lane-dense output slab width

# pl.reciprocal(approx=True) moves the softmax normalization onto the EUP slot
# (essentially free) but introduces ~1e-4 relative error vs an exact divide,
# so softmax rows do not sum to exactly 1.  Set False for exact division.
APPROX_SOFTMAX_RECIP = True


# ------------------------- packed-parameter layout --------------------------
def _layout(entries):
    """entries: [(name, rows, cols)] -> ({name: (row0, rows, cols)}, total_rows, max_cols)."""
    table, off = {}, 0
    for name, rows, cols in entries:
        table[name] = (off, rows, cols)
        off += rows
    return table, off, max(c for _, _, c in entries)


# One weight slab: every matmul weight stacked along the sublane (row) axis so
# unpacking inside the kernel is an aligned static slice (row offsets are
# multiples of 8).  Columns narrower than 64 are zero padded.
_W_ENTRIES = [
    ("bk",     BACKBONE_CHANNELS, BACKBONE_CHANNELS),      # backbone 1x1 conv (3 in-ch, padded to 8 rows)
    ("pj",     BACKBONE_CHANNELS, HIDDEN_DIM),              # input_proj (Conv2d k=1)
    ("enc_qk", HIDDEN_DIM, 2 * HIDDEN_DIM),                 # encoder q|k fused
    ("enc_v",  HIDDEN_DIM, HIDDEN_DIM),
    ("enc_o",  HIDDEN_DIM, HIDDEN_DIM),
    ("enc_f1", HIDDEN_DIM, FFN_DIM),
    ("enc_f2", FFN_DIM, HIDDEN_DIM),
    ("ca_k",   HIDDEN_DIM, HIDDEN_DIM),                     # decoder cross-attention
    ("ca_v",   HIDDEN_DIM, HIDDEN_DIM),
    ("ca_o",   HIDDEN_DIM, HIDDEN_DIM),
    ("dec_f1", HIDDEN_DIM, FFN_DIM),
    ("dec_f2", FFN_DIM, HIDDEN_DIM),
    ("head0",  HIDDEN_DIM, HIDDEN_DIM + NUM_CLASSES + 1),   # bbox-MLP layer0 | class_embed (fused)
    ("bb1",    HIDDEN_DIM, HIDDEN_DIM),
    ("bb2",    HIDDEN_DIM, 4),
]
W_LAYOUT, W_ROWS, W_COLS = _layout(_W_ENTRIES)

# One constants slab: biases, layernorm gamma/beta and the hoisted
# image-independent decoder tensors.  Multi-row entries first (8-row aligned).
_C_ENTRIES = [
    ("tgt1",     NUM_QUERIES, HIDDEN_DIM),   # decoder state after (hoisted) self-attn + LN1
    ("ca_q",     NUM_QUERIES, HIDDEN_DIM),   # (tgt1 + query_pos) @ Wq + bq, hoisted
    ("bk_b",     1, BACKBONE_CHANNELS),
    ("pj_b",     1, HIDDEN_DIM),
    ("enc_qk_b", 1, 2 * HIDDEN_DIM),
    ("enc_v_b",  1, HIDDEN_DIM),
    ("enc_o_b",  1, HIDDEN_DIM),
    ("enc_f1_b", 1, FFN_DIM),
    ("enc_f2_b", 1, HIDDEN_DIM),
    ("enc_g1", 1, HIDDEN_DIM), ("enc_b1", 1, HIDDEN_DIM),
    ("enc_g2", 1, HIDDEN_DIM), ("enc_b2", 1, HIDDEN_DIM),
    ("ca_k_b", 1, HIDDEN_DIM), ("ca_v_b", 1, HIDDEN_DIM), ("ca_o_b", 1, HIDDEN_DIM),
    ("dec_f1_b", 1, FFN_DIM), ("dec_f2_b", 1, HIDDEN_DIM),
    ("head0_b", 1, HIDDEN_DIM + NUM_CLASSES + 1),
    ("bb1_b", 1, HIDDEN_DIM), ("bb2_b", 1, 4),
    ("dec_g2", 1, HIDDEN_DIM), ("dec_b2", 1, HIDDEN_DIM),
    ("dec_g3", 1, HIDDEN_DIM), ("dec_b3", 1, HIDDEN_DIM),
    ("dec_gn", 1, HIDDEN_DIM), ("dec_bn", 1, HIDDEN_DIM),
]
C_LAYOUT, C_ROWS, C_COLS = _layout(_C_ENTRIES)


# --------------------------- numeric helpers ---------------------------------
def _layernorm(x, g, b):
    mu = jnp.mean(x, axis=-1, keepdims=True)
    xc = x - mu
    var = jnp.mean(xc * xc, axis=-1, keepdims=True)
    return xc * jax.lax.rsqrt(var + 1e-5) * g + b


def _ffn(x, w1, b1, w2, b2):
    h = jnp.maximum(jnp.dot(x, w1, preferred_element_type=jnp.float32) + b1, 0.0)
    return jnp.dot(h, w2, preferred_element_type=jnp.float32) + b2


def _attend(q, k, v, wo, bo):
    """Multi-head softmax attention with the output projection folded per head.

    concat_h(o_h) @ Wo == sum_h o_h @ Wo[h*hd:(h+1)*hd, :], so no cross-lane
    head reassembly (concatenate) is needed.  q:(Lq,d)  k,v:(Lk,d).
    """
    scale = 1.0 / math.sqrt(HEAD_DIM)
    acc = None
    for h in range(NHEAD):
        lo, hi = h * HEAD_DIM, (h + 1) * HEAD_DIM
        s = jax.lax.dot_general(q[:, lo:hi], k[:, lo:hi],
                                (((1,), (1,)), ((), ())),
                                preferred_element_type=jnp.float32) * scale
        s = s - jnp.max(s, axis=-1, keepdims=True)
        p = jnp.exp(s)
        denom = jnp.sum(p, axis=-1, keepdims=True)
        o = jnp.dot(p, v[:, lo:hi], preferred_element_type=jnp.float32)
        if APPROX_SOFTMAX_RECIP:
            o = o * pl.reciprocal(denom, approx=True)          # EUP slot
        else:
            o = o / denom
        contrib = jnp.dot(o, wo[lo:hi, :], preferred_element_type=jnp.float32)
        acc = contrib if acc is None else acc + contrib
    return acc + bo


# ------------------------------ Pallas kernel --------------------------------
def _detr_kernel(tok_ref, pos_ref, w_ref, c_ref, out_ref, *, bpg, L):
    """Full DETR forward for `bpg` images per grid step."""
    d, nq, nc1 = HIDDEN_DIM, NUM_QUERIES, NUM_CLASSES + 1

    def w(name):
        r0, rows, cols = W_LAYOUT[name]
        return w_ref[r0:r0 + rows, 0:cols]

    def c(name):
        r0, rows, cols = C_LAYOUT[name]
        return c_ref[r0:r0 + rows, 0:cols]

    tok = tok_ref[...].astype(jnp.float32)                       # (bpg*L, Cin_pad)
    pos = pos_ref[...].astype(jnp.float32)                       # (L, d)
    pos_rows = pos if bpg == 1 else jnp.concatenate([pos] * bpg, axis=0)

    # ---- backbone stand-in (1x1 conv + ReLU) and input_proj (Conv2d k=1) ----
    x = jnp.maximum(
        jnp.dot(tok, w("bk"), preferred_element_type=jnp.float32) + c("bk_b"), 0.0)
    src = jnp.dot(x, w("pj"), preferred_element_type=jnp.float32) + c("pj_b")

    # -------------------- encoder layer (post-norm, q/k = x + pos) --------------------
    qk = jnp.dot(src + pos_rows, w("enc_qk"),
                 preferred_element_type=jnp.float32) + c("enc_qk_b")        # (bpg*L, 2d)
    v_all = jnp.dot(src, w("enc_v"), preferred_element_type=jnp.float32) + c("enc_v_b")
    wo_e, bo_e = w("enc_o"), c("enc_o_b")
    rows = []
    for i in range(bpg):                                         # attention is per image
        sl = slice(i * L, (i + 1) * L)
        rows.append(_attend(qk[sl, :d], qk[sl, d:], v_all[sl], wo_e, bo_e))
    attn = rows[0] if bpg == 1 else jnp.concatenate(rows, axis=0)
    x1 = _layernorm(src + attn, c("enc_g1"), c("enc_b1"))
    ff = _ffn(x1, w("enc_f1"), c("enc_f1_b"), w("enc_f2"), c("enc_f2_b"))
    mem = _layernorm(x1 + ff, c("enc_g2"), c("enc_b2"))          # memory stays in VMEM/vregs

    # ------------------ decoder layer (self-attn on tgt=0 hoisted) ------------------
    tgt1, ca_q = c("tgt1"), c("ca_q")                            # precomputed, image independent
    k_all = jnp.dot(mem + pos_rows, w("ca_k"),
                    preferred_element_type=jnp.float32) + c("ca_k_b")
    v_ca = jnp.dot(mem, w("ca_v"), preferred_element_type=jnp.float32) + c("ca_v_b")
    wo_c, bo_c = w("ca_o"), c("ca_o_b")
    rows = []
    for i in range(bpg):
        sl = slice(i * L, (i + 1) * L)
        rows.append(_attend(ca_q, k_all[sl], v_ca[sl], wo_c, bo_c))
    ca = rows[0] if bpg == 1 else jnp.concatenate(rows, axis=0)              # (bpg*nq, d)
    tgt1_t = tgt1 if bpg == 1 else jnp.concatenate([tgt1] * bpg, axis=0)

    tgt2 = _layernorm(tgt1_t + ca, c("dec_g2"), c("dec_b2"))
    ff2 = _ffn(tgt2, w("dec_f1"), c("dec_f1_b"), w("dec_f2"), c("dec_f2_b"))
    tgt3 = _layernorm(tgt2 + ff2, c("dec_g3"), c("dec_b3"))
    hs = _layernorm(tgt3, c("dec_gn"), c("dec_bn"))              # transformer final norm

    # --------------- heads: class_embed fused with bbox-MLP layer 0 ---------------
    h0c = jnp.dot(hs, w("head0"), preferred_element_type=jnp.float32) + c("head0_b")
    h0 = jnp.maximum(h0c[:, :d], 0.0)                            # bbox layer 0 (+ReLU)
    logits = h0c[:, d:d + nc1]                                   # class logits
    h1 = jnp.maximum(
        jnp.dot(h0, w("bb1"), preferred_element_type=jnp.float32) + c("bb1_b"), 0.0)
    boxes = jax.nn.sigmoid(
        jnp.dot(h1, w("bb2"), preferred_element_type=jnp.float32) + c("bb2_b"))

    # lane-dense (rows, 128) output slab; heads stored directly into lane slices.
    out_ref[...] = jnp.zeros_like(out_ref)
    out_ref[:, 0:nc1] = logits.astype(out_ref.dtype)
    out_ref[:, nc1:nc1 + 4] = boxes.astype(out_ref.dtype)


# ------------------------- positional embedding -----------------------------
def sine_pos_embed(H, W, d):
    """Deterministic 2-D sine positional embedding in token layout, (H*W, d)."""
    half = d // 2
    y = jnp.arange(1, H + 1, dtype=jnp.float32)
    x = jnp.arange(1, W + 1, dtype=jnp.float32)
    dim_t = jnp.arange(half, dtype=jnp.float32)
    dim_t = 10000.0 ** (2.0 * jnp.floor(dim_t / 2.0) / half)
    pos_x = jnp.broadcast_to(x[None, :, None] / dim_t, (H, W, half))
    pos_y = jnp.broadcast_to(y[:, None, None] / dim_t, (H, W, half))
    even = (jnp.arange(half) % 2) == 0
    pos_x = jnp.where(even, jnp.sin(pos_x), jnp.cos(pos_x))
    pos_y = jnp.where(even, jnp.sin(pos_y), jnp.cos(pos_y))
    pos = jnp.concatenate([pos_y, pos_x], axis=-1)
    return pos.reshape(H * W, d).astype(jnp.float32)


# ------------------------------ grid selection -------------------------------
def _batch_per_step(batch):
    """Images per grid step.

    v7x (2 TensorCores/chip): keep grid=(B,) so dimension_semantics="parallel"
    shards images across cores.  Single-core v5e/v6e: collapse the batch into
    one grid step to amortize per-step overhead and double sublane occupancy.
    """
    try:
        kind = jax.devices()[0].device_kind.lower()
    except Exception:
        return 1
    if any(t in kind for t in ("v5e", "v5 lite", "v6e", "v6 lite")):
        return batch
    return 1


# ------------------------------- DETR forward --------------------------------
def detr_forward(params, samples):
    B, Cin, H0, W0 = samples.shape
    assert Cin <= BACKBONE_CHANNELS
    H, W = H0 // 2, W0 // 2
    L = H * W
    nc1 = NUM_CLASSES + 1

    # backbone stand-in downsample (2x2 avg pool) + NCHW -> token layout.
    pooled = samples.reshape(B, Cin, H, 2, W, 2).mean(axis=(3, 5))
    tok = pooled.transpose(0, 2, 3, 1).reshape(B * L, Cin)
    tok = jnp.pad(tok, ((0, 0), (0, BACKBONE_CHANNELS - Cin)))

    # input-independent for fixed H, W -> constant-folded by jit.
    pos = sine_pos_embed(H, W, HIDDEN_DIM)

    bpg = _batch_per_step(B)
    grid = (B // bpg,)
    kernel = functools.partial(_detr_kernel, bpg=bpg, L=L)

    slab = pl.pallas_call(
        kernel,
        out_shape=jax.ShapeDtypeStruct((B * NUM_QUERIES, OUT_SLAB), jnp.float32),
        grid=grid,
        in_specs=[
            pl.BlockSpec((bpg * L, BACKBONE_CHANNELS), lambda g: (g, 0)),   # tokens (per step)
            pl.BlockSpec(pos.shape, lambda g: (0, 0)),                      # pos (replicated)
            pl.BlockSpec(params["W"].shape, lambda g: (0, 0)),              # packed weights
            pl.BlockSpec(params["C"].shape, lambda g: (0, 0)),              # packed consts
        ],
        out_specs=pl.BlockSpec((bpg * NUM_QUERIES, OUT_SLAB), lambda g: (g, 0)),
        compiler_params=pltpu.CompilerParams(dimension_semantics=("parallel",)),
    )(tok, pos, params["W"], params["C"])

    logits = slab[:, :nc1].reshape(B, NUM_QUERIES, nc1)
    boxes = slab[:, nc1:nc1 + 4].reshape(B, NUM_QUERIES, 4)
    return {"pred_logits": logits, "pred_boxes": boxes}


# ------------------------------ parameter init -------------------------------
def init_params(key):
    d, nq, nc1 = HIDDEN_DIM, NUM_QUERIES, NUM_CLASSES + 1
    keys = iter(jax.random.split(key, 32))

    def lin(fan_in, fan_out):
        kw, kb = jax.random.split(next(keys))
        lim = 1.0 / math.sqrt(fan_in)
        wt = jax.random.uniform(kw, (fan_in, fan_out), jnp.float32, -lim, lim)
        bs = jax.random.uniform(kb, (1, fan_out), jnp.float32, -lim, lim)
        return wt, bs

    def attn():
        p = {}
        for n in ("q", "k", "v", "o"):
            p["w" + n], p["b" + n] = lin(d, d)
        return p

    # ---- raw DETR parameters (stand-ins for backbone / 6-layer transformer) ----
    bk_w, bk_b = lin(3, BACKBONE_CHANNELS)                  # backbone 1x1 conv
    pj_w, pj_b = lin(BACKBONE_CHANNELS, d)                  # input_proj
    cls_w, cls_b = lin(d, nc1)                              # class_embed
    bb0_w, bb0_b = lin(d, d)                                # bbox_embed = MLP(d, d, 4, 3)
    bb1_w, bb1_b = lin(d, d)
    bb2_w, bb2_b = lin(d, 4)
    query_embed = jax.random.normal(next(keys), (nq, d), jnp.float32)

    enc_sa = attn()
    enc_f1_w, enc_f1_b = lin(d, FFN_DIM)
    enc_f2_w, enc_f2_b = lin(FFN_DIM, d)
    dec_sa = attn()
    dec_ca = attn()
    dec_f1_w, dec_f1_b = lin(d, FFN_DIM)
    dec_f2_w, dec_f2_b = lin(FFN_DIM, d)
    ones = jnp.ones((1, d), jnp.float32)                    # LayerNorm default init
    zeros = jnp.zeros((1, d), jnp.float32)

    # ---- hoist the image-independent decoder prefix (tgt == 0); exact math ----
    tgt = jnp.zeros((nq, d), jnp.float32)
    q = (tgt + query_embed) @ dec_sa["wq"] + dec_sa["bq"]
    k = (tgt + query_embed) @ dec_sa["wk"] + dec_sa["bk"]
    v = tgt @ dec_sa["wv"] + dec_sa["bv"]
    heads = []
    for h in range(NHEAD):
        lo, hi = h * HEAD_DIM, (h + 1) * HEAD_DIM
        s = (q[:, lo:hi] @ k[:, lo:hi].T) / math.sqrt(HEAD_DIM)
        heads.append(jax.nn.softmax(s, axis=-1) @ v[:, lo:hi])
    sa_out = jnp.concatenate(heads, axis=-1) @ dec_sa["wo"] + dec_sa["bo"]
    tgt1 = _layernorm(tgt + sa_out, ones, zeros)            # decoder LN1
    ca_q = (tgt1 + query_embed) @ dec_ca["wq"] + dec_ca["bq"]

    # ---- fuse encoder q|k and (bbox layer0 | class_embed) ----
    enc_qk_w = jnp.concatenate([enc_sa["wq"], enc_sa["wk"]], axis=1)
    enc_qk_b = jnp.concatenate([enc_sa["bq"], enc_sa["bk"]], axis=1)
    head0_w = jnp.concatenate([bb0_w, cls_w], axis=1)
    head0_b = jnp.concatenate([bb0_b, cls_b], axis=1)

    # ---- pack everything into two slabs (one weights, one constants) ----
    def pack(layout, total_rows, total_cols, items):
        slab = jnp.zeros((total_rows, total_cols), jnp.float32)
        for name, arr in items:
            r0, _, _ = layout[name]
            slab = slab.at[r0:r0 + arr.shape[0], :arr.shape[1]].set(arr)
        return slab

    w_slab = pack(W_LAYOUT, W_ROWS, W_COLS, [
        ("bk", bk_w), ("pj", pj_w),
        ("enc_qk", enc_qk_w), ("enc_v", enc_sa["wv"]), ("enc_o", enc_sa["wo"]),
        ("enc_f1", enc_f1_w), ("enc_f2", enc_f2_w),
        ("ca_k", dec_ca["wk"]), ("ca_v", dec_ca["wv"]), ("ca_o", dec_ca["wo"]),
        ("dec_f1", dec_f1_w), ("dec_f2", dec_f2_w),
        ("head0", head0_w), ("bb1", bb1_w), ("bb2", bb2_w),
    ])
    c_slab = pack(C_LAYOUT, C_ROWS, C_COLS, [
        ("tgt1", tgt1), ("ca_q", ca_q),
        ("bk_b", bk_b), ("pj_b", pj_b),
        ("enc_qk_b", enc_qk_b), ("enc_v_b", enc_sa["bv"]), ("enc_o_b", enc_sa["bo"]),
        ("enc_f1_b", enc_f1_b), ("enc_f2_b", enc_f2_b),
        ("enc_g1", ones), ("enc_b1", zeros), ("enc_g2", ones), ("enc_b2", zeros),
        ("ca_k_b", dec_ca["bk"]), ("ca_v_b", dec_ca["bv"]), ("ca_o_b", dec_ca["bo"]),
        ("dec_f1_b", dec_f1_b), ("dec_f2_b", dec_f2_b),
        ("head0_b", head0_b), ("bb1_b", bb1_b), ("bb2_b", bb2_b),
        ("dec_g2", ones), ("dec_b2", zeros), ("dec_g3", ones), ("dec_b3", zeros),
        ("dec_gn", ones), ("dec_bn", zeros),
    ])
    return {"W": w_slab, "C": c_slab}


# ---------------------------------- main --------------------------------------
if __name__ == "__main__":
    params = init_params(jax.random.PRNGKey(42))
    # samples: NCHW like PyTorch, batch=2, 3 channels, 16x16
    x = jax.random.normal(jax.random.PRNGKey(0), (2, 3, 16, 16), jnp.float32)

    fwd = jax.jit(detr_forward)
    out = fwd(params, x)
    jax.block_until_ready(out)

    assert out["pred_logits"].shape == (2, NUM_QUERIES, NUM_CLASSES + 1)
    assert out["pred_boxes"].shape == (2, NUM_QUERIES, 4)
    assert bool(jnp.all(jnp.isfinite(out["pred_logits"])))
    assert bool(jnp.all((out["pred_boxes"] >= 0.0) & (out["pred_boxes"] <= 1.0)))
    print("KERNEL_OK")
</pallas_src>

<mosaic_0001>
module attributes {stable_mosaic.version = 11 : i64} {
  func.func @_detr_kernel(%arg0: i32, %arg1: memref<64x8xf32, #tpu.memory_space<vmem>>, %arg2: memref<64x32xf32, #tpu.memory_space<vmem>>, %arg3: memref<496x64xf32, #tpu.memory_space<vmem>>, %arg4: memref<41x64xf32, #tpu.memory_space<vmem>>, %arg5: memref<8x128xf32, #tpu.memory_space<vmem>>) attributes {dimension_semantics = [#tpu.dimension_semantics<parallel>], iteration_bounds = array<i64: 2>, scalar_prefetch = 0 : i64, scratch_operands = 0 : i64, tpu.core_type = #tpu.core_type<tc>, window_params = [{transform_indices = @transform_0, window_bounds = array<i64: 64, 8>}, {pipeline_mode = #tpu.pipeline_mode<synchronous>, transform_indices = @transform_1, window_bounds = array<i64: 64, 32>}, {pipeline_mode = #tpu.pipeline_mode<synchronous>, transform_indices = @transform_2, window_bounds = array<i64: 496, 64>}, {pipeline_mode = #tpu.pipeline_mode<synchronous>, transform_indices = @transform_3, window_bounds = array<i64: 41, 64>}, {transform_indices = @transform_4, window_bounds = array<i64: 8, 128>}]} {
    %c0 = arith.constant 0 : index
    %c0_0 = arith.constant 0 : index
    %0 = vector.load %arg1[%c0, %c0_0] : memref<64x8xf32, #tpu.memory_space<vmem>>, vector<64x8xf32>
    %c0_1 = arith.constant 0 : index
    %c0_2 = arith.constant 0 : index
    %1 = vector.load %arg2[%c0_1, %c0_2] : memref<64x32xf32, #tpu.memory_space<vmem>>, vector<64x32xf32>
    %c0_3 = arith.constant 0 : index
    %c0_4 = arith.constant 0 : index
    %2 = vector.load %arg3[%c0_3, %c0_4] : memref<496x64xf32, #tpu.memory_space<vmem>>, vector<8x8xf32>
    %cst = arith.constant dense<0.000000e+00> : vector<64x8xf32>
    %3 = tpu.matmul %0, %2, %cst {dimension_numbers = #tpu.dot_dimension_numbers<[1], [0], [0], [1], [0, 0, 1, 1], [], []>} : vector<64x8xf32>, vector<8x8xf32>, vector<64x8xf32> -> vector<64x8xf32>
    %c16 = arith.constant 16 : index
    %c0_5 = arith.constant 0 : index
    %4 = vector.load %arg4[%c16, %c0_5] : memref<41x64xf32, #tpu.memory_space<vmem>>, vector<1x8xf32>
    %5 = vector.broadcast %4 : vector<1x8xf32> to vector<64x8xf32>
    %6 = arith.addf %3, %5 : vector<64x8xf32>
    %cst_6 = arith.constant 0.000000e+00 : f32
    %7 = vector.broadcast %cst_6 : f32 to vector<64x8xf32>
    %8 = arith.maximumf %6, %7 : vector<64x8xf32>
    %c8 = arith.constant 8 : index
    %c0_7 = arith.constant 0 : index
    %9 = vector.load %arg3[%c8, %c0_7] : memref<496x64xf32, #tpu.memory_space<vmem>>, vector<8x32xf32>
    %cst_8 = arith.constant dense<0.000000e+00> : vector<64x32xf32>
    %10 = tpu.matmul %8, %9, %cst_8 {dimension_numbers = #tpu.dot_dimension_numbers<[1], [0], [0], [1], [0, 0, 1, 1], [], []>} : vector<64x8xf32>, vector<8x32xf32>, vector<64x32xf32> -> vector<64x32xf32>
    %c17 = arith.constant 17 : index
    %c0_9 = arith.constant 0 : index
    %11 = vector.load %arg4[%c17, %c0_9] : memref<41x64xf32, #tpu.memory_space<vmem>>, vector<1x32xf32>
    %12 = vector.broadcast %11 : vector<1x32xf32> to vector<64x32xf32>
    %13 = arith.addf %10, %12 : vector<64x32xf32>
    %14 = arith.addf %13, %1 : vector<64x32xf32>
    %c16_10 = arith.constant 16 : index
    %c0_11 = arith.constant 0 : index
    %15 = vector.load %arg3[%c16_10, %c0_11] : memref<496x64xf32, #tpu.memory_space<vmem>>, vector<32x64xf32>
    %cst_12 = arith.constant dense<0.000000e+00> : vector<64x64xf32>
    %16 = tpu.matmul %14, %15, %cst_12 {dimension_numbers = #tpu.dot_dimension_numbers<[1], [0], [0], [1], [0, 0, 1, 1], [], []>} : vector<64x32xf32>, vector<32x64xf32>, vector<64x64xf32> -> vector<64x64xf32>
    %c18 = arith.constant 18 : index
    %c0_13 = arith.constant 0 : index
    %17 = vector.load %arg4[%c18, %c0_13] : memref<41x64xf32, #tpu.memory_space<vmem>>, vector<1x64xf32>
    %18 = vector.broadcast %17 : vector<1x64xf32> to vector<64x64xf32>
    %19 = arith.addf %16, %18 : vector<64x64xf32>
    %c48 = arith.constant 48 : index
    %c0_14 = arith.constant 0 : index
    %20 = vector.load %arg3[%c48, %c0_14] : memref<496x64xf32, #tpu.memory_space<vmem>>, vector<32x32xf32>
    %cst_15 = arith.constant dense<0.000000e+00> : vector<64x32xf32>
    %21 = tpu.matmul %13, %20, %cst_15 {dimension_numbers = #tpu.dot_dimension_numbers<[1], [0], [0], [1], [0, 0, 1, 1], [], []>} : vector<64x32xf32>, vector<32x32xf32>, vector<64x32xf32> -> vector<64x32xf32>
    %c19 = arith.constant 19 : index
    %c0_16 = arith.constant 0 : index
    %22 = vector.load %arg4[%c19, %c0_16] : memref<41x64xf32, #tpu.memory_space<vmem>>, vector<1x32xf32>
    %23 = vector.broadcast %22 : vector<1x32xf32> to vector<64x32xf32>
    %24 = arith.addf %21, %23 : vector<64x32xf32>
    %c80 = arith.constant 80 : index
    %c0_17 = arith.constant 0 : index
    %25 = vector.load %arg3[%c80, %c0_17] : memref<496x64xf32, #tpu.memory_space<vmem>>, vector<32x32xf32>
    %c20 = arith.constant 20 : index
    %c0_18 = arith.constant 0 : index
    %26 = vector.load %arg4[%c20, %c0_18] : memref<41x64xf32, #tpu.memory_space<vmem>>, vector<1x32xf32>
    %27 = vector.extract_strided_slice %19 {offsets = [0, 0], sizes = [64, 32], strides = [1, 1]} : vector<64x64xf32> to vector<64x32xf32>
    %28 = vector.extract_strided_slice %19 {offsets = [0, 32], sizes = [64, 32], strides = [1, 1]} : vector<64x64xf32> to vector<64x32xf32>
    %29 = vector.extract_strided_slice %27 {offsets = [0, 0], sizes = [64, 8], strides = [1, 1]} : vector<64x32xf32> to vector<64x8xf32>
    %30 = vector.extract_strided_slice %28 {offsets = [0, 0], sizes = [64, 8], strides = [1, 1]} : vector<64x32xf32> to vector<64x8xf32>
    %cst_19 = arith.constant dense<0.000000e+00> : vector<64x64xf32>
    %31 = tpu.matmul %29, %30, %cst_19 {dimension_numbers = #tpu.dot_dimension_numbers<[1], [1], [0], [0], [0, 0, 1, 0], [], []>} : vector<64x8xf32>, vector<64x8xf32>, vector<64x64xf32> -> vector<64x64xf32>
    %cst_20 = arith.constant 0.353553385 : f32
    %32 = vector.broadcast %cst_20 : f32 to vector<64x64xf32>
    %33 = arith.mulf %31, %32 : vector<64x64xf32>
    %cst_21 = arith.constant dense<0xFF800000> : vector<64xf32>
    %34 = vector.multi_reduction <maximumf>, %33, %cst_21 [1] : vector<64x64xf32> to vector<64xf32>
    %35 = vector.shape_cast %34 : vector<64xf32> to vector<64x1xf32>
    %36 = vector.broadcast %35 : vector<64x1xf32> to vector<64x64xf32>
    %37 = arith.subf %33, %36 : vector<64x64xf32>
    %38 = math.exp %37 : vector<64x64xf32>
    %cst_22 = arith.constant dense<0.000000e+00> : vector<64xf32>
    %39 = vector.multi_reduction <add>, %38, %cst_22 [1] : vector<64x64xf32> to vector<64xf32>
    %40 = vector.shape_cast %39 : vector<64xf32> to vector<64x1xf32>
    %41 = vector.extract_strided_slice %24 {offsets = [0, 0], sizes = [64, 8], strides = [1, 1]} : vector<64x32xf32> to vector<64x8xf32>
    %cst_23 = arith.constant dense<0.000000e+00> : vector<64x8xf32>
    %42 = tpu.matmul %38, %41, %cst_23 {dimension_numbers = #tpu.dot_dimension_numbers<[1], [0], [0], [1], [0, 0, 1, 1], [], []>} : vector<64x64xf32>, vector<64x8xf32>, vector<64x8xf32> -> vector<64x8xf32>
    %43 = tpu.reciprocal %40 {approx = true} : vector<64x1xf32> -> vector<64x1xf32>
    %44 = vector.broadcast %43 : vector<64x1xf32> to vector<64x8xf32>
    %45 = arith.mulf %42, %44 : vector<64x8xf32>
    %46 = vector.extract_strided_slice %25 {offsets = [0, 0], sizes = [8, 32], strides = [1, 1]} : vector<32x32xf32> to vector<8x32xf32>
    %cst_24 = arith.constant dense<0.000000e+00> : vector<64x32xf32>
    %47 = tpu.matmul %45, %46, %cst_24 {dimension_numbers = #tpu.dot_dimension_numbers<[1], [0], [0], [1], [0, 0, 1, 1], [], []>} : vector<64x8xf32>, vector<8x32xf32>, vector<64x32xf32> -> vector<64x32xf32>
    %48 = vector.extract_strided_slice %27 {offsets = [0, 8], sizes = [64, 8], strides = [1, 1]} : vector<64x32xf32> to vector<64x8xf32>
    %49 = vector.extract_strided_slice %28 {offsets = [0, 8], sizes = [64, 8], strides = [1, 1]} : vector<64x32xf32> to vector<64x8xf32>
    %cst_25 = arith.constant dense<0.000000e+00> : vector<64x64xf32>
    %50 = tpu.matmul %48, %49, %cst_25 {dimension_numbers = #tpu.dot_dimension_numbers<[1], [1], [0], [0], [0, 0, 1, 0], [], []>} : vector<64x8xf32>, vector<64x8xf32>, vector<64x64xf32> -> vector<64x64xf32>
    %cst_26 = arith.constant 0.353553385 : f32
    %51 = vector.broadcast %cst_26 : f32 to vector<64x64xf32>
    %52 = arith.mulf %50, %51 : vector<64x64xf32>
    %cst_27 = arith.constant dense<0xFF800000> : vector<64xf32>
    %53 = vector.multi_reduction <maximumf>, %52, %cst_27 [1] : vector<64x64xf32> to vector<64xf32>
    %54 = vector.shape_cast %53 : vector<64xf32> to vector<64x1xf32>
    %55 = vector.broadcast %54 : vector<64x1xf32> to vector<64x64xf32>
    %56 = arith.subf %52, %55 : vector<64x64xf32>
    %57 = math.exp %56 : vector<64x64xf32>
    %cst_28 = arith.constant dense<0.000000e+00> : vector<64xf32>
    %58 = vector.multi_reduction <add>, %57, %cst_28 [1] : vector<64x64xf32> to vector<64xf32>
    %59 = vector.shape_cast %58 : vector<64xf32> to vector<64x1xf32>
    %60 = vector.extract_strided_slice %24 {offsets = [0, 8], sizes = [64, 8], strides = [1, 1]} : vector<64x32xf32> to vector<64x8xf32>
    %cst_29 = arith.constant dense<0.000000e+00> : vector<64x8xf32>
    %61 = tpu.matmul %57, %60, %cst_29 {dimension_numbers = #tpu.dot_dimension_numbers<[1], [0], [0], [1], [0, 0, 1, 1], [], []>} : vector<64x64xf32>, vector<64x8xf32>, vector<64x8xf32> -> vector<64x8xf32>
    %62 = tpu.reciprocal %59 {approx = true} : vector<64x1xf32> -> vector<64x1xf32>
    %63 = vector.broadcast %62 : vector<64x1xf32> to vector<64x8xf32>
    %64 = arith.mulf %61, %63 : vector<64x8xf32>
    %65 = vector.extract_strided_slice %25 {offsets = [8, 0], sizes = [8, 32], strides = [1, 1]} : vector<32x32xf32> to vector<8x32xf32>
    %cst_30 = arith.constant dense<0.000000e+00> : vector<64x32xf32>
    %66 = tpu.matmul %64, %65, %cst_30 {dimension_numbers = #tpu.dot_dimension_numbers<[1], [0], [0], [1], [0, 0, 1, 1], [], []>} : vector<64x8xf32>, vector<8x32xf32>, vector<64x32xf32> -> vector<64x32xf32>
    %67 = arith.addf %47, %66 : vector<64x32xf32>
    %68 = vector.extract_strided_slice %27 {offsets = [0, 16], sizes = [64, 8], strides = [1, 1]} : vector<64x32xf32> to vector<64x8xf32>
    %69 = vector.extract_strided_slice %28 {offsets = [0, 16], sizes = [64, 8], strides = [1, 1]} : vector<64x32xf32> to vector<64x8xf32>
    %cst_31 = arith.constant dense<0.000000e+00> : vector<64x64xf32>
    %70 = tpu.matmul %68, %69, %cst_31 {dimension_numbers = #tpu.dot_dimension_numbers<[1], [1], [0], [0], [0, 0, 1, 0], [], []>} : vector<64x8xf32>, vector<64x8xf32>, vector<64x64xf32> -> vector<64x64xf32>
    %cst_32 = arith.constant 0.353553385 : f32
    %71 = vector.broadcast %cst_32 : f32 to vector<64x64xf32>
    %72 = arith.mulf %70, %71 : vector<64x64xf32>
    %cst_33 = arith.constant dense<0xFF800000> : vector<64xf32>
    %73 = vector.multi_reduction <maximumf>, %72, %cst_33 [1] : vector<64x64xf32> to vector<64xf32>
    %74 = vector.shape_cast %73 : vector<64xf32> to vector<64x1xf32>
    %75 = vector.broadcast %74 : vector<64x1xf32> to vector<64x64xf32>
    %76 = arith.subf %72, %75 : vector<64x64xf32>
    %77 = math.exp %76 : vector<64x64xf32>
    %cst_34 = arith.constant dense<0.000000e+00> : vector<64xf32>
    %78 = vector.multi_reduction <add>, %77, %cst_34 [1] : vector<64x64xf32> to vector<64xf32>
    %79 = vector.shape_cast %78 : vector<64xf32> to vector<64x1xf32>
    %80 = vector.extract_strided_slice %24 {offsets = [0, 16], sizes = [64, 8], strides = [1, 1]} : vector<64x32xf32> to vector<64x8xf32>
    %cst_35 = arith.constant dense<0.000000e+00> : vector<64x8xf32>
    %81 = tpu.matmul %77, %80, %cst_35 {dimension_numbers = #tpu.dot_dimension_numbers<[1], [0], [0], [1], [0, 0, 1, 1], [], []>} : vector<64x64xf32>, vector<64x8xf32>, vector<64x8xf32> -> vector<64x8xf32>
    %82 = tpu.reciprocal %79 {approx = true} : vector<64x1xf32> -> vector<64x1xf32>
    %83 = vector.broadcast %82 : vector<64x1xf32> to vector<64x8xf32>
    %84 = arith.mulf %81, %83 : vector<64x8xf32>
    %85 = vector.extract_strided_slice %25 {offsets = [16, 0], sizes = [8, 32], strides = [1, 1]} : vector<32x32xf32> to vector<8x32xf32>
    %cst_36 = arith.constant dense<0.000000e+00> : vector<64x32xf32>
    %86 = tpu.matmul %84, %85, %cst_36 {dimension_numbers = #tpu.dot_dimension_numbers<[1], [0], [0], [1], [0, 0, 1, 1], [], []>} : vector<64x8xf32>, vector<8x32xf32>, vector<64x32xf32> -> vector<64x32xf32>
    %87 = arith.addf %67, %86 : vector<64x32xf32>
    %88 = vector.extract_strided_slice %27 {offsets = [0, 24], sizes = [64, 8], strides = [1, 1]} : vector<64x32xf32> to vector<64x8xf32>
    %89 = vector.extract_strided_slice %28 {offsets = [0, 24], sizes = [64, 8], strides = [1, 1]} : vector<64x32xf32> to vector<64x8xf32>
    %cst_37 = arith.constant dense<0.000000e+00> : vector<64x64xf32>
    %90 = tpu.matmul %88, %89, %cst_37 {dimension_numbers = #tpu.dot_dimension_numbers<[1], [1], [0], [0], [0, 0, 1, 0], [], []>} : vector<64x8xf32>, vector<64x8xf32>, vector<64x64xf32> -> vector<64x64xf32>
    %cst_38 = arith.constant 0.353553385 : f32
    %91 = vector.broadcast %cst_38 : f32 to vector<64x64xf32>
    %92 = arith.mulf %90, %91 : vector<64x64xf32>
    %cst_39 = arith.constant dense<0xFF800000> : vector<64xf32>
    %93 = vector.multi_reduction <maximumf>, %92, %cst_39 [1] : vector<64x64xf32> to vector<64xf32>
    %94 = vector.shape_cast %93 : vector<64xf32> to vector<64x1xf32>
    %95 = vector.broadcast %94 : vector<64x1xf32> to vector<64x64xf32>
    %96 = arith.subf %92, %95 : vector<64x64xf32>
    %97 = math.exp %96 : vector<64x64xf32>
    %cst_40 = arith.constant dense<0.000000e+00> : vector<64xf32>
    %98 = vector.multi_reduction <add>, %97, %cst_40 [1] : vector<64x64xf32> to vector<64xf32>
    %99 = vector.shape_cast %98 : vector<64xf32> to vector<64x1xf32>
    %100 = vector.extract_strided_slice %24 {offsets = [0, 24], sizes = [64, 8], strides = [1, 1]} : vector<64x32xf32> to vector<64x8xf32>
    %cst_41 = arith.constant dense<0.000000e+00> : vector<64x8xf32>
    %101 = tpu.matmul %97, %100, %cst_41 {dimension_numbers = #tpu.dot_dimension_numbers<[1], [0], [0], [1], [0, 0, 1, 1], [], []>} : vector<64x64xf32>, vector<64x8xf32>, vector<64x8xf32> -> vector<64x8xf32>
    %102 = tpu.reciprocal %99 {approx = true} : vector<64x1xf32> -> vector<64x1xf32>
    %103 = vector.broadcast %102 : vector<64x1xf32> to vector<64x8xf32>
    %104 = arith.mulf %101, %103 : vector<64x8xf32>
    %105 = vector.extract_strided_slice %25 {offsets = [24, 0], sizes = [8, 32], strides = [1, 1]} : vector<32x32xf32> to vector<8x32xf32>
    %cst_42 = arith.constant dense<0.000000e+00> : vector<64x32xf32>
    %106 = tpu.matmul %104, %105, %cst_42 {dimension_numbers = #tpu.dot_dimension_numbers<[1], [0], [0], [1], [0, 0, 1, 1], [], []>} : vector<64x8xf32>, vector<8x32xf32>, vector<64x32xf32> -> vector<64x32xf32>
    %107 = arith.addf %87, %106 : vector<64x32xf32>
    %108 = vector.broadcast %26 : vector<1x32xf32> to vector<64x32xf32>
    %109 = arith.addf %107, %108 : vector<64x32xf32>
    %110 = arith.addf %13, %109 : vector<64x32xf32>
    %c23 = arith.constant 23 : index
    %c0_43 = arith.constant 0 : index
    %111 = vector.load %arg4[%c23, %c0_43] : memref<41x64xf32, #tpu.memory_space<vmem>>, vector<1x32xf32>
    %c24 = arith.constant 24 : index
    %c0_44 = arith.constant 0 : index
    %112 = vector.load %arg4[%c24, %c0_44] : memref<41x64xf32, #tpu.memory_space<vmem>>, vector<1x32xf32>
    %cst_45 = arith.constant dense<0.000000e+00> : vector<64xf32>
    %113 = vector.multi_reduction <add>, %110, %cst_45 [1] : vector<64x32xf32> to vector<64xf32>
    %114 = vector.shape_cast %113 : vector<64xf32> to vector<64x1xf32>
    %cst_46 = arith.constant 3.200000e+01 : f32
    %115 = vector.broadcast %cst_46 : f32 to vector<64x1xf32>
    %116 = arith.divf %114, %115 : vector<64x1xf32>
    %117 = vector.broadcast %116 : vector<64x1xf32> to vector<64x32xf32>
    %118 = arith.subf %110, %117 : vector<64x32xf32>
    %119 = arith.mulf %118, %118 : vector<64x32xf32>
    %cst_47 = arith.constant dense<0.000000e+00> : vector<64xf32>
    %120 = vector.multi_reduction <add>, %119, %cst_47 [1] : vector<64x32xf32> to vector<64xf32>
    %121 = vector.shape_cast %120 : vector<64xf32> to vector<64x1xf32>
    %cst_48 = arith.constant 3.200000e+01 : f32
    %122 = vector.broadcast %cst_48 : f32 to vector<64x1xf32>
    %123 = arith.divf %121, %122 : vector<64x1xf32>
    %cst_49 = arith.constant 9.99999974E-6 : f32
    %124 = vector.broadcast %cst_49 : f32 to vector<64x1xf32>
    %125 = arith.addf %123, %124 : vector<64x1xf32>
    %126 = math.rsqrt %125 : vector<64x1xf32>
    %127 = vector.broadcast %126 : vector<64x1xf32> to vector<64x32xf32>
    %128 = arith.mulf %118, %127 : vector<64x32xf32>
    %129 = vector.broadcast %111 : vector<1x32xf32> to vector<64x32xf32>
    %130 = arith.mulf %128, %129 : vector<64x32xf32>
    %131 = vector.broadcast %112 : vector<1x32xf32> to vector<64x32xf32>
    %132 = arith.addf %130, %131 : vector<64x32xf32>
    %c112 = arith.constant 112 : index
    %c0_50 = arith.constant 0 : index
    %133 = vector.load %arg3[%c112, %c0_50] : memref<496x64xf32, #tpu.memory_space<vmem>>, vector<32x64xf32>
    %c21 = arith.constant 21 : index
    %c0_51 = arith.constant 0 : index
    %134 = vector.load %arg4[%c21, %c0_51] : memref<41x64xf32, #tpu.memory_space<vmem>>, vector<1x64xf32>
    %c144 = arith.constant 144 : index
    %c0_52 = arith.constant 0 : index
    %135 = vector.load %arg3[%c144, %c0_52] : memref<496x64xf32, #tpu.memory_space<vmem>>, vector<64x32xf32>
    %c22 = arith.constant 22 : index
    %c0_53 = arith.constant 0 : index
    %136 = vector.load %arg4[%c22, %c0_53] : memref<41x64xf32, #tpu.memory_space<vmem>>, vector<1x32xf32>
    %cst_54 = arith.constant dense<0.000000e+00> : vector<64x64xf32>
    %137 = tpu.matmul %132, %133, %cst_54 {dimension_numbers = #tpu.dot_dimension_numbers<[1], [0], [0], [1], [0, 0, 1, 1], [], []>} : vector<64x32xf32>, vector<32x64xf32>, vector<64x64xf32> -> vector<64x64xf32>
    %138 = vector.broadcast %134 : vector<1x64xf32> to vector<64x64xf32>
    %139 = arith.addf %137, %138 : vector<64x64xf32>
    %cst_55 = arith.constant 0.000000e+00 : f32
    %140 = vector.broadcast %cst_55 : f32 to vector<64x64xf32>
    %141 = arith.maximumf %139, %140 : vector<64x64xf32>
    %cst_56 = arith.constant dense<0.000000e+00> : vector<64x32xf32>
    %142 = tpu.matmul %141, %135, %cst_56 {dimension_numbers = #tpu.dot_dimension_numbers<[1], [0], [0], [1], [0, 0, 1, 1], [], []>} : vector<64x64xf32>, vector<64x32xf32>, vector<64x32xf32> -> vector<64x32xf32>
    %143 = vector.broadcast %136 : vector<1x32xf32> to vector<64x32xf32>
    %144 = arith.addf %142, %143 : vector<64x32xf32>
    %145 = arith.addf %132, %144 : vector<64x32xf32>
    %c25 = arith.constant 25 : index
    %c0_57 = arith.constant 0 : index
    %146 = vector.load %arg4[%c25, %c0_57] : memref<41x64xf32, #tpu.memory_space<vmem>>, vector<1x32xf32>
    %c26 = arith.constant 26 : index
    %c0_58 = arith.constant 0 : index
    %147 = vector.load %arg4[%c26, %c0_58] : memref<41x64xf32, #tpu.memory_space<vmem>>, vector<1x32xf32>
    %cst_59 = arith.constant dense<0.000000e+00> : vector<64xf32>
    %148 = vector.multi_reduction <add>, %145, %cst_59 [1] : vector<64x32xf32> to vector<64xf32>
    %149 = vector.shape_cast %148 : vector<64xf32> to vector<64x1xf32>
    %cst_60 = arith.constant 3.200000e+01 : f32
    %150 = vector.broadcast %cst_60 : f32 to vector<64x1xf32>
    %151 = arith.divf %149, %150 : vector<64x1xf32>
    %152 = vector.broadcast %151 : vector<64x1xf32> to vector<64x32xf32>
    %153 = arith.subf %145, %152 : vector<64x32xf32>
    %154 = arith.mulf %153, %153 : vector<64x32xf32>
    %cst_61 = arith.constant dense<0.000000e+00> : vector<64xf32>
    %155 = vector.multi_reduction <add>, %154, %cst_61 [1] : vector<64x32xf32> to vector<64xf32>
    %156 = vector.shape_cast %155 : vector<64xf32> to vector<64x1xf32>
    %cst_62 = arith.constant 3.200000e+01 : f32
    %157 = vector.broadcast %cst_62 : f32 to vector<64x1xf32>
    %158 = arith.divf %156, %157 : vector<64x1xf32>
    %cst_63 = arith.constant 9.99999974E-6 : f32
    %159 = vector.broadcast %cst_63 : f32 to vector<64x1xf32>
    %160 = arith.addf %158, %159 : vector<64x1xf32>
    %161 = math.rsqrt %160 : vector<64x1xf32>
    %162 = vector.broadcast %161 : vector<64x1xf32> to vector<64x32xf32>
    %163 = arith.mulf %153, %162 : vector<64x32xf32>
    %164 = vector.broadcast %146 : vector<1x32xf32> to vector<64x32xf32>
    %165 = arith.mulf %163, %164 : vector<64x32xf32>
    %166 = vector.broadcast %147 : vector<1x32xf32> to vector<64x32xf32>
    %167 = arith.addf %165, %166 : vector<64x32xf32>
    %c0_64 = arith.constant 0 : index
    %c0_65 = arith.constant 0 : index
    %168 = vector.load %arg4[%c0_64, %c0_65] : memref<41x64xf32, #tpu.memory_space<vmem>>, vector<8x32xf32>
    %c8_66 = arith.constant 8 : index
    %c0_67 = arith.constant 0 : index
    %169 = vector.load %arg4[%c8_66, %c0_67] : memref<41x64xf32, #tpu.memory_space<vmem>>, vector<8x32xf32>
    %170 = arith.addf %167, %1 : vector<64x32xf32>
    %c208 = arith.constant 208 : index
    %c0_68 = arith.constant 0 : index
    %171 = vector.load %arg3[%c208, %c0_68] : memref<496x64xf32, #tpu.memory_space<vmem>>, vector<32x32xf32>
    %cst_69 = arith.constant dense<0.000000e+00> : vector<64x32xf32>
    %172 = tpu.matmul %170, %171, %cst_69 {dimension_numbers = #tpu.dot_dimension_numbers<[1], [0], [0], [1], [0, 0, 1, 1], [], []>} : vector<64x32xf32>, vector<32x32xf32>, vector<64x32xf32> -> vector<64x32xf32>
    %c27 = arith.constant 27 : index
    %c0_70 = arith.constant 0 : index
    %173 = vector.load %arg4[%c27, %c0_70] : memref<41x64xf32, #tpu.memory_space<vmem>>, vector<1x32xf32>
    %174 = vector.broadcast %173 : vector<1x32xf32> to vector<64x32xf32>
    %175 = arith.addf %172, %174 : vector<64x32xf32>
    %c240 = arith.constant 240 : index
    %c0_71 = arith.constant 0 : index
    %176 = vector.load %arg3[%c240, %c0_71] : memref<496x64xf32, #tpu.memory_space<vmem>>, vector<32x32xf32>
    %cst_72 = arith.constant dense<0.000000e+00> : vector<64x32xf32>
    %177 = tpu.matmul %167, %176, %cst_72 {dimension_numbers = #tpu.dot_dimension_numbers<[1], [0], [0], [1], [0, 0, 1, 1], [], []>} : vector<64x32xf32>, vector<32x32xf32>, vector<64x32xf32> -> vector<64x32xf32>
    %c28 = arith.constant 28 : index
    %c0_73 = arith.constant 0 : index
    %178 = vector.load %arg4[%c28, %c0_73] : memref<41x64xf32, #tpu.memory_space<vmem>>, vector<1x32xf32>
    %179 = vector.broadcast %178 : vector<1x32xf32> to vector<64x32xf32>
    %180 = arith.addf %177, %179 : vector<64x32xf32>
    %c272 = arith.constant 272 : index
    %c0_74 = arith.constant 0 : index
    %181 = vector.load %arg3[%c272, %c0_74] : memref<496x64xf32, #tpu.memory_space<vmem>>, vector<32x32xf32>
    %c29 = arith.constant 29 : index
    %c0_75 = arith.constant 0 : index
    %182 = vector.load %arg4[%c29, %c0_75] : memref<41x64xf32, #tpu.memory_space<vmem>>, vector<1x32xf32>
    %183 = vector.extract_strided_slice %169 {offsets = [0, 0], sizes = [8, 8], strides = [1, 1]} : vector<8x32xf32> to vector<8x8xf32>
    %184 = vector.extract_strided_slice %175 {offsets = [0, 0], sizes = [64, 8], strides = [1, 1]} : vector<64x32xf32> to vector<64x8xf32>
    %cst_76 = arith.constant dense<0.000000e+00> : vector<8x64xf32>
    %185 = tpu.matmul %183, %184, %cst_76 {dimension_numbers = #tpu.dot_dimension_numbers<[1], [1], [0], [0], [0, 0, 1, 0], [], []>} : vector<8x8xf32>, vector<64x8xf32>, vector<8x64xf32> -> vector<8x64xf32>
    %cst_77 = arith.constant 0.353553385 : f32
    %186 = vector.broadcast %cst_77 : f32 to vector<8x64xf32>
    %187 = arith.mulf %185, %186 : vector<8x64xf32>
    %cst_78 = arith.constant dense<0xFF800000> : vector<8xf32>
    %188 = vector.multi_reduction <maximumf>, %187, %cst_78 [1] : vector<8x64xf32> to vector<8xf32>
    %189 = vector.shape_cast %188 : vector<8xf32> to vector<8x1xf32>
    %190 = vector.broadcast %189 : vector<8x1xf32> to vector<8x64xf32>
    %191 = arith.subf %187, %190 : vector<8x64xf32>
    %192 = math.exp %191 : vector<8x64xf32>
    %cst_79 = arith.constant dense<0.000000e+00> : vector<8xf32>
    %193 = vector.multi_reduction <add>, %192, %cst_79 [1] : vector<8x64xf32> to vector<8xf32>
    %194 = vector.shape_cast %193 : vector<8xf32> to vector<8x1xf32>
    %195 = vector.extract_strided_slice %180 {offsets = [0, 0], sizes = [64, 8], strides = [1, 1]} : vector<64x32xf32> to vector<64x8xf32>
    %cst_80 = arith.constant dense<0.000000e+00> : vector<8x8xf32>
    %196 = tpu.matmul %192, %195, %cst_80 {dimension_numbers = #tpu.dot_dimension_numbers<[1], [0], [0], [1], [0, 0, 1, 1], [], []>} : vector<8x64xf32>, vector<64x8xf32>, vector<8x8xf32> -> vector<8x8xf32>
    %197 = tpu.reciprocal %194 {approx = true} : vector<8x1xf32> -> vector<8x1xf32>
    %198 = vector.broadcast %197 : vector<8x1xf32> to vector<8x8xf32>
    %199 = arith.mulf %196, %198 : vector<8x8xf32>
    %200 = vector.extract_strided_slice %181 {offsets = [0, 0], sizes = [8, 32], strides = [1, 1]} : vector<32x32xf32> to vector<8x32xf32>
    %cst_81 = arith.constant dense<0.000000e+00> : vector<8x32xf32>
    %201 = tpu.matmul %199, %200, %cst_81 {dimension_numbers = #tpu.dot_dimension_numbers<[1], [0], [0], [1], [0, 0, 1, 1], [], []>} : vector<8x8xf32>, vector<8x32xf32>, vector<8x32xf32> -> vector<8x32xf32>
    %202 = vector.extract_strided_slice %169 {offsets = [0, 8], sizes = [8, 8], strides = [1, 1]} : vector<8x32xf32> to vector<8x8xf32>
    %203 = vector.extract_strided_slice %175 {offsets = [0, 8], sizes = [64, 8], strides = [1, 1]} : vector<64x32xf32> to vector<64x8xf32>
    %cst_82 = arith.constant dense<0.000000e+00> : vector<8x64xf32>
    %204 = tpu.matmul %202, %203, %cst_82 {dimension_numbers = #tpu.dot_dimension_numbers<[1], [1], [0], [0], [0, 0, 1, 0], [], []>} : vector<8x8xf32>, vector<64x8xf32>, vector<8x64xf32> -> vector<8x64xf32>
    %cst_83 = arith.constant 0.353553385 : f32
    %205 = vector.broadcast %cst_83 : f32 to vector<8x64xf32>
    %206 = arith.mulf %204, %205 : vector<8x64xf32>
    %cst_84 = arith.constant dense<0xFF800000> : vector<8xf32>
    %207 = vector.multi_reduction <maximumf>, %206, %cst_84 [1] : vector<8x64xf32> to vector<8xf32>
    %208 = vector.shape_cast %207 : vector<8xf32> to vector<8x1xf32>
    %209 = vector.broadcast %208 : vector<8x1xf32> to vector<8x64xf32>
    %210 = arith.subf %206, %209 : vector<8x64xf32>
    %211 = math.exp %210 : vector<8x64xf32>
    %cst_85 = arith.constant dense<0.000000e+00> : vector<8xf32>
    %212 = vector.multi_reduction <add>, %211, %cst_85 [1] : vector<8x64xf32> to vector<8xf32>
    %213 = vector.shape_cast %212 : vector<8xf32> to vector<8x1xf32>
    %214 = vector.extract_strided_slice %180 {offsets = [0, 8], sizes = [64, 8], strides = [1, 1]} : vector<64x32xf32> to vector<64x8xf32>
    %cst_86 = arith.constant dense<0.000000e+00> : vector<8x8xf32>
    %215 = tpu.matmul %211, %214, %cst_86 {dimension_numbers = #tpu.dot_dimension_numbers<[1], [0], [0], [1], [0, 0, 1, 1], [], []>} : vector<8x64xf32>, vector<64x8xf32>, vector<8x8xf32> -> vector<8x8xf32>
    %216 = tpu.reciprocal %213 {approx = true} : vector<8x1xf32> -> vector<8x1xf32>
    %217 = vector.broadcast %216 : vector<8x1xf32> to vector<8x8xf32>
    %218 = arith.mulf %215, %217 : vector<8x8xf32>
    %219 = vector.extract_strided_slice %181 {offsets = [8, 0], sizes = [8, 32], strides = [1, 1]} : vector<32x32xf32> to vector<8x32xf32>
    %cst_87 = arith.constant dense<0.000000e+00> : vector<8x32xf32>
    %220 = tpu.matmul %218, %219, %cst_87 {dimension_numbers = #tpu.dot_dimension_numbers<[1], [0], [0], [1], [0, 0, 1, 1], [], []>} : vector<8x8xf32>, vector<8x32xf32>, vector<8x32xf32> -> vector<8x32xf32>
    %221 = arith.addf %201, %220 : vector<8x32xf32>
    %222 = vector.extract_strided_slice %169 {offsets = [0, 16], sizes = [8, 8], strides = [1, 1]} : vector<8x32xf32> to vector<8x8xf32>
    %223 = vector.extract_strided_slice %175 {offsets = [0, 16], sizes = [64, 8], strides = [1, 1]} : vector<64x32xf32> to vector<64x8xf32>
    %cst_88 = arith.constant dense<0.000000e+00> : vector<8x64xf32>
    %224 = tpu.matmul %222, %223, %cst_88 {dimension_numbers = #tpu.dot_dimension_numbers<[1], [1], [0], [0], [0, 0, 1, 0], [], []>} : vector<8x8xf32>, vector<64x8xf32>, vector<8x64xf32> -> vector<8x64xf32>
    %cst_89 = arith.constant 0.353553385 : f32
    %225 = vector.broadcast %cst_89 : f32 to vector<8x64xf32>
    %226 = arith.mulf %224, %225 : vector<8x64xf32>
    %cst_90 = arith.constant dense<0xFF800000> : vector<8xf32>
    %227 = vector.multi_reduction <maximumf>, %226, %cst_90 [1] : vector<8x64xf32> to vector<8xf32>
    %228 = vector.shape_cast %227 : vector<8xf32> to vector<8x1xf32>
    %229 = vector.broadcast %228 : vector<8x1xf32> to vector<8x64xf32>
    %230 = arith.subf %226, %229 : vector<8x64xf32>
    %231 = math.exp %230 : vector<8x64xf32>
    %cst_91 = arith.constant dense<0.000000e+00> : vector<8xf32>
    %232 = vector.multi_reduction <add>, %231, %cst_91 [1] : vector<8x64xf32> to vector<8xf32>
    %233 = vector.shape_cast %232 : vector<8xf32> to vector<8x1xf32>
    %234 = vector.extract_strided_slice %180 {offsets = [0, 16], sizes = [64, 8], strides = [1, 1]} : vector<64x32xf32> to vector<64x8xf32>
    %cst_92 = arith.constant dense<0.000000e+00> : vector<8x8xf32>
    %235 = tpu.matmul %231, %234, %cst_92 {dimension_numbers = #tpu.dot_dimension_numbers<[1], [0], [0], [1], [0, 0, 1, 1], [], []>} : vector<8x64xf32>, vector<64x8xf32>, vector<8x8xf32> -> vector<8x8xf32>
    %236 = tpu.reciprocal %233 {approx = true} : vector<8x1xf32> -> vector<8x1xf32>
    %237 = vector.broadcast %236 : vector<8x1xf32> to vector<8x8xf32>
    %238 = arith.mulf %235, %237 : vector<8x8xf32>
    %239 = vector.extract_strided_slice %181 {offsets = [16, 0], sizes = [8, 32], strides = [1, 1]} : vector<32x32xf32> to vector<8x32xf32>
    %cst_93 = arith.constant dense<0.000000e+00> : vector<8x32xf32>
    %240 = tpu.matmul %238, %239, %cst_93 {dimension_numbers = #tpu.dot_dimension_numbers<[1], [0], [0], [1], [0, 0, 1, 1], [], []>} : vector<8x8xf32>, vector<8x32xf32>, vector<8x32xf32> -> vector<8x32xf32>
    %241 = arith.addf %221, %240 : vector<8x32xf32>
    %242 = vector.extract_strided_slice %169 {offsets = [0, 24], sizes = [8, 8], strides = [1, 1]} : vector<8x32xf32> to vector<8x8xf32>
    %243 = vector.extract_strided_slice %175 {offsets = [0, 24], sizes = [64, 8], strides = [1, 1]} : vector<64x32xf32> to vector<64x8xf32>
    %cst_94 = arith.constant dense<0.000000e+00> : vector<8x64xf32>
    %244 = tpu.matmul %242, %243, %cst_94 {dimension_numbers = #tpu.dot_dimension_numbers<[1], [1], [0], [0], [0, 0, 1, 0], [], []>} : vector<8x8xf32>, vector<64x8xf32>, vector<8x64xf32> -> vector<8x64xf32>
    %cst_95 = arith.constant 0.353553385 : f32
    %245 = vector.broadcast %cst_95 : f32 to vector<8x64xf32>
    %246 = arith.mulf %244, %245 : vector<8x64xf32>
    %cst_96 = arith.constant dense<0xFF800000> : vector<8xf32>
    %247 = vector.multi_reduction <maximumf>, %246, %cst_96 [1] : vector<8x64xf32> to vector<8xf32>
    %248 = vector.shape_cast %247 : vector<8xf32> to vector<8x1xf32>
    %249 = vector.broadcast %248 : vector<8x1xf32> to vector<8x64xf32>
    %250 = arith.subf %246, %249 : vector<8x64xf32>
    %251 = math.exp %250 : vector<8x64xf32>
    %cst_97 = arith.constant dense<0.000000e+00> : vector<8xf32>
    %252 = vector.multi_reduction <add>, %251, %cst_97 [1] : vector<8x64xf32> to vector<8xf32>
    %253 = vector.shape_cast %252 : vector<8xf32> to vector<8x1xf32>
    %254 = vector.extract_strided_slice %180 {offsets = [0, 24], sizes = [64, 8], strides = [1, 1]} : vector<64x32xf32> to vector<64x8xf32>
    %cst_98 = arith.constant dense<0.000000e+00> : vector<8x8xf32>
    %255 = tpu.matmul %251, %254, %cst_98 {dimension_numbers = #tpu.dot_dimension_numbers<[1], [0], [0], [1], [0, 0, 1, 1], [], []>} : vector<8x64xf32>, vector<64x8xf32>, vector<8x8xf32> -> vector<8x8xf32>
    %256 = tpu.reciprocal %253 {approx = true} : vector<8x1xf32> -> vector<8x1xf32>
    %257 = vector.broadcast %256 : vector<8x1xf32> to vector<8x8xf32>
    %258 = arith.mulf %255, %257 : vector<8x8xf32>
    %259 = vector.extract_strided_slice %181 {offsets = [24, 0], sizes = [8, 32], strides = [1, 1]} : vector<32x32xf32> to vector<8x32xf32>
    %cst_99 = arith.constant dense<0.000000e+00> : vector<8x32xf32>
    %260 = tpu.matmul %258, %259, %cst_99 {dimension_numbers = #tpu.dot_dimension_numbers<[1], [0], [0], [1], [0, 0, 1, 1], [], []>} : vector<8x8xf32>, vector<8x32xf32>, vector<8x32xf32> -> vector<8x32xf32>
    %261 = arith.addf %241, %260 : vector<8x32xf32>
    %262 = vector.broadcast %182 : vector<1x32xf32> to vector<8x32xf32>
    %263 = arith.addf %261, %262 : vector<8x32xf32>
    %264 = arith.addf %168, %263 : vector<8x32xf32>
    %c35 = arith.constant 35 : index
    %c0_100 = arith.constant 0 : index
    %265 = vector.load %arg4[%c35, %c0_100] : memref<41x64xf32, #tpu.memory_space<vmem>>, vector<1x32xf32>
    %c36 = arith.constant 36 : index
    %c0_101 = arith.constant 0 : index
    %266 = vector.load %arg4[%c36, %c0_101] : memref<41x64xf32, #tpu.memory_space<vmem>>, vector<1x32xf32>
    %cst_102 = arith.constant dense<0.000000e+00> : vector<8xf32>
    %267 = vector.multi_reduction <add>, %264, %cst_102 [1] : vector<8x32xf32> to vector<8xf32>
    %268 = vector.shape_cast %267 : vector<8xf32> to vector<8x1xf32>
    %cst_103 = arith.constant 3.200000e+01 : f32
    %269 = vector.broadcast %cst_103 : f32 to vector<8x1xf32>
    %270 = arith.divf %268, %269 : vector<8x1xf32>
    %271 = vector.broadcast %270 : vector<8x1xf32> to vector<8x32xf32>
    %272 = arith.subf %264, %271 : vector<8x32xf32>
    %273 = arith.mulf %272, %272 : vector<8x32xf32>
    %cst_104 = arith.constant dense<0.000000e+00> : vector<8xf32>
    %274 = vector.multi_reduction <add>, %273, %cst_104 [1] : vector<8x32xf32> to vector<8xf32>
    %275 = vector.shape_cast %274 : vector<8xf32> to vector<8x1xf32>
    %cst_105 = arith.constant 3.200000e+01 : f32
    %276 = vector.broadcast %cst_105 : f32 to vector<8x1xf32>
    %277 = arith.divf %275, %276 : vector<8x1xf32>
    %cst_106 = arith.constant 9.99999974E-6 : f32
    %278 = vector.broadcast %cst_106 : f32 to vector<8x1xf32>
    %279 = arith.addf %277, %278 : vector<8x1xf32>
    %280 = math.rsqrt %279 : vector<8x1xf32>
    %281 = vector.broadcast %280 : vector<8x1xf32> to vector<8x32xf32>
    %282 = arith.mulf %272, %281 : vector<8x32xf32>
    %283 = vector.broadcast %265 : vector<1x32xf32> to vector<8x32xf32>
    %284 = arith.mulf %282, %283 : vector<8x32xf32>
    %285 = vector.broadcast %266 : vector<1x32xf32> to vector<8x32xf32>
    %286 = arith.addf %284, %285 : vector<8x32xf32>
    %c304 = arith.constant 304 : index
    %c0_107 = arith.constant 0 : index
    %287 = vector.load %arg3[%c304, %c0_107] : memref<496x64xf32, #tpu.memory_space<vmem>>, vector<32x64xf32>
    %c30 = arith.constant 30 : index
    %c0_108 = arith.constant 0 : index
    %288 = vector.load %arg4[%c30, %c0_108] : memref<41x64xf32, #tpu.memory_space<vmem>>, vector<1x64xf32>
    %c336 = arith.constant 336 : index
    %c0_109 = arith.constant 0 : index
    %289 = vector.load %arg3[%c336, %c0_109] : memref<496x64xf32, #tpu.memory_space<vmem>>, vector<64x32xf32>
    %c31 = arith.constant 31 : index
    %c0_110 = arith.constant 0 : index
    %290 = vector.load %arg4[%c31, %c0_110] : memref<41x64xf32, #tpu.memory_space<vmem>>, vector<1x32xf32>
    %cst_111 = arith.constant dense<0.000000e+00> : vector<8x64xf32>
    %291 = tpu.matmul %286, %287, %cst_111 {dimension_numbers = #tpu.dot_dimension_numbers<[1], [0], [0], [1], [0, 0, 1, 1], [], []>} : vector<8x32xf32>, vector<32x64xf32>, vector<8x64xf32> -> vector<8x64xf32>
    %292 = vector.broadcast %288 : vector<1x64xf32> to vector<8x64xf32>
    %293 = arith.addf %291, %292 : vector<8x64xf32>
    %cst_112 = arith.constant 0.000000e+00 : f32
    %294 = vector.broadcast %cst_112 : f32 to vector<8x64xf32>
    %295 = arith.maximumf %293, %294 : vector<8x64xf32>
    %cst_113 = arith.constant dense<0.000000e+00> : vector<8x32xf32>
    %296 = tpu.matmul %295, %289, %cst_113 {dimension_numbers = #tpu.dot_dimension_numbers<[1], [0], [0], [1], [0, 0, 1, 1], [], []>} : vector<8x64xf32>, vector<64x32xf32>, vector<8x32xf32> -> vector<8x32xf32>
    %297 = vector.broadcast %290 : vector<1x32xf32> to vector<8x32xf32>
    %298 = arith.addf %296, %297 : vector<8x32xf32>
    %299 = arith.addf %286, %298 : vector<8x32xf32>
    %c37 = arith.constant 37 : index
    %c0_114 = arith.constant 0 : index
    %300 = vector.load %arg4[%c37, %c0_114] : memref<41x64xf32, #tpu.memory_space<vmem>>, vector<1x32xf32>
    %c38 = arith.constant 38 : index
    %c0_115 = arith.constant 0 : index
    %301 = vector.load %arg4[%c38, %c0_115] : memref<41x64xf32, #tpu.memory_space<vmem>>, vector<1x32xf32>
    %cst_116 = arith.constant dense<0.000000e+00> : vector<8xf32>
    %302 = vector.multi_reduction <add>, %299, %cst_116 [1] : vector<8x32xf32> to vector<8xf32>
    %303 = vector.shape_cast %302 : vector<8xf32> to vector<8x1xf32>
    %cst_117 = arith.constant 3.200000e+01 : f32
    %304 = vector.broadcast %cst_117 : f32 to vector<8x1xf32>
    %305 = arith.divf %303, %304 : vector<8x1xf32>
    %306 = vector.broadcast %305 : vector<8x1xf32> to vector<8x32xf32>
    %307 = arith.subf %299, %306 : vector<8x32xf32>
    %308 = arith.mulf %307, %307 : vector<8x32xf32>
    %cst_118 = arith.constant dense<0.000000e+00> : vector<8xf32>
    %309 = vector.multi_reduction <add>, %308, %cst_118 [1] : vector<8x32xf32> to vector<8xf32>
    %310 = vector.shape_cast %309 : vector<8xf32> to vector<8x1xf32>
    %cst_119 = arith.constant 3.200000e+01 : f32
    %311 = vector.broadcast %cst_119 : f32 to vector<8x1xf32>
    %312 = arith.divf %310, %311 : vector<8x1xf32>
    %cst_120 = arith.constant 9.99999974E-6 : f32
    %313 = vector.broadcast %cst_120 : f32 to vector<8x1xf32>
    %314 = arith.addf %312, %313 : vector<8x1xf32>
    %315 = math.rsqrt %314 : vector<8x1xf32>
    %316 = vector.broadcast %315 : vector<8x1xf32> to vector<8x32xf32>
    %317 = arith.mulf %307, %316 : vector<8x32xf32>
    %318 = vector.broadcast %300 : vector<1x32xf32> to vector<8x32xf32>
    %319 = arith.mulf %317, %318 : vector<8x32xf32>
    %320 = vector.broadcast %301 : vector<1x32xf32> to vector<8x32xf32>
    %321 = arith.addf %319, %320 : vector<8x32xf32>
    %c39 = arith.constant 39 : index
    %c0_121 = arith.constant 0 : index
    %322 = vector.load %arg4[%c39, %c0_121] : memref<41x64xf32, #tpu.memory_space<vmem>>, vector<1x32xf32>
    %c40 = arith.constant 40 : index
    %c0_122 = arith.constant 0 : index
    %323 = vector.load %arg4[%c40, %c0_122] : memref<41x64xf32, #tpu.memory_space<vmem>>, vector<1x32xf32>
    %cst_123 = arith.constant dense<0.000000e+00> : vector<8xf32>
    %324 = vector.multi_reduction <add>, %321, %cst_123 [1] : vector<8x32xf32> to vector<8xf32>
    %325 = vector.shape_cast %324 : vector<8xf32> to vector<8x1xf32>
    %cst_124 = arith.constant 3.200000e+01 : f32
    %326 = vector.broadcast %cst_124 : f32 to vector<8x1xf32>
    %327 = arith.divf %325, %326 : vector<8x1xf32>
    %328 = vector.broadcast %327 : vector<8x1xf32> to vector<8x32xf32>
    %329 = arith.subf %321, %328 : vector<8x32xf32>
    %330 = arith.mulf %329, %329 : vector<8x32xf32>
    %cst_125 = arith.constant dense<0.000000e+00> : vector<8xf32>
    %331 = vector.multi_reduction <add>, %330, %cst_125 [1] : vector<8x32xf32> to vector<8xf32>
    %332 = vector.shape_cast %331 : vector<8xf32> to vector<8x1xf32>
    %cst_126 = arith.constant 3.200000e+01 : f32
    %333 = vector.broadcast %cst_126 : f32 to vector<8x1xf32>
    %334 = arith.divf %332, %333 : vector<8x1xf32>
    %cst_127 = arith.constant 9.99999974E-6 : f32
    %335 = vector.broadcast %cst_127 : f32 to vector<8x1xf32>
    %336 = arith.addf %334, %335 : vector<8x1xf32>
    %337 = math.rsqrt %336 : vector<8x1xf32>
    %338 = vector.broadcast %337 : vector<8x1xf32> to vector<8x32xf32>
    %339 = arith.mulf %329, %338 : vector<8x32xf32>
    %340 = vector.broadcast %322 : vector<1x32xf32> to vector<8x32xf32>
    %341 = arith.mulf %339, %340 : vector<8x32xf32>
    %342 = vector.broadcast %323 : vector<1x32xf32> to vector<8x32xf32>
    %343 = arith.addf %341, %342 : vector<8x32xf32>
    %c400 = arith.constant 400 : index
    %c0_128 = arith.constant 0 : index
    %344 = vector.load %arg3[%c400, %c0_128] : memref<496x64xf32, #tpu.memory_space<vmem>>, vector<32x38xf32>
    %cst_129 = arith.constant dense<0.000000e+00> : vector<8x38xf32>
    %345 = tpu.matmul %343, %344, %cst_129 {dimension_numbers = #tpu.dot_dimension_numbers<[1], [0], [0], [1], [0, 0, 1, 1], [], []>} : vector<8x32xf32>, vector<32x38xf32>, vector<8x38xf32> -> vector<8x38xf32>
    %c32 = arith.constant 32 : index
    %c0_130 = arith.constant 0 : index
    %346 = vector.load %arg4[%c32, %c0_130] : memref<41x64xf32, #tpu.memory_space<vmem>>, vector<1x38xf32>
    %347 = vector.broadcast %346 : vector<1x38xf32> to vector<8x38xf32>
    %348 = arith.addf %345, %347 : vector<8x38xf32>
    %349 = vector.extract_strided_slice %348 {offsets = [0, 0], sizes = [8, 32], strides = [1, 1]} : vector<8x38xf32> to vector<8x32xf32>
    %cst_131 = arith.constant 0.000000e+00 : f32
    %350 = vector.broadcast %cst_131 : f32 to vector<8x32xf32>
    %351 = arith.maximumf %349, %350 : vector<8x32xf32>
    %352 = vector.extract_strided_slice %348 {offsets = [0, 32], sizes = [8, 6], strides = [1, 1]} : vector<8x38xf32> to vector<8x6xf32>
    %c432 = arith.constant 432 : index
    %c0_132 = arith.constant 0 : index
    %353 = vector.load %arg3[%c432, %c0_132] : memref<496x64xf32, #tpu.memory_space<vmem>>, vector<32x32xf32>
    %cst_133 = arith.constant dense<0.000000e+00> : vector<8x32xf32>
    %354 = tpu.matmul %351, %353, %cst_133 {dimension_numbers = #tpu.dot_dimension_numbers<[1], [0], [0], [1], [0, 0, 1, 1], [], []>} : vector<8x32xf32>, vector<32x32xf32>, vector<8x32xf32> -> vector<8x32xf32>
    %c33 = arith.constant 33 : index
    %c0_134 = arith.constant 0 : index
    %355 = vector.load %arg4[%c33, %c0_134] : memref<41x64xf32, #tpu.memory_space<vmem>>, vector<1x32xf32>
    %356 = vector.broadcast %355 : vector<1x32xf32> to vector<8x32xf32>
    %357 = arith.addf %354, %356 : vector<8x32xf32>
    %cst_135 = arith.constant 0.000000e+00 : f32
    %358 = vector.broadcast %cst_135 : f32 to vector<8x32xf32>
    %359 = arith.maximumf %357, %358 : vector<8x32xf32>
    %c464 = arith.constant 464 : index
    %c0_136 = arith.constant 0 : index
    %360 = vector.load %arg3[%c464, %c0_136] : memref<496x64xf32, #tpu.memory_space<vmem>>, vector<32x4xf32>
    %cst_137 = arith.constant dense<0.000000e+00> : vector<8x4xf32>
    %361 = tpu.matmul %359, %360, %cst_137 {dimension_numbers = #tpu.dot_dimension_numbers<[1], [0], [0], [1], [0, 0, 1, 1], [], []>} : vector<8x32xf32>, vector<32x4xf32>, vector<8x4xf32> -> vector<8x4xf32>
    %c34 = arith.constant 34 : index
    %c0_138 = arith.constant 0 : index
    %362 = vector.load %arg4[%c34, %c0_138] : memref<41x64xf32, #tpu.memory_space<vmem>>, vector<1x4xf32>
    %363 = vector.broadcast %362 : vector<1x4xf32> to vector<8x4xf32>
    %364 = arith.addf %361, %363 : vector<8x4xf32>
    %365 = arith.negf %364 : vector<8x4xf32>
    %366 = math.exp %365 : vector<8x4xf32>
    %cst_139 = arith.constant 1.000000e+00 : f32
    %367 = vector.broadcast %cst_139 : f32 to vector<8x4xf32>
    %368 = arith.addf %367, %366 : vector<8x4xf32>
    %369 = arith.divf %367, %368 : vector<8x4xf32>
    %cst_140 = arith.constant 0.000000e+00 : f32
    %370 = vector.broadcast %cst_140 : f32 to vector<8x128xf32>
    %c0_141 = arith.constant 0 : index
    %c0_142 = arith.constant 0 : index
    %371 = vector.load %arg5[%c0_141, %c0_142] : memref<8x128xf32, #tpu.memory_space<vmem>>, vector<8x128xf32>
    tpu.vector_store %arg5[%c0_141, %c0_142], %370 {strides = array<i32>} : memref<8x128xf32, #tpu.memory_space<vmem>>, vector<8x128xf32>,
    %c0_143 = arith.constant 0 : index
    %c0_144 = arith.constant 0 : index
    %372 = vector.load %arg5[%c0_143, %c0_144] : memref<8x128xf32, #tpu.memory_space<vmem>>, vector<8x6xf32>
    tpu.vector_store %arg5[%c0_143, %c0_144], %352 {strides = array<i32>} : memref<8x128xf32, #tpu.memory_space<vmem>>, vector<8x6xf32>,
    %c0_145 = arith.constant 0 : index
    %c6 = arith.constant 6 : index
    %373 = vector.load %arg5[%c0_145, %c6] : memref<8x128xf32, #tpu.memory_space<vmem>>, vector<8x4xf32>
    tpu.vector_store %arg5[%c0_145, %c6], %369 {strides = array<i32>} : memref<8x128xf32, #tpu.memory_space<vmem>>, vector<8x4xf32>,
    return
  }
  func.func @transform_0(%arg0: i32) -> (i32, i32) {
    %c0_i32 = arith.constant 0 : i32
    %c0_i32_0 = arith.constant 0 : i32
    return %arg0, %c0_i32 : i32, i32
  }
  func.func @transform_1(%arg0: i32) -> (i32, i32) {
    %c0_i32 = arith.constant 0 : i32
    %c0_i32_0 = arith.constant 0 : i32
    %c0_i32_1 = arith.constant 0 : i32
    return %c0_i32, %c0_i32_0 : i32, i32
  }
  func.func @transform_2(%arg0: i32) -> (i32, i32) {
    %c0_i32 = arith.constant 0 : i32
    %c0_i32_0 = arith.constant 0 : i32
    %c0_i32_1 = arith.constant 0 : i32
    return %c0_i32, %c0_i32_0 : i32, i32
  }
  func.func @transform_3(%arg0: i32) -> (i32, i32) {
    %c0_i32 = arith.constant 0 : i32
    %c0_i32_0 = arith.constant 0 : i32
    %c0_i32_1 = arith.constant 0 : i32
    return %c0_i32, %c0_i32_0 : i32, i32
  }
  func.func @transform_4(%arg0: i32) -> (i32, i32) {
    %c0_i32 = arith.constant 0 : i32
    %c0_i32_0 = arith.constant 0 : i32
    return %arg0, %c0_i32 : i32, i32
  }
}

</mosaic_0001>

<bundles_post_ra>
// kernel: detr_forward.1
= control target key start
LH: loop header
LB: loop body
LE: loop exit
PB: predicated region body
PF: predicated region fallthrough
CT: control target
= control target key end

     0   :  { %s7752_s15 = smov 0   ;;  %s9218_s0 = inlined_call_operand.vmem [shape: f32[128,8], index: 0, kind: input, shape index: {}]   ;;  %s9219_s1 = inlined_call_operand.vmem [shape: f32[64,32], index: 1, kind: input, shape index: {}]   ;;  %s9220_s2 = inlined_call_operand.vmem [shape: f32[496,64], index: 2, kind: input, shape index: {}]   ;;  %s9221_s3 = inlined_call_operand.vmem [shape: f32[41,64], index: 3, kind: input, shape index: {}]   ;;  %s9222_s4 = inlined_call_operand.vmem [shape: f32[16,128], index: 4, kind: output, shape index: {}]  }
   0x1 LB: > { %s7758_s16 = sadd.s32 4294967295, %s7714_s15   ;;  %p5536_p0 = scmp.ge.s32.totalorder %s7714_s15, 1  ;;  %s7714_s15 = sphi %s7752_s15, %s14_s15  }
   0x2   : > { %p163_p1 = scmp.lt.s32.totalorder %s7714_s15, 3 }
   0x4   : > { %p164_p2 = pnand %p5536_p0, %p163_p1 }
   0x5   : > { %v214_v0 = vld [vmem:[%s9220_s2] sm:$0xff] (!%p164_p2)  ;;  %s5537_s19 = sshll.u32 (!%p164_p2), %s7758_s16, 3  ;;  %vm220_vm0 = vcmask (!%p164_p2), 64512   ;;  %v358_v9 = vld [vmem:[%s9220_s2 + $0x8] sm:$0xff] (!%p164_p2)  ;;  %v501_v10 = vld [vmem:[%s9220_s2 + $0x10] sm:$0xff] (!%p164_p2)  ;;  %vm510_vm1 = vcmask (!%p164_p2), 261120  }
   0x6   : > { %167 = sbr.rel (%p164_p2) target bundleno = 8512 (0x2140), region = 36  ;;  %6176 = vmatprep.subr.mxu0 (!%p164_p2), %v214_v0  ;;  %p189_p3 = scmp.lt.s32.totalorder (!%p164_p2), %s5537_s19, 15  ;;  %6190 = vmatprep.subr.mxu1 (!%p164_p2), %v358_v9  ;;  %v502_v11 = vld [vmem:[%s9220_s2 + $0x18] sm:$0xff] (!%p164_p2)  ;;  %v640_v12 = vld [vmem:[%s9220_s2 + $0x30] sm:$0xff] (!%p164_p2)  ;;  %v503_v15 = vld [vmem:[%s9220_s2 + $0x20] sm:$0xff] (!%p164_p2)  ;;  %vm952_vm3 = vcmask (!%p164_p2), 523264  }
   0x7   : > { %6177 = vmatpush3.msra.mxu0 (!%p164_p2), %v214_v0  ;;  %6191 = vmatpush3.msra.mxu1 (!%p164_p2), %v358_v9  ;;  %v6847_v13 = vpack.c.bf16 (!%p164_p2), %v502_v11, %v501_v10  ;;  %v641_v14 = vld [vmem:[%s9220_s2 + $0x38] sm:$0xff] (!%p164_p2)  ;;  %v504_v16 = vld [vmem:[%s9220_s2 + $0x28] sm:$0xff] (!%p164_p2)  ;;  %v5540_v19 = vld [vmem:[%s9221_s3 + $0x10] ss:$0 sm:$0xff] (!%p164_p2)  ;;  %s7716_s18 = smov (!%p164_p2), 96   ;;  %s7719_s21 = smov (!%p164_p2), 80  }
   0x8   : > { %v6855_v17 = vpack.c.bf16 (!%p164_p2), %v641_v14, %v640_v12  ;;  %v6851_v18 = vpack.c.bf16 (!%p164_p2), %v504_v16, %v503_v15  ;;  %v642_v44 = vld [vmem:[%s9220_s2 + $0x40] sm:$0xff] (!%p164_p2)  ;;  %v643_v45 = vld [vmem:[%s9220_s2 + $0x48] sm:$0xff] (!%p164_p2)  ;;  %v5549_v47 = vld [vmem:[%s9221_s3 + $0x11] ss:$0 sm:$0xff] (!%p164_p2)  ;;  %s7720_s22 = smov (!%p164_p2), 112   ;;  %s7722_s24 = smov (!%p164_p2), 104  }
   0x9   : > { %6848 = vmatprep.subr.bf16.mxu0 (!%p164_p2), %v6847_v13  ;;  %v6859_v46 = vpack.c.bf16 (!%p164_p2), %v643_v45, %v642_v44  ;;  %v206_v50 = vld [vmem:[%s9219_s1] sm:$0xff] (!%p164_p2)  ;;  %v207_v52 = vld [vmem:[%s9219_s1 + $0x8] sm:$0xff] (!%p164_p2)  ;;  %v209_v55 = vld [vmem:[%s9219_s1 + $0x18] sm:$0xff] (!%p164_p2)  ;;  %vm7724_vm4 = vmmov (!%p164_p2), 0   ;;  %p194_p4 = scmp.lt.s32.totalorder (!%p164_p2), %s7758_s16, 1  ;;  %vm5471_vm5 = vcmask (!%p164_p2), 48128  }
   0xa   : > { %6856 = vmatprep.subr.bf16.mxu1 (!%p164_p2), %v6855_v17  ;;  %v208_v59 = vld [vmem:[%s9219_s1 + $0x10] sm:$0xff] (!%p164_p2)  ;;  %v211_v0 = vld [vmem:[%s9219_s1 + $0x28] sm:$0xff] (!%p164_p2)  ;;  %vm7952_vm2 = vmpackc.low (!%p164_p2), %vm220_vm0, %vm220_vm0  ;;  %s7726_s17 = smov (!%p164_p2), 6   ;;  %vm5477_vm6 = vcmask (!%p164_p2), 80944  }
   0xb   : > { %v212_v11 = vld [vmem:[%s9219_s1 + $0x30] sm:$0xff] (!%p164_p2) }
   0xc   : > { %v5567_v16 = vld [vmem:[%s9221_s3 + $0x13] ss:$0 sm:$0xff] (!%p164_p2) }
   0xd   : > { %s9226_s19 = smov (!%p189_p3, %s5537_s19), 15  ;;  %s9228_s16 = smov (!%p194_p4, %s7758_s16), 1 }
   0xe   : > { %s5538_s20 = sshll.u32 %s9226_s19, 3  ;;  %s7717_s19 = smov 88  }
   0xf   : > { %s192_s23 = scalar_lea.vmem %s9218_s0, %s5538_s20  ;;  %s7718_s20 = smov 120  }
  0x10   : > { %v198_v1 = vld [vmem:[%s192_s23] sm:$0xff]  ;;  %v199_v2 = vld [vmem:[%s192_s23 + $0x8] sm:$0xff]  ;;  %v200_v3 = vld [vmem:[%s192_s23 + $0x10] sm:$0xff]  ;;  %s5539_s28 = sshll.u32 %s9228_s16, 3 }
  0x11   : > { %6178 = vmatprep.mubr.msk.f32.mxu0 %vm220_vm0, %v198_v1  ;;  %v201_v4 = vld [vmem:[%s192_s23 + $0x18] sm:$0xff]  ;;  %v202_v5 = vld [vmem:[%s192_s23 + $0x20] sm:$0xff]  ;;  %v203_v6 = vld [vmem:[%s192_s23 + $0x28] sm:$0xff]  ;;  %s9184_s30 = scalar_lea.vmem %s9222_s4, %s5539_s28 }
  0x12   : > { %6179 = vmatmul.mubr.msk.f32.vlgmr.msra.gmra.mrb[0].mxu0 %vm220_vm0, %v199_v2  ;;  %v204_v7 = vld [vmem:[%s192_s23 + $0x30] sm:$0xff]  ;;  %v205_v8 = vld [vmem:[%s192_s23 + $0x38] sm:$0xff]  ;;  %s7721_s23 = smov 72  }
  0x13   : > { %6181 = vmatprep.mubr.msk.f32.mxu0 %vm220_vm0, %v200_v3  ;;  %6850 = vmatpush3.bf16.msra.mxu0 %v6847_v13  ;;  %v210_v3 = vld [vmem:[%s9219_s1 + $0x20] sm:$0xff] }
  0x14   : > { %6852 = vmatprep.subr.bf16.mxu0 %v6851_v18 }
  0x16   : > { %6182 = vmatmul.mubr.msk.f32.gmra.mrb[2].mxu0 %vm220_vm0, %v201_v4 }
  0x17   : > { %6184 = vmatprep.mubr.msk.f32.mxu0 %vm220_vm0, %v202_v5  ;;  %6854 = vmatpush3.bf16.msra.mxu0 %v6851_v18  ;;  %v5558_v18 = vld [vmem:[%s9221_s3 + $0x12] ss:$0 sm:$0xff] }
  0x1a   : > { %6185 = vmatmul.mubr.msk.f32.gmra.mrb[4].mxu0 %vm220_vm0, %v203_v6 }
  0x1b   : > { %6187 = vmatprep.mubr.msk.f32.mxu0 %vm220_vm0, %v204_v7 }
  0x1e   : > { %6188 = vmatmul.mubr.msk.f32.gmra.mrb[6].mxu0 %vm220_vm0, %v205_v8  ;;  %v213_v8 = vld [vmem:[%s9219_s1 + $0x38] sm:$0xff] }
  0xe5   : > { %v6180_v20 = vpop.f32.mrb[0].mxu0 }
  0xe6   : > { %v317_v21 = vadd.f32 %v6180_v20, %v5540_v19  ;;  %v311_v22 = vpop.f32.mrb[1].mxu0 }
  0xe7   : > { %v312_v23 = vadd.f32 %v5540_v19, %v311_v22 }
  0xe8   : > { %v351_v26 = vmax.f32 %v317_v21, 0.0 }
  0xe9   : > { %v350_v24 = vmax.f32 %v312_v23, 0.0  ;;  %v6183_v25 = vpop.f32.mrb[2].mxu0 }
  0xea   : > { %v327_v27 = vadd.f32 %v6183_v25, %v5540_v19  ;;  %v321_v28 = vpop.f32.mrb[3].mxu0 }
  0xeb   : > { %v322_v29 = vadd.f32 %v5540_v19, %v321_v28  ;;  %6192 = vmatprep.mubr.msk.f32.mxu1 %vm220_vm0, %v350_v24 }
  0xec   : > { %v353_v30 = vmax.f32 %v327_v27, 0.0  ;;  %6193 = vmatmul.mubr.msk.f32.vlgmr.msra.gmra.mrb[0].mxu1 %vm220_vm0, %v351_v26 }
  0xed   : > { %v352_v31 = vmax.f32 %v322_v29, 0.0  ;;  %v6186_v32 = vpop.f32.mrb[4].mxu0  ;;  %6858 = vmatpush3.bf16.msra.mxu1 %v6855_v17 }
  0xee   : > { %v337_v33 = vadd.f32 %v6186_v32, %v5540_v19  ;;  %v331_v34 = vpop.f32.mrb[5].mxu0  ;;  %6860 = vmatprep.subr.bf16.mxu1 %v6859_v46 }
  0xef   : > { %v332_v35 = vadd.f32 %v5540_v19, %v331_v34  ;;  %6195 = vmatprep.mubr.msk.f32.mxu1 %vm220_vm0, %v352_v31 }
  0xf0   : > { %v355_v36 = vmax.f32 %v337_v33, 0.0  ;;  %6196 = vmatmul.mubr.msk.f32.gmra.mrb[2].mxu1 %vm220_vm0, %v353_v30 }
  0xf1   : > { %v354_v37 = vmax.f32 %v332_v35, 0.0  ;;  %v6189_v38 = vpop.f32.mrb[6].mxu0  ;;  %6862 = vmatpush3.bf16.msra.mxu1 %v6859_v46 }
  0xf2   : > { %v347_v39 = vadd.f32 %v6189_v38, %v5540_v19  ;;  %v341_v40 = vpop.f32.mrb[7].mxu0 }
  0xf3   : > { %v342_v41 = vadd.f32 %v5540_v19, %v341_v40  ;;  %6198 = vmatprep.mubr.msk.f32.mxu1 %vm220_vm0, %v354_v37 }
  0xf4   : > { %v357_v42 = vmax.f32 %v347_v39, 0.0  ;;  %6199 = vmatmul.mubr.msk.f32.gmra.mrb[4].mxu1 %vm220_vm0, %v355_v36 }
  0xf5   : > { %v356_v43 = vmax.f32 %v342_v41, 0.0 }
  0xf7   : > { %6201 = vmatprep.mubr.msk.f32.mxu1 %vm220_vm0, %v356_v43 }
  0xf8   : > { %6202 = vmatmul.mubr.msk.f32.gmra.mrb[6].mxu1 %vm220_vm0, %v357_v42 }
 0x1bf   : > { %v6194_v48 = vpop.f32.mrb[0].mxu1 }
 0x1c0   : > { %v7818_v49 = vadd.f32 %v6194_v48, %v5549_v47  ;;  %v454_v51 = vpop.f32.mrb[1].mxu1 }
 0x1c1   : > { %v7826_v53 = vadd.f32 %v5549_v47, %v454_v51 }
 0x1c2   : > { %v494_v57 = vadd.f32 %v7818_v49, %v207_v52 }
 0x1c3   : > { %v493_v54 = vadd.f32 %v7826_v53, %v206_v50  ;;  %v6197_v56 = vpop.f32.mrb[2].mxu1  ;;  %6232 = vmatprep.mubr.msk.f32.mxu1 %vm510_vm1, %v7826_v53 }
 0x1c4   : > { %v7835_v58 = vadd.f32 %v6197_v56, %v5549_v47  ;;  %v464_v60 = vpop.f32.mrb[3].mxu1  ;;  %6233 = vmatmul.mubr.msk.f32.vlgmr.msra.gmra.mrb[8].mxu1 %vm510_vm1, %v7818_v49 }
 0x1c5   : > { %v7842_v61 = vadd.f32 %v5549_v47, %v464_v60  ;;  %6212 = vmatprep.mubr.msk.f32.mxu0 %vm510_vm1, %v493_v54 }
 0x1c6   : > { %v496_v62 = vadd.f32 %v7835_v58, %v209_v55  ;;  %6213 = vmatmul.mubr.msk.f32.vlgmr.msra.gmra.mrb[8].mxu0 %vm510_vm1, %v494_v57 }
 0x1c7   : > { %v495_v63 = vadd.f32 %v7842_v61, %v208_v59  ;;  %v6200_v1 = vpop.f32.mrb[4].mxu1  ;;  %6235 = vmatprep.mubr.msk.f32.mxu1 %vm510_vm1, %v7842_v61 }
 0x1c8   : > { %v7853_v2 = vadd.f32 %v6200_v1, %v5549_v47  ;;  %v474_v4 = vpop.f32.mrb[5].mxu1  ;;  %6236 = vmatmul.mubr.msk.f32.gmra.mrb[10].mxu1 %vm510_vm1, %v7835_v58 }
 0x1c9   : > { %v7860_v5 = vadd.f32 %v5549_v47, %v474_v4  ;;  %6215 = vmatprep.mubr.msk.f32.mxu0 %vm510_vm1, %v495_v63 }
 0x1ca   : > { %v498_v6 = vadd.f32 %v7853_v2, %v211_v0  ;;  %6216 = vmatmul.mubr.msk.f32.gmra.mrb[10].mxu0 %vm510_vm1, %v496_v62 }
 0x1cb   : > { %v497_v7 = vadd.f32 %v7860_v5, %v210_v3  ;;  %v6203_v9 = vpop.f32.mrb[6].mxu1  ;;  %6238 = vmatprep.mubr.msk.f32.mxu1 %vm510_vm1, %v7860_v5 }
 0x1cc   : > { %v7871_v10 = vadd.f32 %v6203_v9, %v5549_v47  ;;  %v484_v12 = vpop.f32.mrb[7].mxu1  ;;  %6239 = vmatmul.mubr.msk.f32.gmra.mrb[12].mxu1 %vm510_vm1, %v7853_v2 }
 0x1cd   : > { %v7878_v13 = vadd.f32 %v5549_v47, %v484_v12  ;;  %6218 = vmatprep.mubr.msk.f32.mxu0 %vm510_vm1, %v497_v7 }
 0x1ce   : > { %v500_v14 = vadd.f32 %v7871_v10, %v213_v8  ;;  %6219 = vmatmul.mubr.msk.f32.gmra.mrb[12].mxu0 %vm510_vm1, %v498_v6 }
 0x1cf   : > { %v499_v15 = vadd.f32 %v7878_v13, %v212_v11  ;;  %6241 = vmatprep.mubr.msk.f32.mxu1 %vm510_vm1, %v7878_v13 }
 0x1d0   : > { %6242 = vmatmul.mubr.msk.f32.gmra.mrb[14].mxu1 %vm510_vm1, %v7871_v10 }
 0x1d1   : > { %6221 = vmatprep.mubr.msk.f32.mxu0 %vm510_vm1, %v499_v15 }
 0x1d2   : > { %6222 = vmatmul.mubr.msk.f32.gmra.mrb[14].mxu0 %vm510_vm1, %v500_v14 }
 0x297   : > { %v6234_v17 = vpop.f32.mrb[8].mxu1 }
 0x298   : > { %v745_v19 = vadd.f32 %v6234_v17, %v5567_v16  ;;  %v739_v20 = vpop.f32.mrb[9].mxu1 }
 0x299   : > { %v740_v21 = vadd.f32 %v5567_v16, %v739_v20  ;;  %v6214_v22 = vpop.f32.mrb[8].mxu0 }
 0x29a   : > { %v7896_v23 = vadd.f32 %v6214_v22, %v5558_v18  ;;  %v601_v24 = vpop.f32.mrb[9].mxu0 }
 0x29b   : > { %v7898_v25 = vadd.f32 %v5558_v18, %v601_v24  ;;  %v6237_v26 = vpop.f32.mrb[10].mxu1  ;;  %v6887_v27 = vpack.c.bf16 %v745_v19, %v740_v21  ;;  %v7900_v28 = vpack.i.bf16 %v745_v19, %v740_v21 }
 0x29c   : > { %v755_v29 = vadd.f32 %v6237_v26, %v5567_v16  ;;  %v749_v30 = vpop.f32.mrb[11].mxu1 }
 0x29d   : > { %v750_v31 = vadd.f32 %v5567_v16, %v749_v30  ;;  %v6217_v32 = vpop.f32.mrb[10].mxu0  ;;  %6260 = vmatprep.mubr.msk.f32.mxu0 %vm220_vm0, %v7898_v25  ;;  %6888 = vmatprep.subr.bf16.mxu1 %v6887_v27  ;;  %v7906_v33 = vpack.i.bf16 %v7896_v23, %v7898_v25 }
 0x29e   : > { %v7908_v34 = vadd.f32 %v6217_v32, %v5558_v18  ;;  %v611_v35 = vpop.f32.mrb[11].mxu0  ;;  %6890 = vmatpush3.bf16.msra.mxu1 %v6887_v27 }
 0x29f   : > { %v7910_v36 = vadd.f32 %v5558_v18, %v611_v35  ;;  %7255 = vrot.lane.b32.xlu0 %v7906_v33, %s7716_s18  ;;  %v6240_v37 = vpop.f32.mrb[12].mxu1  ;;  %v6891_v38 = vpack.c.bf16 %v755_v29, %v750_v31  ;;  %v7914_v39 = vpack.i.bf16 %v755_v29, %v750_v31 }
 0x2a0   : > { %v765_v40 = vadd.f32 %v6240_v37, %v5567_v16  ;;  %v759_v41 = vpop.f32.mrb[13].mxu1 }
 0x2a1   : > { %v6220_v42 = vpop.f32.mrb[12].mxu0  ;;  %6892 = vmatprep.subr.bf16.mxu1 %v6891_v38  ;;  %v760_v43 = vadd.f32 %v5567_v16, %v759_v41  ;;  %v7918_v44 = vpack.i.bf16 %v7908_v34, %v7910_v36 }
 0x2a2   : > { %v7920_v45 = vadd.f32 %v6220_v42, %v5558_v18  ;;  %v621_v46 = vpop.f32.mrb[13].mxu0  ;;  %6894 = vmatpush3.bf16.msra.mxu1 %v6891_v38 }
 0x2a3   : > { %v7922_v47 = vadd.f32 %v5558_v18, %v621_v46  ;;  %7260 = vrot.lane.b32.xlu0 %v7918_v44, %s7716_s18  ;;  %v6895_v48 = vpack.c.bf16 %v765_v40, %v760_v43  ;;  %v6243_v50 = vpop.f32.mrb[14].mxu1  ;;  %v7926_v51 = vpack.i.bf16 %v765_v40, %v760_v43 }
 0x2a4   : > { %v775_v52 = vadd.f32 %v6243_v50, %v5567_v16  ;;  %v769_v54 = vpop.f32.mrb[15].mxu1 }
 0x2a5   : > { %v6223_v55 = vpop.f32.mrb[14].mxu0  ;;  %6896 = vmatprep.subr.bf16.mxu1 %v6895_v48  ;;  %v7930_v56 = vpack.i.bf16 %v7920_v45, %v7922_v47  ;;  %v770_v57 = vadd.f32 %v5567_v16, %v769_v54 }
 0x2a6   : > { %v7932_v59 = vadd.f32 %v6223_v55, %v5558_v18  ;;  %v631_v60 = vpop.f32.mrb[15].mxu0  ;;  %6898 = vmatpush3.bf16.msra.mxu1 %v6895_v48 }
 0x2a7   : > { %v7934_v62 = vadd.f32 %v5558_v18, %v631_v60  ;;  %7265 = vrot.lane.b32.xlu1 %v7930_v56, %s7716_s18  ;;  %7275 = vrot.lane.b32.xlu0 %v7906_v33, %s7717_s19  ;;  %v6899_v63 = vpack.c.bf16 %v775_v52, %v770_v57  ;;  %v7940_v0 = vpack.i.bf16 %v775_v52, %v770_v57 }
 0x2a9   : > { %v7944_v1 = vpack.i.bf16 %v7932_v59, %v7934_v62  ;;  %6900 = vmatprep.subr.bf16.mxu1 %v6899_v63 }
 0x2aa   : > { %6902 = vmatpush3.bf16.msra.mxu1 %v6899_v63 }
 0x2ab   : > { %7270 = vrot.lane.b32.xlu1 %v7944_v1, %s7716_s18 }
 0x2af   : > { %7280 = vrot.lane.b32.xlu1 %v7918_v44, %s7717_s19 }
 0x311   : > { %v7256_v3 = vpop.permute.xlu0 %7255 }
 0x312   : > { %v7258_v4 = vunpack.i.h.bf16 %v7256_v3  ;;  %v7257_v6 = vunpack.i.l.bf16 %v7256_v3 }
 0x314   : > { %v6863_v8 = vpack.c.bf16 %v7258_v4, %v7257_v6 }
 0x315   : > { %v7261_v9 = vpop.permute.xlu0 %7260 }
 0x316   : > { %v7263_v11 = vunpack.i.h.bf16 %v7261_v9  ;;  %v7262_v12 = vunpack.i.l.bf16 %v7261_v9  ;;  %6865 = vmatprep.subr.msk.bf16.mxu0 %vm7952_vm2, %v6863_v8 }
 0x317   : > { %6868 = vmatpush3.bf16.xpose.msk.msra.mxu0 %vm7952_vm2, %v6863_v8 }
 0x318   : > { %v6869_v14 = vpack.c.bf16 %v7263_v11, %v7262_v12 }
 0x319   : > { %v7266_v15 = vpop.permute.xlu1 %7265  ;;  %v7276_v16 = vpop.permute.xlu0 %7275 }
 0x31a   : > { %v7268_v17 = vunpack.i.h.bf16 %v7266_v15  ;;  %v7267_v18 = vunpack.i.l.bf16 %v7266_v15  ;;  %v7278_v19 = vunpack.i.h.bf16 %v7276_v16  ;;  %v7277_v20 = vunpack.i.l.bf16 %v7276_v16  ;;  %6871 = vmatprep.subr.msk.bf16.mxu0 %vm7952_vm2, %v6869_v14 }
 0x31c   : > { %v6875_v21 = vpack.c.bf16 %v7268_v17, %v7267_v18  ;;  %v7962_v22 = vpack.c.bf16 %v7278_v19, %v7277_v20 }
 0x31d   : > { %v7271_v24 = vpop.permute.xlu1 %7270 }
 0x31e   : > { %6905 = vmatprep.subr.msk.bf16.mxu1 %vm7952_vm2, %v7962_v22  ;;  %v7273_v26 = vunpack.i.h.bf16 %v7271_v24  ;;  %v7272_v27 = vunpack.i.l.bf16 %v7271_v24 }
 0x31f   : > { %6874 = vmatpush3.bf16.xpose.msk.msra.mxu0 %vm7952_vm2, %v6869_v14 }
 0x320   : > { %6877 = vmatprep.subr.msk.bf16.mxu0 %vm7952_vm2, %v6875_v21  ;;  %v6881_v29 = vpack.c.bf16 %v7273_v26, %v7272_v27 }
 0x321   : > { %v7281_v11 = vpop.permute.xlu1 %7280 }
 0x327   : > { %6880 = vmatpush3.bf16.xpose.msk.msra.mxu0 %vm7952_vm2, %v6875_v21 }
 0x328   : > { %6883 = vmatprep.subr.msk.bf16.mxu0 %vm7952_vm2, %v6881_v29 }
 0x32f   : > { %6886 = vmatpush3.bf16.xpose.msk.msra.mxu0 %vm7952_vm2, %v6881_v29 }
 0x336   : > { %6261 = vmatmul.mubr.msk.f32.vlgmr.msra.gmra.mrb[16].mxu0 %vm220_vm0, %v7896_v23 }
 0x337   : > { %6263 = vmatprep.mubr.msk.f32.mxu0 %vm220_vm0, %v7910_v36 }
 0x33a   : > { %6264 = vmatmul.mubr.msk.f32.gmra.mrb[18].mxu0 %vm220_vm0, %v7908_v34 }
 0x33b   : > { %6266 = vmatprep.mubr.msk.f32.mxu0 %vm220_vm0, %v7922_v47 }
 0x33e   : > { %6267 = vmatmul.mubr.msk.f32.gmra.mrb[20].mxu0 %vm220_vm0, %v7920_v45 }
 0x33f   : > { %6269 = vmatprep.mubr.msk.f32.mxu0 %vm220_vm0, %v7934_v62 }
 0x342   : > { %6270 = vmatmul.mubr.msk.f32.gmra.mrb[22].mxu0 %vm220_vm0, %v7932_v59 }
 0x409   : > { %v6262_v30 = vpop.f32.mrb[16].mxu0 }
 0x40a   : > { %v7991_v31 = vmul.f32 0.35355338, %v6262_v30  ;;  %v905_v32 = vpop.f32.mrb[17].mxu0  ;;  %v7283_v30 = vunpack.i.h.bf16 %v7281_v11 }
 0x40b   : > { %v944_v35 = vmul.f32 0.35355338, %v905_v32  ;;  %v7282_v32 = vunpack.i.l.bf16 %v7281_v11 }
 0x40c   : > { %v956_v37 = vsel %vm952_vm3, %v7991_v31, -inf }
 0x40d   : > { %957 = vmax.xlane.f32.xlu1 %v956_v37  ;;  %v6265_v38 = vpop.f32.mrb[18].mxu0  ;;  %v953_v40 = vsel %vm952_vm3, %v944_v35, -inf }
 0x40e   : > { %v7996_v41 = vmul.f32 0.35355338, %v6265_v38  ;;  %954 = vmax.xlane.f32.xlu0 %v953_v40  ;;  %v915_v42 = vpop.f32.mrb[19].mxu0  ;;  %v6909_v38 = vpack.c.bf16 %v7283_v30, %v7282_v32 }
 0x40f   : > { %v946_v46 = vmul.f32 0.35355338, %v915_v42 }
 0x410   : > { %v962_v43 = vsel %vm952_vm3, %v7996_v41, -inf }
 0x411   : > { %v6268_v48 = vpop.f32.mrb[20].mxu0  ;;  %v959_v55 = vsel %vm952_vm3, %v946_v46, -inf }
 0x412   : > { %963 = vmax.xlane.f32.xlu0 %v962_v43  ;;  %v925_v50 = vpop.f32.mrb[21].mxu0  ;;  %v8000_v52 = vmul.f32 0.35355338, %v6268_v48 }
 0x413   : > { %v8015_v63 = vmul.f32 0.35355338, %v925_v50 }
 0x414   : > { %v968_v60 = vsel %vm952_vm3, %v8000_v52, -inf }
 0x415   : > { %v6271_v54 = vpop.f32.mrb[22].mxu0  ;;  %v965_v4 = vsel %vm952_vm3, %v8015_v63, -inf }
 0x416   : > { %960 = vmax.xlane.f32.xlu0 %v959_v55  ;;  %v935_v57 = vpop.f32.mrb[23].mxu0  ;;  %v8019_v3 = vmul.f32 0.35355338, %v6271_v54 }
 0x417   : > { %v8024_v6 = vmul.f32 0.35355338, %v935_v57 }
 0x418   : > { %v974_v8 = vsel %vm952_vm3, %v8019_v3, -inf }
 0x419   : > { %v971_v9 = vsel %vm952_vm3, %v8024_v6, -inf }
 0x41a   : > { %969 = vmax.xlane.f32.xlu0 %v968_v60 }
 0x41e   : > { %7290 = vrot.lane.b32.xlu1 %v7944_v1, %s7717_s19 }
 0x430   : > { %7285 = vrot.lane.b32.xlu0 %v7930_v56, %s7717_s19 }
 0x434   : > { %1170 = vrot.lane.b32.xlu0 %v7898_v25, %s7718_s20 }
 0x438   : > { %1174 = vrot.lane.b32.xlu0 %v7910_v36, %s7718_s20 }
 0x43c   : > { %1178 = vrot.lane.b32.xlu0 %v7922_v47, %s7718_s20 }
 0x440   : > { %1182 = vrot.lane.b32.xlu0 %v7934_v62, %s7718_s20 }
 0x442   : > { %966 = vmax.xlane.f32.xlu1 %v965_v4 }
 0x444   : > { %7295 = vrot.lane.b32.xlu0 %v7906_v33, %s7719_s21 }
 0x446   : > { %975 = vmax.xlane.f32.xlu1 %v974_v8 }
 0x448   : > { %7305 = vrot.lane.b32.xlu0 %v7930_v56, %s7719_s21 }
 0x44a   : > { %972 = vmax.xlane.f32.xlu1 %v971_v9 }
 0x44c   : > { %1854 = vrot.lane.b32.xlu0 %v7898_v25, %s7720_s22 }
 0x450   : > { %1858 = vrot.lane.b32.xlu0 %v7910_v36, %s7720_s22 }
 0x454   : > { %1862 = vrot.lane.b32.xlu0 %v7922_v47, %s7720_s22 }
 0x458   : > { %1866 = vrot.lane.b32.xlu0 %v7934_v62, %s7720_s22 }
 0x45b   : > { %1172 = vrot.lane.b32.xlu1 %v7896_v23, %s7718_s20 }
 0x45c   : > { %7315 = vrot.lane.b32.xlu0 %v7900_v28, %s7718_s20 }
 0x45f   : > { %1176 = vrot.lane.b32.xlu1 %v7908_v34, %s7718_s20 }
 0x463   : > { %1180 = vrot.lane.b32.xlu1 %v7920_v45, %s7718_s20 }
 0x467   : > { %1184 = vrot.lane.b32.xlu1 %v7932_v59, %s7718_s20 }
 0x46b   : > { %7300 = vrot.lane.b32.xlu1 %v7918_v44, %s7719_s21 }
 0x46f   : > { %7310 = vrot.lane.b32.xlu1 %v7944_v1, %s7719_s21 }
 0x473   : > { %1856 = vrot.lane.b32.xlu1 %v7896_v23, %s7720_s22 }
 0x477   : > { %1860 = vrot.lane.b32.xlu1 %v7908_v34, %s7720_s22 }
 0x47b   : > { %1864 = vrot.lane.b32.xlu1 %v7920_v45, %s7720_s22 }
 0x47f   : > { %1868 = vrot.lane.b32.xlu1 %v7932_v59, %s7720_s22 }
 0x483   : > { %7320 = vrot.lane.b32.xlu1 %v7914_v39, %s7718_s20 }
 0x49a   : > { %v958_v12 = vpop.xlane.xlu1 %957 }
 0x49b   : > { %v978_v14 = vsub.f32 %v7991_v31, %v958_v12  ;;  %v955_v15 = vpop.xlane.xlu0 %954 }
 0x49c   : > { %v977_v16 = vsub.f32 %v944_v35, %v955_v15 }
 0x49d   : > { %v987_v17 = vmul.f32 1.442695, %v978_v14 }
 0x49e   : > { %v985_v18 = vmul.f32 1.442695, %v977_v16 }
 0x49f   : > { %v964_v19 = vpop.xlane.xlu0 %963 }
 0x4a0   : > { %7514 = vpow2.f32 %v985_v18  ;;  %v980_v20 = vsub.f32 %v7996_v41, %v964_v19 }
 0x4a1   : > { %7516 = vpow2.f32 %v987_v17 }
 0x4a2   : > { %v991_v26 = vmul.f32 1.442695, %v980_v20 }
 0x4a3   : > { %v961_v21 = vpop.xlane.xlu0 %960 }
 0x4a4   : > { %v979_v24 = vsub.f32 %v946_v46, %v961_v21 }
 0x4a6   : > { %v989_v27 = vmul.f32 1.442695, %v979_v24 }
 0x4a7   : > { %v970_v29 = vpop.xlane.xlu0 %969 }
 0x4a8   : > { %7518 = vpow2.f32 %v989_v27  ;;  %v982_v17 = vsub.f32 %v8000_v52, %v970_v29 }
 0x4a9   : > { %7520 = vpow2.f32 %v991_v26 }
 0x4aa   : > { %v8063_v37 = vpop.eup %7514  ;;  %v995_v21 = vmul.f32 1.442695, %v982_v17 }
 0x4ab   : > { %v8065_v31 = vpop.eup %7516  ;;  %6288 = vmatprep.mubr.msk.f32.mxu1 %vm952_vm3, %v8063_v37  ;;  %v7286_v35 = vpop.permute.xlu0 %7285 }
 0x4ac   : > { %6289 = vmatmul.mubr.msk.f32.vlgmr.msra.gmra.mrb[16].mxu1 %vm952_vm3, %v8065_v31  ;;  %v7288_v41 = vunpack.i.h.bf16 %v7286_v35  ;;  %v7287_v42 = vunpack.i.l.bf16 %v7286_v35 }
 0x4ad   : > { %6908 = vmatpush3.bf16.xpose.msk.msra.mxu1 %vm7952_vm2, %v7962_v22  ;;  %v7291_v22 = vpop.permute.xlu1 %7290 }
 0x4ae   : > { %6911 = vmatprep.subr.msk.bf16.mxu1 %vm7952_vm2, %v6909_v38  ;;  %v6915_v50 = vpack.c.bf16 %v7288_v41, %v7287_v42  ;;  %v7293_v55 = vunpack.i.h.bf16 %v7291_v22  ;;  %v7292_v57 = vunpack.i.l.bf16 %v7291_v22 }
 0x4af   : > { %v8076_v40 = vpop.permute.xlu0 %1170 }
 0x4b0   : > { %v6921_v4 = vpack.c.bf16 %v7293_v55, %v7292_v57 }
 0x4b2   : > { %v8078_v43 = vpop.eup %7518 }
 0x4b3   : > { %v8080_v46 = vpop.eup %7520  ;;  %6291 = vmatprep.mubr.msk.f32.mxu1 %vm952_vm3, %v8078_v43  ;;  %v8084_v48 = vpop.permute.xlu0 %1174 }
 0x4b4   : > { %6292 = vmatmul.mubr.msk.f32.gmra.mrb[18].mxu1 %vm952_vm3, %v8080_v46 }
 0x4b5   : > { %6914 = vmatpush3.bf16.xpose.msk.msra.mxu1 %vm7952_vm2, %v6909_v38 }
 0x4b6   : > { %6917 = vmatprep.subr.msk.bf16.mxu1 %vm7952_vm2, %v6915_v50 }
 0x4b7   : > { %v8092_v54 = vpop.permute.xlu0 %1178 }
 0x4bb   : > { %v8094_v60 = vpop.permute.xlu0 %1182 }
 0x4bd   : > { %6920 = vmatpush3.bf16.xpose.msk.msra.mxu1 %vm7952_vm2, %v6915_v50 }
 0x4be   : > { %6923 = vmatprep.subr.msk.bf16.mxu1 %vm7952_vm2, %v6921_v4 }
 0x4bf   : > { %v7296_v8 = vpop.permute.xlu0 %7295 }
 0x4c0   : > { %v7298_v9 = vunpack.i.h.bf16 %v7296_v8  ;;  %v7297_v11 = vunpack.i.l.bf16 %v7296_v8 }
 0x4c2   : > { %v6943_v12 = vpack.c.bf16 %v7298_v9, %v7297_v11 }
 0x4c3   : > { %v7306_v14 = vpop.permute.xlu0 %7305 }
 0x4c5   : > { %6926 = vmatpush3.bf16.xpose.msk.msra.mxu1 %vm7952_vm2, %v6921_v4 }
 0x4c6   : > { %6945 = vmatprep.subr.msk.bf16.mxu1 %vm7952_vm2, %v6943_v12 }
 0x4c7   : > { %v1855_v15 = vpop.permute.xlu0 %1854 }
 0x4cb   : > { %v8104_v16 = vpop.permute.xlu0 %1858 }
 0x4cf   : > { %v8107_v18 = vpop.permute.xlu0 %1862  ;;  %v967_v19 = vpop.xlane.xlu1 %966 }
 0x4d0   : > { %v981_v20 = vsub.f32 %v8015_v63, %v967_v19 }
 0x4d2   : > { %v993_v24 = vmul.f32 1.442695, %v981_v20 }
 0x4d3   : > { %v8110_v26 = vpop.permute.xlu0 %1866  ;;  %v976_v27 = vpop.xlane.xlu1 %975 }
 0x4d4   : > { %7522 = vpow2.f32 %v993_v24  ;;  %v984_v30 = vsub.f32 %v8019_v3, %v976_v27  ;;  %v7307_v24 = vunpack.i.l.bf16 %v7306_v14 }
 0x4d5   : > { %7524 = vpow2.f32 %v995_v21  ;;  %v7308_v21 = vunpack.i.h.bf16 %v7306_v14 }
 0x4d6   : > { %v999_v29 = vmul.f32 1.442695, %v984_v30 }
 0x4d7   : > { %v7316_v32 = vpop.permute.xlu0 %7315  ;;  %v973_v35 = vpop.xlane.xlu1 %972  ;;  %v6955_v27 = vpack.c.bf16 %v7308_v21, %v7307_v24 }
 0x4d8   : > { %v7318_v38 = vunpack.i.h.bf16 %v7316_v32  ;;  %v7317_v41 = vunpack.i.l.bf16 %v7316_v32  ;;  %v983_v52 = vsub.f32 %v8024_v6, %v973_v35 }
 0x4da   : > { %v997_v42 = vmul.f32 1.442695, %v983_v52  ;;  %v6927_v50 = vpack.c.bf16 %v7318_v38, %v7317_v41 }
 0x4db   : > { %v1173_v22 = vpop.permute.xlu1 %1172 }
 0x4dc   : > { %7526 = vpow2.f32 %v997_v42  ;;  %6928 = vmatprep.subr.bf16.mxu0 %v6927_v50 }
 0x4dd   : > { %7528 = vpow2.f32 %v999_v29  ;;  %6930 = vmatpush3.bf16.msra.mxu0 %v6927_v50 }
 0x4de   : > { %v8114_v63 = vpop.eup %7522 }
 0x4df   : > { %v8116_v55 = vpop.eup %7524  ;;  %6294 = vmatprep.mubr.msk.f32.mxu1 %vm952_vm3, %v8114_v63  ;;  %v1177_v3 = vpop.permute.xlu1 %1176 }
 0x4e0   : > { %6295 = vmatmul.mubr.msk.f32.gmra.mrb[20].mxu1 %vm952_vm3, %v8116_v55 }
 0x4e3   : > { %v1181_v6 = vpop.permute.xlu1 %1180 }
 0x4e6   : > { %v8122_v57 = vpop.eup %7526 }
 0x4e7   : > { %v8124_v4 = vpop.eup %7528  ;;  %6297 = vmatprep.mubr.msk.f32.mxu1 %vm952_vm3, %v8122_v57  ;;  %v1185_v8 = vpop.permute.xlu1 %1184 }
 0x4e8   : > { %6298 = vmatmul.mubr.msk.f32.gmra.mrb[22].mxu1 %vm952_vm3, %v8124_v4 }
 0x4e9   : > { %6316 = vmatprep.mubr.msk.f32.mxu1 %vm220_vm0, %v8076_v40 }
 0x4eb   : > { %v7301_v9 = vpop.permute.xlu1 %7300 }
 0x4ec   : > { %v7303_v11 = vunpack.i.h.bf16 %v7301_v9  ;;  %v7302_v17 = vunpack.i.l.bf16 %v7301_v9  ;;  %6317 = vmatmul.mubr.msk.f32.vlgmr.msra.gmra.mrb[24].mxu1 %vm220_vm0, %v1173_v22 }
 0x4ed   : > { %6948 = vmatpush3.bf16.xpose.msk.msra.mxu1 %vm7952_vm2, %v6943_v12  ;;  %6319 = vmatprep.mubr.msk.f32.mxu1 %vm220_vm0, %v8084_v48 }
 0x4ee   : > { %v6949_v19 = vpack.c.bf16 %v7303_v11, %v7302_v17 }
 0x4ef   : > { %v7311_v20 = vpop.permute.xlu1 %7310 }
 0x4f0   : > { %6320 = vmatmul.mubr.msk.f32.gmra.mrb[26].mxu1 %vm220_vm0, %v1177_v3  ;;  %6951 = vmatprep.subr.msk.bf16.mxu1 %vm7952_vm2, %v6949_v19  ;;  %v7313_v12 = vunpack.i.h.bf16 %v7311_v20  ;;  %v7312_v14 = vunpack.i.l.bf16 %v7311_v20 }
 0x4f1   : > { %6322 = vmatprep.mubr.msk.f32.mxu1 %vm220_vm0, %v8092_v54 }
 0x4f2   : > { %v6961_v30 = vpack.c.bf16 %v7313_v12, %v7312_v14 }
 0x4f3   : > { %v1857_v40 = vpop.permute.xlu1 %1856 }
 0x4f4   : > { %6323 = vmatmul.mubr.msk.f32.gmra.mrb[28].mxu1 %vm220_vm0, %v1181_v6 }
 0x4f5   : > { %6954 = vmatpush3.bf16.xpose.msk.msra.mxu1 %vm7952_vm2, %v6949_v19  ;;  %6325 = vmatprep.mubr.msk.f32.mxu1 %vm220_vm0, %v8094_v60 }
 0x4f6   : > { %6957 = vmatprep.subr.msk.bf16.mxu1 %vm7952_vm2, %v6955_v27 }
 0x4f7   : > { %v1861_v48 = vpop.permute.xlu1 %1860 }
 0x4f8   : > { %6326 = vmatmul.mubr.msk.f32.gmra.mrb[30].mxu1 %vm220_vm0, %v1185_v8 }
 0x4f9   : > { %6400 = vmatprep.mubr.msk.f32.mxu1 %vm220_vm0, %v1855_v15 }
 0x4fb   : > { %v1865_v54 = vpop.permute.xlu1 %1864 }
 0x4fd   : > { %6960 = vmatpush3.bf16.xpose.msk.msra.mxu1 %vm7952_vm2, %v6955_v27 }
 0x4fe   : > { %6963 = vmatprep.subr.msk.bf16.mxu1 %vm7952_vm2, %v6961_v30 }
 0x4ff   : > { %v1869_v32 = vpop.permute.xlu1 %1868 }
 0x503   : > { %v7321_v60 = vpop.permute.xlu1 %7320 }
 0x504   : > { %v7323_v35 = vunpack.i.h.bf16 %v7321_v60  ;;  %v7322_v38 = vunpack.i.l.bf16 %v7321_v60 }
 0x505   : > { %6966 = vmatpush3.bf16.xpose.msk.msra.mxu1 %vm7952_vm2, %v6961_v30 }
 0x506   : > { %v6931_v41 = vpack.c.bf16 %v7323_v35, %v7322_v38 }
 0x508   : > { %6932 = vmatprep.subr.bf16.mxu0 %v6931_v41 }
 0x509   : > { %6934 = vmatpush3.bf16.msra.mxu0 %v6931_v41 }
 0x50c   : > { %6401 = vmatmul.mubr.msk.f32.vlgmr.msra.gmra.mrb[32].mxu1 %vm220_vm0, %v1857_v40 }
 0x50d   : > { %6403 = vmatprep.mubr.msk.f32.mxu1 %vm220_vm0, %v8104_v16 }
 0x510   : > { %6404 = vmatmul.mubr.msk.f32.gmra.mrb[34].mxu1 %vm220_vm0, %v1861_v48 }
 0x511   : > { %6406 = vmatprep.mubr.msk.f32.mxu1 %vm220_vm0, %v8107_v18 }
 0x514   : > { %6407 = vmatmul.mubr.msk.f32.gmra.mrb[36].mxu1 %vm220_vm0, %v1865_v54 }
 0x515   : > { %6409 = vmatprep.mubr.msk.f32.mxu1 %vm220_vm0, %v8110_v26 }
 0x518   : > { %6410 = vmatmul.mubr.msk.f32.gmra.mrb[38].mxu1 %vm220_vm0, %v1869_v32 }
 0x57f   : > { %v8167_v15 = vpop.f32.mrb[16].mxu1 }
 0x580   : > { %v8169_v52 = vpop.f32.mrb[17].mxu1 }
 0x587   : > { %v8171_v29 = vpop.f32.mrb[18].mxu1 }
 0x588   : > { %v8173_v42 = vpop.f32.mrb[19].mxu1 }
 0x5b3   : > { %v8175_v16 = vpop.f32.mrb[20].mxu1 }
 0x5b4   : > { %v8177_v50 = vpop.f32.mrb[21].mxu1 }
 0x5bb   : > { %v8179_v18 = vpop.f32.mrb[22].mxu1 }
 0x5bc   : > { %v8181_v22 = vpop.f32.mrb[23].mxu1 }
 0x5bf   : > { %v6318_v3 = vpop.f32.mrb[24].mxu1 }
 0x5c0   : > { %v8183_v26 = vmul.f32 0.35355338, %v6318_v3  ;;  %v1300_v6 = vpop.f32.mrb[25].mxu1 }
 0x5c1   : > { %v8185_v8 = vmul.f32 0.35355338, %v1300_v6 }
 0x5c2   : > { %v1350_v9 = vsel %vm952_vm3, %v8183_v26, -inf }
 0x5c3   : > { %1351 = vmax.xlane.f32.xlu1 %v1350_v9  ;;  %v6321_v11 = vpop.f32.mrb[26].mxu1  ;;  %v1347_v17 = vsel %vm952_vm3, %v8185_v8, -inf }
 0x5c4   : > { %v8191_v19 = vmul.f32 0.35355338, %v6321_v11  ;;  %1348 = vmax.xlane.f32.xlu0 %v1347_v17  ;;  %v1310_v20 = vpop.f32.mrb[27].mxu1 }
 0x5c5   : > { %v8195_v24 = vmul.f32 0.35355338, %v1310_v20 }
 0x5c6   : > { %v1356_v21 = vsel %vm952_vm3, %v8191_v19, -inf }
 0x5c7   : > { %v6324_v40 = vpop.f32.mrb[28].mxu1  ;;  %v1353_v54 = vsel %vm952_vm3, %v8195_v24, -inf }
 0x5c8   : > { %1357 = vmax.xlane.f32.xlu0 %v1356_v21  ;;  %v1320_v27 = vpop.f32.mrb[29].mxu1  ;;  %v8199_v12 = vmul.f32 0.35355338, %v6324_v40 }
 0x5c9   : > { %v8197_v48 = vmul.f32 0.35355338, %v1320_v27 }
 0x5ca   : > { %v1362_v41 = vsel %vm952_vm3, %v8199_v12, -inf }
 0x5cb   : > { %v6327_v14 = vpop.f32.mrb[30].mxu1  ;;  %v1359_v30 = vsel %vm952_vm3, %v8197_v48, -inf }
 0x5cc   : > { %v8205_v32 = vmul.f32 0.35355338, %v6327_v14  ;;  %1354 = vmax.xlane.f32.xlu0 %v1353_v54  ;;  %1360 = vmax.xlane.f32.xlu1 %v1359_v30  ;;  %v1330_v60 = vpop.f32.mrb[31].mxu1 }
 0x5cd   : > { %v8209_v38 = vmul.f32 0.35355338, %v1330_v60 }
 0x5ce   : > { %v1368_v35 = vsel %vm952_vm3, %v8205_v32, -inf }
 0x5cf   : > { %v1365_v3 = vsel %vm952_vm3, %v8209_v38, -inf }
 0x5d0   : > { %1363 = vmax.xlane.f32.xlu0 %v1362_v41  ;;  %1369 = vmax.xlane.f32.xlu1 %v1368_v35 }
 0x5d4   : > { %1366 = vmax.xlane.f32.xlu1 %v1365_v3 }
 0x5df   : > { %v6402_v6 = vpop.f32.mrb[32].mxu1 }
 0x5e0   : > { %v1984_v9 = vpop.f32.mrb[33].mxu1 }
 0x5e3   : > { %v6405_v11 = vpop.f32.mrb[34].mxu1 }
 0x5e4   : > { %v1994_v17 = vpop.f32.mrb[35].mxu1 }
 0x5e5   : > { %7330 = vrot.lane.b32.xlu1 %v7940_v0, %s7718_s20 }
 0x5e6   : > { %7325 = vrot.lane.b32.xlu0 %v7926_v51, %s7718_s20 }
 0x5e7   : > { %v6408_v20 = vpop.f32.mrb[36].mxu1 }
 0x5e8   : > { %v2004_v21 = vpop.f32.mrb[37].mxu1 }
 0x5e9   : > { %7340 = vrot.lane.b32.xlu1 %v7918_v44, %s7721_s23  ;;  %v8251_v44 = vmul.f32 0.35355338, %v1984_v9 }
 0x5ea   : > { %7335 = vrot.lane.b32.xlu0 %v7906_v33, %s7721_s23  ;;  %v1001_v33 = vsel %vm952_vm3, %v8063_v37, 0.0  ;;  %v8265_v37 = vmul.f32 0.35355338, %v6405_v11 }
 0x5eb   : > { %v8221_v40 = vpop.f32.mrb[38].mxu1 }
 0x5ec   : > { %v2014_v27 = vpop.f32.mrb[39].mxu1 }
 0x5ed   : > { %7350 = vrot.lane.b32.xlu1 %v7944_v1, %s7721_s23  ;;  %v2031_v1 = vsel %vm952_vm3, %v8251_v44, -inf }
 0x5ee   : > { %7345 = vrot.lane.b32.xlu0 %v7930_v56, %s7721_s23  ;;  %v8257_v56 = vmul.f32 0.35355338, %v6402_v6 }
 0x5f1   : > { %2411 = vrot.lane.b32.xlu1 %v7896_v23, %s7722_s24  ;;  %v1004_v23 = vsel %vm952_vm3, %v8065_v31, 0.0  ;;  %v8267_v31 = vmul.f32 0.35355338, %v2004_v21 }
 0x5f2   : > { %2409 = vrot.lane.b32.xlu0 %v7898_v25, %s7722_s24  ;;  %v1007_v25 = vsel %vm952_vm3, %v8078_v43, 0.0  ;;  %v2034_v43 = vsel %vm952_vm3, %v8257_v56, -inf }
 0x5f5   : > { %2415 = vrot.lane.b32.xlu1 %v7908_v34, %s7722_s24  ;;  %v1010_v34 = vsel %vm952_vm3, %v8080_v46, 0.0 }
 0x5f6   : > { %2413 = vrot.lane.b32.xlu0 %v7910_v36, %s7722_s24  ;;  %v1013_v36 = vsel %vm952_vm3, %v8114_v63, 0.0  ;;  %v8273_v63 = vmul.f32 0.35355338, %v6408_v20 }
 0x5f8   : > { %v2046_v14 = vsel %vm952_vm3, %v8273_v63, -inf }
 0x5f9   : > { %2419 = vrot.lane.b32.xlu1 %v7920_v45, %s7722_s24  ;;  %v1016_v45 = vsel %vm952_vm3, %v8116_v55, 0.0  ;;  %v8275_v55 = vmul.f32 0.35355338, %v2014_v27 }
 0x5fa   : > { %2417 = vrot.lane.b32.xlu0 %v7922_v47, %s7722_s24  ;;  %v1019_v47 = vsel %vm952_vm3, %v8122_v57, 0.0  ;;  %v2040_v57 = vsel %vm952_vm3, %v8265_v37, -inf }
 0x5fb   : > { %v2049_v54 = vsel %vm952_vm3, %v8275_v55, -inf }
 0x5fd   : > { %2423 = vrot.lane.b32.xlu1 %v7932_v59, %s7722_s24  ;;  %v8259_v59 = vmul.f32 0.35355338, %v1994_v17 }
 0x5fe   : > { %2421 = vrot.lane.b32.xlu0 %v7934_v62, %s7722_s24  ;;  %v1022_v62 = vsel %vm952_vm3, %v8124_v4, 0.0  ;;  %v2043_v4 = vsel %vm952_vm3, %v8267_v31, -inf }
 0x5ff   : > { %v2037_v46 = vsel %vm952_vm3, %v8259_v59, -inf }
 0x61d   : > { %1005 = vadd.xlane.f32.xlu0 %v1004_v23 }
 0x621   : > { %1008 = vadd.xlane.f32.xlu0 %v1007_v25  ;;  %1002 = vadd.xlane.f32.xlu1 %v1001_v33 }
 0x625   : > { %1011 = vadd.xlane.f32.xlu0 %v1010_v34  ;;  %1014 = vadd.xlane.f32.xlu1 %v1013_v36 }
 0x629   : > { %1017 = vadd.xlane.f32.xlu0 %v1016_v45  ;;  %1020 = vadd.xlane.f32.xlu1 %v1019_v47 }
 0x62d   : > { %1023 = vadd.xlane.f32.xlu0 %v1022_v62  ;;  %2032 = vmax.xlane.f32.xlu1 %v2031_v1 }
 0x631   : > { %2035 = vmax.xlane.f32.xlu0 %v2034_v43  ;;  %2038 = vmax.xlane.f32.xlu1 %v2037_v46 }
 0x635   : > { %2041 = vmax.xlane.f32.xlu0 %v2040_v57  ;;  %2044 = vmax.xlane.f32.xlu1 %v2043_v4 }
 0x639   : > { %2047 = vmax.xlane.f32.xlu0 %v2046_v14  ;;  %2050 = vmax.xlane.f32.xlu1 %v2049_v54 }
 0x650   : > { %v1352_v30 = vpop.xlane.xlu1 %1351 }
 0x651   : > { %v1372_v60 = vsub.f32 %v8183_v26, %v1352_v30  ;;  %v1349_v35 = vpop.xlane.xlu0 %1348 }
 0x652   : > { %v1371_v41 = vsub.f32 %v8185_v8, %v1349_v35 }
 0x653   : > { %v1381_v3 = vmul.f32 1.442695, %v1372_v60 }
 0x654   : > { %v1379_v6 = vmul.f32 1.442695, %v1371_v41 }
 0x655   : > { %7530 = vpow2.f32 %v1381_v3  ;;  %v1358_v9 = vpop.xlane.xlu0 %1357 }
 0x656   : > { %7532 = vpow2.f32 %v1379_v6  ;;  %v1374_v11 = vsub.f32 %v8191_v19, %v1358_v9 }
 0x658   : > { %v1385_v17 = vmul.f32 1.442695, %v1374_v11 }
 0x659   : > { %v1355_v20 = vpop.xlane.xlu0 %1354  ;;  %v1361_v21 = vpop.xlane.xlu1 %1360 }
 0x65a   : > { %7534 = vpow2.f32 %v1385_v17  ;;  %v1373_v27 = vsub.f32 %v8195_v24, %v1355_v20  ;;  %v1375_v23 = vsub.f32 %v8197_v48, %v1361_v21 }
 0x65c   : > { %v1383_v25 = vmul.f32 1.442695, %v1373_v27  ;;  %v1387_v26 = vmul.f32 1.442695, %v1375_v23 }
 0x65d   : > { %v1364_v33 = vpop.xlane.xlu0 %1363  ;;  %v1370_v34 = vpop.xlane.xlu1 %1369 }
 0x65e   : > { %7536 = vpow2.f32 %v1383_v25  ;;  %v1376_v8 = vsub.f32 %v8199_v12, %v1364_v33  ;;  %v1378_v36 = vsub.f32 %v8205_v32, %v1370_v34 }
 0x65f   : > { %v7531_v45 = vpop.eup %7530  ;;  %7538 = vpow2.f32 %v1387_v26 }
 0x660   : > { %v7533_v47 = vpop.eup %7532  ;;  %v1389_v19 = vmul.f32 1.442695, %v1376_v8  ;;  %v1398_v62 = vsel %vm952_vm3, %v7531_v45, 0.0  ;;  %v1393_v1 = vmul.f32 1.442695, %v1378_v36 }
 0x661   : > { %6344 = vmatprep.mubr.msk.f32.mxu0 %vm952_vm3, %v7533_v47  ;;  %v7326_v24 = vpop.permute.xlu0 %7325  ;;  %v1367_v48 = vpop.xlane.xlu1 %1366  ;;  %1399 = vadd.xlane.f32.xlu1 %v1398_v62  ;;  %v1395_v43 = vsel %vm952_vm3, %v7533_v47, 0.0  ;;  %v8307_v47 = vmul.f32 0.35355338, %v8221_v40 }
 0x662   : > { %7540 = vpow2.f32 %v1389_v19  ;;  %v7328_v46 = vunpack.i.h.bf16 %v7326_v24  ;;  %v7327_v57 = vunpack.i.l.bf16 %v7326_v24  ;;  %v1377_v12 = vsub.f32 %v8209_v38, %v1367_v48  ;;  %1396 = vadd.xlane.f32.xlu0 %v1395_v43 }
 0x663   : > { %7542 = vpow2.f32 %v1393_v1  ;;  %v2052_v48 = vsel %vm952_vm3, %v8307_v47, -inf }
 0x664   : > { %v7535_v32 = vpop.eup %7534  ;;  %v6935_v4 = vpack.c.bf16 %v7328_v46, %v7327_v57  ;;  %v1391_v60 = vmul.f32 1.442695, %v1377_v12 }
 0x665   : > { %v7336_v14 = vpop.permute.xlu0 %7335  ;;  %v7331_v54 = vpop.permute.xlu1 %7330  ;;  %v1404_v30 = vsel %vm952_vm3, %v7535_v32, 0.0 }
 0x666   : > { %v7338_v35 = vunpack.i.h.bf16 %v7336_v14  ;;  %v7337_v41 = vunpack.i.l.bf16 %v7336_v14  ;;  %v7333_v3 = vunpack.i.h.bf16 %v7331_v54  ;;  %6936 = vmatprep.subr.bf16.mxu0 %v6935_v4  ;;  %1405 = vadd.xlane.f32.xlu0 %v1404_v30  ;;  %v7332_v6 = vunpack.i.l.bf16 %v7331_v54 }
 0x667   : > { %6938 = vmatpush3.bf16.msra.mxu0 %v6935_v4  ;;  %7544 = vpow2.f32 %v1391_v60 }
 0x668   : > { %v7537_v9 = vpop.eup %7536  ;;  %v6983_v11 = vpack.c.bf16 %v7338_v35, %v7337_v41  ;;  %v6939_v20 = vpack.c.bf16 %v7333_v3, %v7332_v6  ;;  %v779_v3 = vld [vmem:[%s9220_s2 + $0x58] sm:$0xff]  ;;  %v778_v6 = vld [vmem:[%s9220_s2 + $0x50] sm:$0xff] }
 0x669   : > { %v7346_v17 = vpop.permute.xlu0 %7345  ;;  %v7341_v38 = vpop.permute.xlu1 %7340  ;;  %v1401_v21 = vsel %vm952_vm3, %v7537_v9, 0.0 }
 0x66a   : > { %v7343_v27 = vunpack.i.h.bf16 %v7341_v38  ;;  %v7342_v23 = vunpack.i.l.bf16 %v7341_v38  ;;  %6985 = vmatprep.subr.msk.bf16.mxu1 %vm7952_vm2, %v6983_v11  ;;  %1402 = vadd.xlane.f32.xlu1 %v1401_v21  ;;  %v7539_v25 = vpop.eup %7538  ;;  %v7348_v62 = vunpack.i.h.bf16 %v7346_v17  ;;  %v7347_v1 = vunpack.i.l.bf16 %v7346_v17 }
 0x66b   : > { %6940 = vmatprep.subr.bf16.mxu0 %v6939_v20  ;;  %6988 = vmatpush3.bf16.xpose.msk.msra.mxu1 %vm7952_vm2, %v6983_v11  ;;  %v1407_v19 = vsel %vm952_vm3, %v7539_v25, 0.0 }
 0x66c   : > { %v7541_v26 = vpop.eup %7540  ;;  %v6989_v33 = vpack.c.bf16 %v7343_v27, %v7342_v23  ;;  %6942 = vmatpush3.bf16.msra.mxu0 %v6939_v20  ;;  %v6995_v43 = vpack.c.bf16 %v7348_v62, %v7347_v1 }
 0x66d   : > { %v2410_v34 = vpop.permute.xlu0 %2409  ;;  %v1410_v8 = vsel %vm952_vm3, %v7541_v26, 0.0  ;;  %v7543_v36 = vpop.eup %7542  ;;  %6356 = vmatprep.subr.mxu0 %v779_v3 }
 0x66e   : > { %6991 = vmatprep.subr.msk.bf16.mxu1 %vm7952_vm2, %v6989_v33  ;;  %6470 = vmatprep.mubr.msk.f32.mxu1 %vm220_vm0, %v2410_v34  ;;  %v1416_v24 = vsel %vm952_vm3, %v7543_v36, 0.0 }
 0x66f   : > { %6345 = vmatmul.mubr.msk.f32.vlgmr.msra.gmra.mrb[24].mxu0 %vm952_vm3, %v7531_v45  ;;  %1411 = vadd.xlane.f32.xlu0 %v1410_v8  ;;  %v7351_v45 = vpop.permute.xlu1 %7350 }
 0x670   : > { %1408 = vadd.xlane.f32.xlu1 %v1407_v19  ;;  %6347 = vmatprep.mubr.msk.f32.mxu0 %vm952_vm3, %v7537_v9  ;;  %v7353_v57 = vunpack.i.h.bf16 %v7351_v45  ;;  %v7352_v12 = vunpack.i.l.bf16 %v7351_v45 }
 0x671   : > { %v7545_v40 = vpop.eup %7544  ;;  %v2414_v14 = vpop.permute.xlu0 %2413  ;;  %6357 = vmatpush3.msra.mxu0 %v779_v3 }
 0x672   : > { %v1413_v46 = vsel %vm952_vm3, %v7545_v40, 0.0  ;;  %6370 = vmatprep.subr.mxu0 %v778_v6 }
 0x673   : > { %6348 = vmatmul.mubr.msk.f32.gmra.mrb[26].mxu0 %vm952_vm3, %v7535_v32  ;;  %1417 = vadd.xlane.f32.xlu0 %v1416_v24  ;;  %v7001_v32 = vpack.c.bf16 %v7353_v57, %v7352_v12  ;;  %v2412_v4 = vpop.permute.xlu1 %2411 }
 0x674   : > { %2053 = vmax.xlane.f32.xlu1 %v2052_v48  ;;  %6350 = vmatprep.mubr.msk.f32.mxu0 %vm952_vm3, %v7539_v25 }
 0x675   : > { %6994 = vmatpush3.bf16.xpose.msk.msra.mxu1 %vm7952_vm2, %v6989_v33  ;;  %v2418_v30 = vpop.permute.xlu0 %2417 }
 0x676   : > { %6997 = vmatprep.subr.msk.bf16.mxu1 %vm7952_vm2, %v6995_v43 }
 0x677   : > { %6351 = vmatmul.mubr.msk.f32.gmra.mrb[28].mxu0 %vm952_vm3, %v7541_v26  ;;  %v2416_v54 = vpop.permute.xlu1 %2415 }
 0x678   : > { %1414 = vadd.xlane.f32.xlu1 %v1413_v46  ;;  %6353 = vmatprep.mubr.msk.f32.mxu0 %vm952_vm3, %v7545_v40 }
 0x679   : > { %v2422_v35 = vpop.permute.xlu0 %2421 }
 0x67b   : > { %6354 = vmatmul.mubr.msk.f32.gmra.mrb[30].mxu0 %vm952_vm3, %v7543_v36  ;;  %v2420_v60 = vpop.permute.xlu1 %2419 }
 0x67d   : > { %7000 = vmatpush3.bf16.xpose.msk.msra.mxu1 %vm7952_vm2, %v6995_v43 }
 0x67e   : > { %7003 = vmatprep.subr.msk.bf16.mxu1 %vm7952_vm2, %v7001_v32 }
 0x67f   : > { %v2424_v41 = vpop.permute.xlu1 %2423 }
 0x685   : > { %7006 = vmatpush3.bf16.xpose.msk.msra.mxu1 %vm7952_vm2, %v7001_v32 }
 0x689   : > { %7360 = vrot.lane.b32.xlu1 %v7914_v39, %s7720_s22  ;;  %7355 = vrot.lane.b32.xlu0 %v7900_v28, %s7720_s22 }
 0x68c   : > { %6471 = vmatmul.mubr.msk.f32.vlgmr.msra.gmra.mrb[40].mxu1 %vm220_vm0, %v2412_v4 }
 0x68d   : > { %6473 = vmatprep.mubr.msk.f32.mxu1 %vm220_vm0, %v2414_v14  ;;  %7370 = vrot.lane.b32.xlu1 %v7940_v0, %s7720_s22 }
 0x68e   : > { %7365 = vrot.lane.b32.xlu0 %v7926_v51, %s7720_s22 }
 0x690   : > { %6474 = vmatmul.mubr.msk.f32.gmra.mrb[42].mxu1 %vm220_vm0, %v2416_v54 }
 0x691   : > { %6476 = vmatprep.mubr.msk.f32.mxu1 %vm220_vm0, %v2418_v30 }
 0x694   : > { %6477 = vmatmul.mubr.msk.f32.gmra.mrb[44].mxu1 %vm220_vm0, %v2420_v60 }
 0x695   : > { %6479 = vmatprep.mubr.msk.f32.mxu1 %vm220_vm0, %v2422_v35 }
 0x698   : > { %6480 = vmatmul.mubr.msk.f32.gmra.mrb[46].mxu1 %vm220_vm0, %v2424_v41 }
 0x6aa   : > { %v1006_v9 = vpop.xlane.xlu0 %1005 }
 0x6ae   : > { %v1009_v11 = vpop.xlane.xlu0 %1008  ;;  %v1003_v17 = vpop.xlane.xlu1 %1002 }
 0x6b2   : > { %v1012_v38 = vpop.xlane.xlu0 %1011  ;;  %v1015_v20 = vpop.xlane.xlu1 %1014 }
 0x6b6   : > { %v8352_v21 = vpop.xlane.xlu0 %1017  ;;  %v8354_v27 = vpop.xlane.xlu1 %1020 }
 0x6ba   : > { %v8356_v23 = vpop.xlane.xlu0 %1023  ;;  %v8358_v25 = vpop.xlane.xlu1 %2032 }
 0x6be   : > { %v8360_v26 = vpop.xlane.xlu0 %2035  ;;  %v8362_v33 = vpop.xlane.xlu1 %2038 }
 0x6c2   : > { %v8364_v34 = vpop.xlane.xlu0 %2041  ;;  %v8366_v8 = vpop.xlane.xlu1 %2044 }
 0x6c6   : > { %v8368_v36 = vpop.xlane.xlu0 %2047  ;;  %v8370_v19 = vpop.xlane.xlu1 %2050 }
 0x6ee   : > { %v1400_v1 = vpop.xlane.xlu1 %1399 }
 0x6ef   : > { %v1397_v62 = vpop.xlane.xlu0 %1396 }
 0x6f0   : > { %7546 = vrcp.f32 %v1397_v62 }
 0x6f1   : > { %7548 = vrcp.f32 %v1400_v1 }
 0x6f3   : > { %v1406_v24 = vpop.xlane.xlu0 %1405 }
 0x6f7   : > { %v1403_v48 = vpop.xlane.xlu1 %1402 }
 0x6f8   : > { %7550 = vrcp.f32 %v1403_v48 }
 0x6f9   : > { %7552 = vrcp.f32 %v1406_v24 }
 0x6fa   : > { %v7547_v4 = vpop.eup %7546 }
 0x6fb   : > { %v7549_v60 = vpop.eup %7548 }
 0x6fc   : > { %v1412_v40 = vpop.xlane.xlu0 %1411 }
 0x6fd   : > { %v1409_v43 = vpop.xlane.xlu1 %1408 }
 0x6fe   : > { %7554 = vrcp.f32 %v1409_v43 }
 0x6ff   : > { %7556 = vrcp.f32 %v1412_v40 }
 0x700   : > { %v1418_v45 = vpop.xlane.xlu0 %1417  ;;  %7558 = vrcp.f32 %v1003_v17 }
 0x701   : > { %v8372_v46 = vpop.xlane.xlu1 %2053 }
 0x702   : > { %v7551_v62 = vpop.eup %7550 }
 0x703   : > { %v7553_v48 = vpop.eup %7552 }
 0x704   : > { %v7356_v57 = vpop.permute.xlu0 %7355 }
 0x705   : > { %v1415_v12 = vpop.xlane.xlu1 %1414  ;;  %v7358_v14 = vunpack.i.h.bf16 %v7356_v57  ;;  %v7357_v54 = vunpack.i.l.bf16 %v7356_v57 }
 0x706   : > { %7560 = vrcp.f32 %v1415_v12 }
 0x707   : > { %7562 = vrcp.f32 %v1418_v45  ;;  %v6967_v24 = vpack.c.bf16 %v7358_v14, %v7357_v54 }
 0x708   : > { %7564 = vrcp.f32 %v1006_v9  ;;  %v7555_v57 = vpop.eup %7554 }
 0x709   : > { %7566 = vrcp.f32 %v1009_v11  ;;  %v7557_v12 = vpop.eup %7556 }
 0x70a   : > { %7568 = vrcp.f32 %v1012_v38  ;;  %v7559_v14 = vpop.eup %7558 }
 0x70b   : > { %7570 = vrcp.f32 %v1015_v20  ;;  %v2055_v20 = vsub.f32 %v8251_v44, %v8358_v25  ;;  %v2057_v44 = vsub.f32 %v8259_v59, %v8362_v33  ;;  %v2059_v59 = vsub.f32 %v8267_v31, %v8366_v8 }
 0x70c   : > { %7572 = vrcp.f32 %v8352_v21  ;;  %v2056_v21 = vsub.f32 %v8257_v56, %v8360_v26  ;;  %v2058_v56 = vsub.f32 %v8265_v37, %v8364_v34  ;;  %v2061_v31 = vsub.f32 %v8275_v55, %v8370_v19 }
 0x70d   : > { %7574 = vrcp.f32 %v8354_v27  ;;  %v7366_v27 = vpop.permute.xlu0 %7365 }
 0x70e   : > { %7576 = vrcp.f32 %v8356_v23  ;;  %v2065_v23 = vmul.f32 1.442695, %v2056_v21  ;;  %v2069_v34 = vmul.f32 1.442695, %v2058_v56 }
 0x742   : > { %v6346_v32 = vpop.f32.mrb[24].mxu0 }
 0x743   : > { %v1541_v30 = vpop.f32.mrb[25].mxu0  ;;  %v1589_v41 = vmul.f32 %v7549_v60, %v6346_v32 }
 0x744   : > { %v1588_v35 = vmul.f32 %v7547_v4, %v1541_v30  ;;  %v7361_v30 = vpop.permute.xlu1 %7360 }
 0x746   : > { %v6349_v3 = vpop.f32.mrb[26].mxu0  ;;  %6358 = vmatprep.mubr.msk.f32.mxu0 %vm220_vm0, %v1588_v35 }
 0x747   : > { %v1551_v1 = vpop.f32.mrb[27].mxu0  ;;  %6359 = vmatmul.mubr.msk.f32.vlgmr.msra.gmra.mrb[32].mxu0 %vm220_vm0, %v1589_v41  ;;  %v1591_v43 = vmul.f32 %v7553_v48, %v6349_v3  ;;  %v1162_v41 = vmul.f32 %v7559_v14, %v8169_v52  ;;  %v2063_v52 = vmul.f32 1.442695, %v2055_v20 }
 0x748   : > { %v1590_v40 = vmul.f32 %v7551_v62, %v1551_v1  ;;  %6371 = vmatpush3.msra.mxu0 %v778_v6  ;;  %v7561_v6 = vpop.eup %7560  ;;  %v7363_v62 = vunpack.i.h.bf16 %v7361_v30  ;;  %v7362_v1 = vunpack.i.l.bf16 %v7361_v30  ;;  %v7371_v26 = vpop.permute.xlu1 %7370 }
 0x749   : > { %6968 = vmatprep.subr.bf16.mxu0 %v6967_v24  ;;  %v7563_v11 = vpop.eup %7562  ;;  %7578 = vpow2.f32 %v2063_v52  ;;  %v7372_v14 = vunpack.i.l.bf16 %v7371_v26 }
 0x74a   : > { %v6352_v17 = vpop.f32.mrb[28].mxu0  ;;  %6361 = vmatprep.mubr.msk.f32.mxu0 %vm220_vm0, %v1590_v40  ;;  %v7565_v38 = vpop.eup %7564  ;;  %7580 = vpow2.f32 %v2065_v23  ;;  %v780_v23 = vld [vmem:[%s9220_s2 + $0x60] sm:$0xff] }
 0x74b   : > { %v1561_v45 = vpop.f32.mrb[29].mxu0  ;;  %6362 = vmatmul.mubr.msk.f32.gmra.mrb[34].mxu0 %vm220_vm0, %v1591_v43  ;;  %v1593_v4 = vmul.f32 %v7557_v12, %v6352_v17  ;;  %v7567_v3 = vpop.eup %7566  ;;  %v1163_v48 = vmul.f32 %v7565_v38, %v8167_v15  ;;  %v7368_v17 = vunpack.i.h.bf16 %v7366_v27  ;;  %v2067_v15 = vmul.f32 1.442695, %v2057_v44 }
 0x74c   : > { %v1592_v32 = vmul.f32 %v7555_v57, %v1561_v45  ;;  %v7569_v25 = vpop.eup %7568  ;;  %v1164_v40 = vmul.f32 %v7567_v3, %v8173_v42  ;;  %v7367_v57 = vunpack.i.l.bf16 %v7366_v27  ;;  %v6971_v45 = vpack.c.bf16 %v7363_v62, %v7362_v1 }
 0x74d   : > { %v7571_v43 = vpop.eup %7570  ;;  %v1165_v42 = vmul.f32 %v7569_v25, %v8171_v29  ;;  %7582 = vpow2.f32 %v2067_v15  ;;  %v2071_v29 = vmul.f32 1.442695, %v2059_v59 }
 0x74e   : > { %v6355_v54 = vpop.f32.mrb[30].mxu0  ;;  %6364 = vmatprep.mubr.msk.f32.mxu0 %vm220_vm0, %v1592_v32  ;;  %v7573_v33 = vpop.eup %7572  ;;  %v1166_v12 = vmul.f32 %v7571_v43, %v8177_v50  ;;  %v6975_v37 = vpack.c.bf16 %v7368_v17, %v7367_v57  ;;  %7584 = vpow2.f32 %v2069_v34 }
 0x74f   : > { %v1571_v9 = vpop.f32.mrb[31].mxu0  ;;  %6365 = vmatmul.mubr.msk.f32.gmra.mrb[36].mxu0 %vm220_vm0, %v1593_v4  ;;  %v1595_v35 = vmul.f32 %v7563_v11, %v6355_v54  ;;  %v7575_v32 = vpop.eup %7574  ;;  %v7373_v4 = vunpack.i.h.bf16 %v7371_v26  ;;  %v1167_v50 = vmul.f32 %v7573_v33, %v8175_v16  ;;  %7586 = vpow2.f32 %v2071_v29 }
 0x750   : > { %v1594_v60 = vmul.f32 %v7561_v6, %v1571_v9  ;;  %v7577_v8 = vpop.eup %7576  ;;  %v1168_v54 = vmul.f32 %v7575_v32, %v8181_v22  ;;  %v2075_v16 = vmul.f32 1.442695, %v2061_v31 }
 0x751   : > { %v6979_v6 = vpack.c.bf16 %v7373_v4, %v7372_v14  ;;  %v1169_v22 = vmul.f32 %v7577_v8, %v8179_v18 }
 0x752   : > { %6367 = vmatprep.mubr.msk.f32.mxu0 %vm220_vm0, %v1594_v60 }
 0x753   : > { %6368 = vmatmul.mubr.msk.f32.gmra.mrb[38].mxu0 %vm220_vm0, %v1595_v35 }
 0x754   : > { %6372 = vmatprep.mubr.msk.f32.mxu0 %vm220_vm0, %v1162_v41 }
 0x757   : > { %6373 = vmatmul.mubr.msk.f32.vlgmr.msra.gmra.mrb[32].mxu0 %vm220_vm0, %v1163_v48 }
 0x758   : > { %6970 = vmatpush3.bf16.msra.mxu0 %v6967_v24  ;;  %6375 = vmatprep.mubr.msk.f32.mxu0 %vm220_vm0, %v1164_v40  ;;  %v2060_v24 = vsub.f32 %v8273_v63, %v8368_v36  ;;  %v2062_v36 = vsub.f32 %v8307_v47, %v8372_v46  ;;  %v7579_v46 = vpop.eup %7578 }
 0x759   : > { %6972 = vmatprep.subr.bf16.mxu0 %v6971_v45  ;;  %v7581_v41 = vpop.eup %7580  ;;  %v2079_v15 = vsel %vm952_vm3, %v7579_v46, 0.0 }
 0x75a   : > { %v2073_v63 = vmul.f32 1.442695, %v2060_v24  ;;  %v2077_v35 = vmul.f32 1.442695, %v2062_v36  ;;  %v7583_v62 = vpop.eup %7582  ;;  %v2082_v59 = vsel %vm952_vm3, %v7581_v41, 0.0 }
 0x75b   : > { %6376 = vmatmul.mubr.msk.f32.gmra.mrb[34].mxu0 %vm220_vm0, %v1165_v42  ;;  %v7585_v44 = vpop.eup %7584 }
 0x75c   : > { %6974 = vmatpush3.bf16.msra.mxu0 %v6971_v45  ;;  %6378 = vmatprep.mubr.msk.f32.mxu0 %vm220_vm0, %v1166_v12  ;;  %7588 = vpow2.f32 %v2073_v63  ;;  %v7587_v25 = vpop.eup %7586 }
 0x75d   : > { %6976 = vmatprep.subr.bf16.mxu0 %v6975_v37  ;;  %7590 = vpow2.f32 %v2075_v16  ;;  %v2091_v42 = vsel %vm952_vm3, %v7587_v25, 0.0 }
 0x75e   : > { %7592 = vpow2.f32 %v2077_v35 }
 0x75f   : > { %v6472_v9 = vpop.f32.mrb[40].mxu1  ;;  %6379 = vmatmul.mubr.msk.f32.gmra.mrb[36].mxu0 %vm220_vm0, %v1167_v50 }
 0x760   : > { %v8414_v11 = vmul.f32 0.35355338, %v6472_v9  ;;  %6978 = vmatpush3.bf16.msra.mxu0 %v6975_v37  ;;  %v2539_v30 = vpop.f32.mrb[41].mxu1  ;;  %6381 = vmatprep.mubr.msk.f32.mxu0 %vm220_vm0, %v1168_v54 }
 0x761   : > { %v8417_v55 = vmul.f32 0.35355338, %v2539_v30  ;;  %6980 = vmatprep.subr.bf16.mxu0 %v6979_v6 }
 0x762   : > { %v2589_v19 = vsel %vm952_vm3, %v8414_v11, -inf }
 0x763   : > { %2590 = vmax.xlane.f32.xlu0 %v2589_v19  ;;  %v6475_v60 = vpop.f32.mrb[42].mxu1  ;;  %v2586_v47 = vsel %vm952_vm3, %v8417_v55, -inf  ;;  %6382 = vmatmul.mubr.msk.f32.gmra.mrb[38].mxu0 %vm220_vm0, %v1169_v22 }
 0x764   : > { %v8425_v38 = vmul.f32 0.35355338, %v6475_v60  ;;  %v2549_v20 = vpop.f32.mrb[43].mxu1  ;;  %2587 = vmax.xlane.f32.xlu1 %v2586_v47  ;;  %6982 = vmatpush3.bf16.msra.mxu0 %v6979_v6 }
 0x765   : > { %v8427_v18 = vmul.f32 0.35355338, %v2549_v20  ;;  %6428 = vmatprep.mubr.msk.f32.mxu0 %vm952_vm3, %v7579_v46  ;;  %6440 = vmatprep.subr.mxu0 %v780_v23 }
 0x766   : > { %v2595_v3 = vsel %vm952_vm3, %v8425_v38, -inf  ;;  %v7589_v17 = vpop.eup %7588 }
 0x767   : > { %2596 = vmax.xlane.f32.xlu0 %v2595_v3  ;;  %v6478_v1 = vpop.f32.mrb[44].mxu1  ;;  %v2592_v21 = vsel %vm952_vm3, %v8427_v18, -inf  ;;  %6429 = vmatmul.mubr.msk.f32.vlgmr.msra.gmra.mrb[40].mxu0 %vm952_vm3, %v7581_v41  ;;  %v7591_v57 = vpop.eup %7590  ;;  %v2094_v12 = vsel %vm952_vm3, %v7589_v17, 0.0 }
 0x768   : > { %v2559_v27 = vpop.f32.mrb[45].mxu1  ;;  %2593 = vmax.xlane.f32.xlu1 %v2592_v21  ;;  %6431 = vmatprep.mubr.msk.f32.mxu0 %vm952_vm3, %v7583_v62  ;;  %v7593_v45 = vpop.eup %7592  ;;  %v8452_v56 = vmul.f32 0.35355338, %v6478_v1  ;;  %v2097_v33 = vsel %vm952_vm3, %v7591_v57, 0.0 }
 0x769   : > { %v8436_v48 = vmul.f32 0.35355338, %v2559_v27  ;;  %6441 = vmatpush3.msra.mxu0 %v780_v23  ;;  %v2100_v32 = vsel %vm952_vm3, %v7593_v45, 0.0 }
 0x76a   : > { %v2601_v26 = vsel %vm952_vm3, %v8452_v56, -inf }
 0x76b   : > { %v6481_v52 = vpop.f32.mrb[46].mxu1  ;;  %v2598_v40 = vsel %vm952_vm3, %v8436_v48, -inf  ;;  %6432 = vmatmul.mubr.msk.f32.gmra.mrb[42].mxu0 %vm952_vm3, %v7585_v44 }
 0x76c   : > { %2599 = vmax.xlane.f32.xlu0 %v2598_v40  ;;  %v2569_v43 = vpop.f32.mrb[47].mxu1  ;;  %6434 = vmatprep.mubr.msk.f32.mxu0 %vm952_vm3, %v7587_v25  ;;  %v8470_v14 = vmul.f32 0.35355338, %v6481_v52 }
 0x76d   : > { %v8468_v4 = vmul.f32 0.35355338, %v2569_v43 }
 0x76e   : > { %v2607_v34 = vsel %vm952_vm3, %v8470_v14, -inf }
 0x76f   : > { %6435 = vmatmul.mubr.msk.f32.gmra.mrb[44].mxu0 %vm952_vm3, %v7589_v17  ;;  %v2604_v37 = vsel %vm952_vm3, %v8468_v4, -inf }
 0x770   : > { %6437 = vmatprep.mubr.msk.f32.mxu0 %vm952_vm3, %v7591_v57 }
 0x773   : > { %6438 = vmatmul.mubr.msk.f32.gmra.mrb[46].mxu0 %vm952_vm3, %v7593_v45 }
 0x779   : > { %7375 = vrot.lane.b32.xlu1 %v7900_v28, %s7722_s24  ;;  %v2088_v28 = vsel %vm952_vm3, %v7585_v44, 0.0 }
 0x782   : > { %7380 = vrot.lane.b32.xlu0 %v7914_v39, %s7722_s24  ;;  %v2085_v39 = vsel %vm952_vm3, %v7583_v62, 0.0 }
 0x79d   : > { %2602 = vmax.xlane.f32.xlu1 %v2601_v26 }
 0x7a1   : > { %2080 = vadd.xlane.f32.xlu0 %v2079_v15  ;;  %2083 = vadd.xlane.f32.xlu1 %v2082_v59 }
 0x7a5   : > { %2089 = vadd.xlane.f32.xlu0 %v2088_v28  ;;  %2092 = vadd.xlane.f32.xlu1 %v2091_v42 }
 0x7a9   : > { %2086 = vadd.xlane.f32.xlu0 %v2085_v39  ;;  %2098 = vadd.xlane.f32.xlu1 %v2097_v33 }
 0x7ad   : > { %2095 = vadd.xlane.f32.xlu0 %v2094_v12 }
 0x7b1   : > { %2101 = vadd.xlane.f32.xlu0 %v2100_v32 }
 0x7ba   : > { %7390 = vrot.lane.b32.xlu1 %v7940_v0, %s7722_s24 }
 0x7c7   : > { %7385 = vrot.lane.b32.xlu0 %v7926_v51, %s7722_s24 }
 0x7e6   : > { %2605 = vmax.xlane.f32.xlu0 %v2604_v37 }
 0x7ea   : > { %2608 = vmax.xlane.f32.xlu0 %v2607_v34 }
 0x7f0   : > { %v2591_v24 = vpop.xlane.xlu0 %2590 }
 0x7f1   : > { %v2611_v29 = vsub.f32 %v8414_v11, %v2591_v24  ;;  %v2588_v31 = vpop.xlane.xlu1 %2587 }
 0x7f2   : > { %v2610_v0 = vsub.f32 %v8417_v55, %v2588_v31 }
 0x7f3   : > { %v2620_v50 = vmul.f32 1.442695, %v2611_v29 }
 0x7f4   : > { %v2618_v51 = vmul.f32 1.442695, %v2610_v0  ;;  %v2597_v8 = vpop.xlane.xlu0 %2596 }
 0x7f5   : > { %7594 = vpow2.f32 %v2620_v50  ;;  %v2613_v54 = vsub.f32 %v8425_v38, %v2597_v8  ;;  %v2594_v6 = vpop.xlane.xlu1 %2593 }
 0x7f6   : > { %7596 = vpow2.f32 %v2618_v51  ;;  %v2612_v9 = vsub.f32 %v8427_v18, %v2594_v6 }
 0x7f7   : > { %v2624_v63 = vmul.f32 1.442695, %v2613_v54 }
 0x7f8   : > { %v2622_v36 = vmul.f32 1.442695, %v2612_v9 }
 0x7f9   : > { %v2600_v30 = vpop.xlane.xlu0 %2599  ;;  %v7376_v16 = vpop.permute.xlu1 %7375 }
 0x7fa   : > { %7598 = vpow2.f32 %v2622_v36  ;;  %v2614_v11 = vsub.f32 %v8436_v48, %v2600_v30  ;;  %v7378_v22 = vunpack.i.h.bf16 %v7376_v16  ;;  %v7377_v19 = vunpack.i.l.bf16 %v7376_v16 }
 0x7fb   : > { %7600 = vpow2.f32 %v2624_v63 }
 0x7fc   : > { %v2626_v55 = vmul.f32 1.442695, %v2614_v11  ;;  %v7007_v60 = vpack.c.bf16 %v7378_v22, %v7377_v19 }
 0x7fd   : > { %v7381_v21 = vpop.permute.xlu0 %7380 }
 0x7fe   : > { %7008 = vmatprep.subr.bf16.mxu0 %v7007_v60  ;;  %7602 = vpow2.f32 %v2626_v55  ;;  %v7383_v59 = vunpack.i.h.bf16 %v7381_v21  ;;  %v7382_v28 = vunpack.i.l.bf16 %v7381_v21 }
 0x7ff   : > { %v8481_v47 = vpop.eup %7594 }
 0x800   : > { %v8483_v46 = vpop.eup %7596  ;;  %v2637_v35 = vsel %vm952_vm3, %v8481_v47, 0.0  ;;  %v7011_v24 = vpack.c.bf16 %v7383_v59, %v7382_v28 }
 0x801   : > { %2638 = vadd.xlane.f32.xlu1 %v2637_v35  ;;  %v2634_v38 = vsel %vm952_vm3, %v8483_v46, 0.0 }
 0x802   : > { %2635 = vadd.xlane.f32.xlu0 %v2634_v38 }
 0x804   : > { %v8489_v20 = vpop.eup %7598 }
 0x805   : > { %v2640_v18 = vsel %vm952_vm3, %v8489_v20, 0.0  ;;  %v8493_v41 = vpop.eup %7600 }
 0x806   : > { %2641 = vadd.xlane.f32.xlu0 %v2640_v18  ;;  %v2643_v3 = vsel %vm952_vm3, %v8493_v41, 0.0 }
 0x808   : > { %v8497_v62 = vpop.eup %7602 }
 0x809   : > { %v2646_v1 = vsel %vm952_vm3, %v8497_v62, 0.0 }
 0x80a   : > { %2644 = vadd.xlane.f32.xlu0 %v2643_v3 }
 0x80e   : > { %2647 = vadd.xlane.f32.xlu0 %v2646_v1 }
 0x82a   : > { %v2603_v27 = vpop.xlane.xlu1 %2602 }
 0x82b   : > { %v2615_v48 = vsub.f32 %v8452_v56, %v2603_v27 }
 0x82d   : > { %v2628_v44 = vmul.f32 1.442695, %v2615_v48 }
 0x82e   : > { %v2081_v25 = vpop.xlane.xlu0 %2080  ;;  %v2084_v52 = vpop.xlane.xlu1 %2083 }
 0x82f   : > { %7604 = vpow2.f32 %v2628_v44 }
 0x830   : > { %7606 = vrcp.f32 %v2081_v25 }
 0x831   : > { %7608 = vrcp.f32 %v2084_v52 }
 0x832   : > { %v2090_v40 = vpop.xlane.xlu0 %2089  ;;  %v2093_v43 = vpop.xlane.xlu1 %2092 }
 0x836   : > { %v2087_v17 = vpop.xlane.xlu0 %2086  ;;  %v2099_v45 = vpop.xlane.xlu1 %2098 }
 0x837   : > { %7610 = vrcp.f32 %v2087_v17 }
 0x838   : > { %7612 = vrcp.f32 %v2090_v40 }
 0x839   : > { %v8502_v57 = vpop.eup %7604  ;;  %7614 = vrcp.f32 %v2093_v43 }
 0x83a   : > { %v2096_v23 = vpop.xlane.xlu0 %2095  ;;  %v2649_v26 = vsel %vm952_vm3, %v8502_v57, 0.0  ;;  %v6430_v56 = vpop.f32.mrb[40].mxu0 }
 0x83b   : > { %7616 = vrcp.f32 %v2096_v23  ;;  %2650 = vadd.xlane.f32.xlu0 %v2649_v26  ;;  %v7607_v15 = vpop.eup %7606  ;;  %v2217_v42 = vpop.f32.mrb[41].mxu0 }
 0x83c   : > { %v7609_v39 = vpop.eup %7608  ;;  %7618 = vrcp.f32 %v2099_v45  ;;  %v2264_v33 = vmul.f32 %v7607_v15, %v2217_v42  ;;  %v7391_v31 = vpop.permute.xlu1 %7390 }
 0x83d   : > { %v2265_v12 = vmul.f32 %v7609_v39, %v6430_v56  ;;  %v7393_v36 = vunpack.i.h.bf16 %v7391_v31  ;;  %v7392_v30 = vunpack.i.l.bf16 %v7391_v31 }
 0x83e   : > { %v2102_v32 = vpop.xlane.xlu0 %2101  ;;  %v6433_v37 = vpop.f32.mrb[42].mxu0  ;;  %6442 = vmatprep.mubr.msk.f32.mxu0 %vm220_vm0, %v2264_v33 }
 0x83f   : > { %7620 = vrcp.f32 %v2102_v32  ;;  %v2227_v34 = vpop.f32.mrb[43].mxu0  ;;  %6443 = vmatmul.mubr.msk.f32.vlgmr.msra.gmra.mrb[32].mxu0 %vm220_vm0, %v2265_v12  ;;  %v7019_v18 = vpack.c.bf16 %v7393_v36, %v7392_v30 }
 0x840   : > { %7010 = vmatpush3.bf16.msra.mxu0 %v7007_v60 }
 0x841   : > { %v7611_v29 = vpop.eup %7610  ;;  %7012 = vmatprep.subr.bf16.mxu0 %v7011_v24 }
 0x842   : > { %v7613_v0 = vpop.eup %7612  ;;  %v2266_v50 = vmul.f32 %v7611_v29, %v2227_v34  ;;  %v7386_v51 = vpop.permute.xlu0 %7385 }
 0x843   : > { %v6436_v8 = vpop.f32.mrb[44].mxu0  ;;  %v7615_v54 = vpop.eup %7614  ;;  %v7388_v6 = vunpack.i.h.bf16 %v7386_v51  ;;  %v7387_v9 = vunpack.i.l.bf16 %v7386_v51  ;;  %v2267_v16 = vmul.f32 %v7613_v0, %v6433_v37 }
 0x844   : > { %v2237_v63 = vpop.f32.mrb[45].mxu0  ;;  %6445 = vmatprep.mubr.msk.f32.mxu0 %vm220_vm0, %v2266_v50  ;;  %7014 = vmatpush3.bf16.msra.mxu0 %v7011_v24 }
 0x845   : > { %v2268_v11 = vmul.f32 %v7615_v54, %v2237_v63  ;;  %v7617_v22 = vpop.eup %7616  ;;  %v7015_v19 = vpack.c.bf16 %v7388_v6, %v7387_v9  ;;  %6446 = vmatmul.mubr.msk.f32.gmra.mrb[34].mxu0 %vm220_vm0, %v2267_v16  ;;  %v5704_v16 = vld [vmem:[%s9221_s3 + $0x14] ss:$0 sm:$0xff] }
 0x846   : > { %v2269_v55 = vmul.f32 %v7617_v22, %v6436_v8  ;;  %v6439_v60 = vpop.f32.mrb[46].mxu0  ;;  %v7619_v35 = vpop.eup %7618 }
 0x847   : > { %6448 = vmatprep.mubr.msk.f32.mxu0 %vm220_vm0, %v2268_v11  ;;  %7016 = vmatprep.subr.bf16.mxu0 %v7015_v19  ;;  %v2247_v38 = vpop.f32.mrb[47].mxu0 }
 0x848   : > { %v2270_v3 = vmul.f32 %v7619_v35, %v2247_v38  ;;  %7018 = vmatpush3.bf16.msra.mxu0 %v7015_v19 }
 0x849   : > { %v7621_v1 = vpop.eup %7620  ;;  %6449 = vmatmul.mubr.msk.f32.gmra.mrb[36].mxu0 %vm220_vm0, %v2269_v55  ;;  %7020 = vmatprep.subr.bf16.mxu0 %v7019_v18 }
 0x84a   : > { %v2271_v21 = vmul.f32 %v7621_v1, %v6439_v60  ;;  %6451 = vmatprep.mubr.msk.f32.mxu0 %vm220_vm0, %v2270_v3 }
 0x84c   : > { %7022 = vmatpush3.bf16.msra.mxu0 %v7019_v18 }
 0x84d   : > { %6452 = vmatmul.mubr.msk.f32.gmra.mrb[38].mxu0 %vm220_vm0, %v2271_v21 }
 0x84e   : > { %6498 = vmatprep.mubr.msk.f32.mxu0 %vm952_vm3, %v8483_v46 }
 0x851   : > { %6499 = vmatmul.mubr.msk.f32.vlgmr.msra.gmra.mrb[48].mxu0 %vm952_vm3, %v8481_v47 }
 0x852   : > { %6501 = vmatprep.mubr.msk.f32.mxu0 %vm952_vm3, %v8489_v20 }
 0x855   : > { %6502 = vmatmul.mubr.msk.f32.gmra.mrb[50].mxu0 %vm952_vm3, %v8493_v41 }
 0x856   : > { %6504 = vmatprep.mubr.msk.f32.mxu0 %vm952_vm3, %v8497_v62 }
 0x859   : > { %6505 = vmatmul.mubr.msk.f32.gmra.mrb[52].mxu0 %vm952_vm3, %v8502_v57 }
 0x873   : > { %v2606_v27 = vpop.xlane.xlu0 %2605 }
 0x874   : > { %v2616_v48 = vsub.f32 %v8468_v4, %v2606_v27  ;;  %v781_v4 = vld [vmem:[%s9220_s2 + $0x68] sm:$0xff] }
 0x875   : > { %6510 = vmatprep.subr.mxu0 %v781_v4 }
 0x876   : > { %v2630_v44 = vmul.f32 1.442695, %v2616_v48  ;;  %6511 = vmatpush3.msra.mxu0 %v781_v4 }
 0x877   : > { %v2609_v46 = vpop.xlane.xlu0 %2608 }
 0x878   : > { %7622 = vpow2.f32 %v2630_v44  ;;  %v2617_v47 = vsub.f32 %v8470_v14, %v2609_v46 }
 0x87a   : > { %v2632_v25 = vmul.f32 1.442695, %v2617_v47 }
 0x87c   : > { %7624 = vpow2.f32 %v2632_v25 }
 0x882   : > { %v7623_v20 = vpop.eup %7622 }
 0x883   : > { %6507 = vmatprep.mubr.msk.f32.mxu0 %vm952_vm3, %v7623_v20  ;;  %v2652_v41 = vsel %vm952_vm3, %v7623_v20, 0.0 }
 0x884   : > { %2653 = vadd.xlane.f32.xlu0 %v2652_v41 }
 0x886   : > { %v7625_v62 = vpop.eup %7624 }
 0x887   : > { %6508 = vmatmul.mubr.msk.f32.gmra.mrb[54].mxu0 %vm952_vm3, %v7625_v62  ;;  %v2655_v52 = vsel %vm952_vm3, %v7625_v62, 0.0 }
 0x888   : > { %2656 = vadd.xlane.f32.xlu0 %v2655_v52 }
 0x88e   : > { %v2639_v17 = vpop.xlane.xlu1 %2638 }
 0x88f   : > { %v2636_v14 = vpop.xlane.xlu0 %2635 }
 0x890   : > { %7626 = vrcp.f32 %v2636_v14 }
 0x891   : > { %7628 = vrcp.f32 %v2639_v17 }
 0x893   : > { %v2642_v40 = vpop.xlane.xlu0 %2641 }
 0x894   : > { %7630 = vrcp.f32 %v2642_v40 }
 0x897   : > { %v2645_v43 = vpop.xlane.xlu0 %2644 }
 0x898   : > { %7632 = vrcp.f32 %v2645_v43 }
 0x89a   : > { %v7627_v26 = vpop.eup %7626 }
 0x89b   : > { %v2648_v57 = vpop.xlane.xlu0 %2647  ;;  %v7629_v15 = vpop.eup %7628 }
 0x89c   : > { %7634 = vrcp.f32 %v2648_v57 }
 0x89e   : > { %v7631_v39 = vpop.eup %7630 }
 0x8a2   : > { %v7633_v12 = vpop.eup %7632 }
 0x8a6   : > { %v7635_v24 = vpop.eup %7634 }
 0x8c8   : > { %v2651_v45 = vpop.xlane.xlu0 %2650 }
 0x8c9   : > { %7636 = vrcp.f32 %v2651_v45 }
 0x8d3   : > { %v7637_v31 = vpop.eup %7636 }
 0x911   : > { %v2654_v51 = vpop.xlane.xlu0 %2653 }
 0x912   : > { %7638 = vrcp.f32 %v2654_v51 }
 0x915   : > { %v2657_v8 = vpop.xlane.xlu0 %2656 }
 0x916   : > { %7640 = vrcp.f32 %v2657_v8 }
 0x91c   : > { %v7639_v6 = vpop.eup %7638 }
 0x920   : > { %v7641_v63 = vpop.eup %7640 }
 0x924   : > { %v6500_v23 = vpop.f32.mrb[48].mxu0 }
 0x925   : > { %v2772_v56 = vpop.f32.mrb[49].mxu0  ;;  %v2820_v28 = vmul.f32 %v7629_v15, %v6500_v23 }
 0x926   : > { %v2819_v59 = vmul.f32 %v7627_v26, %v2772_v56 }
 0x928   : > { %v6503_v42 = vpop.f32.mrb[50].mxu0  ;;  %6512 = vmatprep.mubr.msk.f32.mxu0 %vm220_vm0, %v2819_v59 }
 0x929   : > { %v2782_v33 = vpop.f32.mrb[51].mxu0  ;;  %6513 = vmatmul.mubr.msk.f32.vlgmr.msra.gmra.mrb[32].mxu0 %vm220_vm0, %v2820_v28  ;;  %v2822_v37 = vmul.f32 %v7633_v12, %v6503_v42 }
 0x92a   : > { %v2821_v32 = vmul.f32 %v7631_v39, %v2782_v33 }
 0x92c   : > { %v6506_v34 = vpop.f32.mrb[52].mxu0  ;;  %6515 = vmatprep.mubr.msk.f32.mxu0 %vm220_vm0, %v2821_v32 }
 0x92d   : > { %v2792_v29 = vpop.f32.mrb[53].mxu0  ;;  %6516 = vmatmul.mubr.msk.f32.gmra.mrb[34].mxu0 %vm220_vm0, %v2822_v37  ;;  %v2824_v50 = vmul.f32 %v7637_v31, %v6506_v34 }
 0x92e   : > { %v2823_v0 = vmul.f32 %v7635_v24, %v2792_v29 }
 0x930   : > { %6518 = vmatprep.mubr.msk.f32.mxu0 %vm220_vm0, %v2823_v0 }
 0x931   : > { %6519 = vmatmul.mubr.msk.f32.gmra.mrb[36].mxu0 %vm220_vm0, %v2824_v50 }
 0x95a   : > { %v6509_v54 = vpop.f32.mrb[54].mxu0 }
 0x95b   : > { %v2802_v9 = vpop.f32.mrb[55].mxu0  ;;  %v2826_v30 = vmul.f32 %v7641_v63, %v6509_v54 }
 0x95c   : > { %v2825_v36 = vmul.f32 %v7639_v6, %v2802_v9 }
 0x95e   : > { %6521 = vmatprep.mubr.msk.f32.mxu0 %vm220_vm0, %v2825_v36 }
 0x95f   : > { %6522 = vmatmul.mubr.msk.f32.gmra.mrb[38].mxu0 %vm220_vm0, %v2826_v30 }
 0x9fc   : > { %v6514_v11 = vpop.f32.mrb[32].mxu0 }
 0x9fd   : > { %v2917_v22 = vpop.f32.mrb[33].mxu0  ;;  %v2969_v19 = vadd.f32 %v6514_v11, %v5704_v16  ;;  %v3116_v11 = vld [vmem:[%s9220_s2 + $0x78] sm:$0xff] }
 0x9fe   : > { %v2968_v55 = vadd.f32 %v5704_v16, %v2917_v22 }
 0x9ff   : > { %v2977_v3 = vadd.f32 %v2969_v19, %v7818_v49  ;;  %v3117_v19 = vld [vmem:[%s9220_s2 + $0x80] sm:$0xff] }
 0xa00   : > { %v2976_v60 = vadd.f32 %v2968_v55, %v7826_v53  ;;  %v6517_v35 = vpop.f32.mrb[34].mxu0  ;;  %v3118_v55 = vld [vmem:[%s9220_s2 + $0x88] sm:$0xff] }
 0xa01   : > { %v2971_v38 = vadd.f32 %v6517_v35, %v5704_v16  ;;  %v2927_v18 = vpop.f32.mrb[35].mxu0  ;;  %v2989_v53 = vsel %vm510_vm1, %v2977_v3, 0.0 }
 0xa02   : > { %v2970_v1 = vadd.f32 %v5704_v16, %v2927_v18  ;;  %v2986_v21 = vsel %vm510_vm1, %v2976_v60, 0.0 }
 0xa03   : > { %v2979_v27 = vadd.f32 %v2971_v38, %v7835_v58  ;;  %2987 = vadd.xlane.f32.xlu0 %v2986_v21 }
 0xa04   : > { %v6520_v48 = vpop.f32.mrb[36].mxu0  ;;  %v2978_v25 = vadd.f32 %v2970_v1, %v7842_v61 }
 0xa05   : > { %v2973_v44 = vadd.f32 %v6520_v48, %v5704_v16  ;;  %v2937_v46 = vpop.f32.mrb[37].mxu0  ;;  %v2995_v47 = vsel %vm510_vm1, %v2979_v27, 0.0 }
 0xa06   : > { %v2972_v20 = vadd.f32 %v5704_v16, %v2937_v46  ;;  %2996 = vadd.xlane.f32.xlu1 %v2995_v47  ;;  %v2992_v58 = vsel %vm510_vm1, %v2978_v25, 0.0  ;;  %v3120_v47 = vld [vmem:[%s9220_s2 + $0x90] sm:$0xff] }
 0xa07   : > { %v2981_v41 = vadd.f32 %v2973_v44, %v7853_v2  ;;  %2990 = vadd.xlane.f32.xlu0 %v2989_v53 }
 0xa08   : > { %v2980_v62 = vadd.f32 %v2972_v20, %v7860_v5 }
 0xa09   : > { %v3001_v49 = vsel %vm510_vm1, %v2981_v41, 0.0 }
 0xa0a   : > { %3002 = vadd.xlane.f32.xlu1 %v3001_v49  ;;  %v2998_v52 = vsel %vm510_vm1, %v2980_v62, 0.0 }
 0xa0b   : > { %2993 = vadd.xlane.f32.xlu0 %v2992_v58 }
 0xa0f   : > { %2999 = vadd.xlane.f32.xlu0 %v2998_v52 }
 0xa32   : > { %v6523_v4 = vpop.f32.mrb[38].mxu0 }
 0xa33   : > { %v2975_v61 = vadd.f32 %v6523_v4, %v5704_v16  ;;  %v2947_v14 = vpop.f32.mrb[39].mxu0 }
 0xa34   : > { %v2974_v40 = vadd.f32 %v5704_v16, %v2947_v14  ;;  %v3115_v16 = vld [vmem:[%s9220_s2 + $0x70] sm:$0xff] }
 0xa35   : > { %v2983_v43 = vadd.f32 %v2975_v61, %v7871_v10  ;;  %v7023_v22 = vpack.c.bf16 %v3116_v11, %v3115_v16 }
 0xa36   : > { %v2982_v2 = vadd.f32 %v2974_v40, %v7878_v13 }
 0xa37   : > { %v3007_v17 = vsel %vm510_vm1, %v2983_v43, 0.0  ;;  %7024 = vmatprep.subr.bf16.mxu1 %v7023_v22 }
 0xa38   : > { %3008 = vadd.xlane.f32.xlu1 %v3007_v17  ;;  %v3004_v5 = vsel %vm510_vm1, %v2982_v2, 0.0  ;;  %7026 = vmatpush3.bf16.msra.mxu1 %v7023_v22 }
 0xa39   : > { %3005 = vadd.xlane.f32.xlu0 %v3004_v5 }
 0xa90   : > { %v2988_v57 = vpop.xlane.xlu0 %2987 }
 0xa91   : > { %v3011_v45 = vmul.f32 0.03125, %v2988_v57 }
 0xa93   : > { %v8562_v23 = vsub.f32 %v2976_v60, %v3011_v45  ;;  %v2997_v26 = vpop.xlane.xlu1 %2996  ;;  %v7027_v60 = vpack.c.bf16 %v3118_v55, %v3117_v19 }
 0xa94   : > { %v3014_v56 = vmul.f32 0.03125, %v2997_v26  ;;  %v2991_v15 = vpop.xlane.xlu0 %2990 }
 0xa95   : > { %v3012_v59 = vmul.f32 0.03125, %v2991_v15  ;;  %v3027_v28 = vmul.f32 %v8562_v23, %v8562_v23  ;;  %7028 = vmatprep.subr.bf16.mxu1 %v7027_v60 }
 0xa96   : > { %v8566_v10 = vsub.f32 %v2979_v27, %v3014_v56  ;;  %7030 = vmatpush3.bf16.msra.mxu1 %v7027_v60  ;;  %v5705_v56 = vld [vmem:[%s9221_s3 + $0x17] ss:$0 sm:$0xff] }
 0xa97   : > { %v8568_v13 = vsub.f32 %v2977_v3, %v3012_v59  ;;  %v3003_v42 = vpop.xlane.xlu1 %3002  ;;  %v3035_v39 = vsel %vm510_vm1, %v3027_v28, 0.0 }
 0xa98   : > { %v3016_v33 = vmul.f32 0.03125, %v3003_v42  ;;  %v2994_v12 = vpop.xlane.xlu0 %2993  ;;  %3036 = vadd.xlane.f32.xlu0 %v3035_v39  ;;  %v3030_v31 = vmul.f32 %v8566_v10, %v8566_v10  ;;  %v5706_v42 = vld [vmem:[%s9221_s3 + $0x18] ss:$0 sm:$0xff] }
 0xa99   : > { %v3013_v32 = vmul.f32 0.03125, %v2994_v12  ;;  %v3028_v37 = vmul.f32 %v8568_v13, %v8568_v13 }
 0xa9a   : > { %v8573_v34 = vsub.f32 %v2981_v41, %v3016_v33  ;;  %v3044_v54 = vsel %vm510_vm1, %v3030_v31, 0.0 }
 0xa9b   : > { %v8575_v24 = vsub.f32 %v2978_v25, %v3013_v32  ;;  %v3038_v29 = vsel %vm510_vm1, %v3028_v37, 0.0  ;;  %v3121_v25 = vld [vmem:[%s9220_s2 + $0x98] sm:$0xff]  ;;  %v3122_v37 = vld [vmem:[%s9220_s2 + $0xa0] sm:$0xff] }
 0xa9c   : > { %v3000_v0 = vpop.xlane.xlu0 %2999  ;;  %3039 = vadd.xlane.f32.xlu1 %v3038_v29  ;;  %v3032_v9 = vmul.f32 %v8573_v34, %v8573_v34  ;;  %v7031_v20 = vpack.c.bf16 %v3121_v25, %v3120_v47 }
 0xa9d   : > { %v3015_v50 = vmul.f32 0.03125, %v3000_v0  ;;  %v3029_v51 = vmul.f32 %v8575_v24, %v8575_v24 }
 0xa9e   : > { %v3050_v36 = vsel %vm510_vm1, %v3032_v9, 0.0  ;;  %7032 = vmatprep.subr.bf16.mxu1 %v7031_v20  ;;  %v3125_v9 = vld [vmem:[%s9220_s2 + $0xb8] sm:$0xff] }
 0xa9f   : > { %v8582_v8 = vsub.f32 %v2980_v62, %v3015_v50  ;;  %v3041_v6 = vsel %vm510_vm1, %v3029_v51, 0.0 }
 0xaa0   : > { %3045 = vadd.xlane.f32.xlu1 %v3044_v54  ;;  %3042 = vadd.xlane.f32.xlu0 %v3041_v6  ;;  %v3124_v6 = vld [vmem:[%s9220_s2 + $0xb0] sm:$0xff] }
 0xaa1   : > { %v3031_v63 = vmul.f32 %v8582_v8, %v8582_v8  ;;  %v7039_v11 = vpack.c.bf16 %v3125_v9, %v3124_v6 }
 0xaa3   : > { %v3047_v30 = vsel %vm510_vm1, %v3031_v63, 0.0 }
 0xaa4   : > { %3051 = vadd.xlane.f32.xlu1 %v3050_v36  ;;  %3048 = vadd.xlane.f32.xlu0 %v3047_v30 }
 0xac5   : > { %v3009_v35 = vpop.xlane.xlu1 %3008 }
 0xac6   : > { %v3018_v38 = vmul.f32 0.03125, %v3009_v35  ;;  %v3006_v18 = vpop.xlane.xlu0 %3005 }
 0xac7   : > { %v3017_v3 = vmul.f32 0.03125, %v3006_v18 }
 0xac8   : > { %v8604_v1 = vsub.f32 %v2983_v43, %v3018_v38 }
 0xac9   : > { %v8606_v21 = vsub.f32 %v2982_v2, %v3017_v3 }
 0xaca   : > { %v3034_v27 = vmul.f32 %v8604_v1, %v8604_v1 }
 0xacb   : > { %v3033_v48 = vmul.f32 %v8606_v21, %v8606_v21 }
 0xacc   : > { %v3056_v44 = vsel %vm510_vm1, %v3034_v27, 0.0 }
 0xacd   : > { %3057 = vadd.xlane.f32.xlu1 %v3056_v44  ;;  %v3053_v46 = vsel %vm510_vm1, %v3033_v48, 0.0 }
 0xace   : > { %3054 = vadd.xlane.f32.xlu0 %v3053_v46 }
 0xb25   : > { %v3037_v53 = vpop.xlane.xlu0 %3036 }
 0xb26   : > { %v3059_v41 = vmul.f32 0.03125, %v3037_v53 }
 0xb28   : > { %v3067_v49 = vadd.f32 1e-05, %v3059_v41 }
 0xb29   : > { %v3040_v62 = vpop.xlane.xlu1 %3039 }
 0xb2a   : > { %7642 = vrsqrt.f32 %v3067_v49  ;;  %v3060_v58 = vmul.f32 0.03125, %v3040_v62  ;;  %v3126_v62 = vld [vmem:[%s9220_s2 + $0xc0] sm:$0xff] }
 0xb2c   : > { %v3068_v52 = vadd.f32 1e-05, %v3060_v58  ;;  %v5707_v58 = vld [vmem:[%s9221_s3 + $0x15] ss:$0 sm:$0xff] }
 0xb2d   : > { %v3046_v4 = vpop.xlane.xlu1 %3045  ;;  %v3043_v61 = vpop.xlane.xlu0 %3042 }
 0xb2e   : > { %7644 = vrsqrt.f32 %v3068_v52  ;;  %v3062_v14 = vmul.f32 0.03125, %v3046_v4  ;;  %v3061_v40 = vmul.f32 0.03125, %v3043_v61 }
 0xb30   : > { %v3070_v43 = vadd.f32 1e-05, %v3062_v14  ;;  %v3069_v2 = vadd.f32 1e-05, %v3061_v40 }
 0xb31   : > { %v3052_v17 = vpop.xlane.xlu1 %3051  ;;  %v3049_v5 = vpop.xlane.xlu0 %3048 }
 0xb32   : > { %7646 = vrsqrt.f32 %v3070_v43  ;;  %v3064_v57 = vmul.f32 0.03125, %v3052_v17  ;;  %v3063_v45 = vmul.f32 0.03125, %v3049_v5 }
 0xb33   : > { %7648 = vrsqrt.f32 %v3069_v2 }
 0xb34   : > { %v7643_v26 = vpop.eup %7642  ;;  %v3072_v15 = vadd.f32 1e-05, %v3064_v57  ;;  %v3071_v59 = vadd.f32 1e-05, %v3063_v45 }
 0xb35   : > { %v3083_v28 = vmul.f32 %v7643_v26, %v8562_v23  ;;  %v3123_v23 = vld [vmem:[%s9220_s2 + $0xa8] sm:$0xff] }
 0xb36   : > { %7650 = vrsqrt.f32 %v3072_v15  ;;  %v7035_v51 = vpack.c.bf16 %v3123_v23, %v3122_v37 }
 0xb37   : > { %7652 = vrsqrt.f32 %v3071_v59  ;;  %v3095_v39 = vmul.f32 %v5705_v56, %v3083_v28 }
 0xb38   : > { %v7645_v33 = vpop.eup %7644 }
 0xb39   : > { %v3084_v12 = vmul.f32 %v7645_v33, %v8568_v13  ;;  %v8628_v32 = vadd.f32 %v5706_v42, %v3095_v39 }
 0xb3b   : > { %v3096_v29 = vmul.f32 %v5705_v56, %v3084_v12  ;;  %6532 = vmatprep.mubr.msk.f32.mxu1 %vm510_vm1, %v8628_v32 }
 0xb3c   : > { %v7647_v31 = vpop.eup %7646 }
 0xb3d   : > { %v7649_v0 = vpop.eup %7648  ;;  %v8638_v50 = vadd.f32 %v5706_v42, %v3096_v29  ;;  %v3086_v13 = vmul.f32 %v7647_v31, %v8566_v10 }
 0xb3e   : > { %v3085_v54 = vmul.f32 %v7649_v0, %v8575_v24  ;;  %v5716_v0 = vld [vmem:[%s9221_s3 + $0x16] ss:$0 sm:$0xff] }
 0xb3f   : > { %6533 = vmatmul.mubr.msk.f32.vlgmr.msra.gmra.mrb[48].mxu1 %vm510_vm1, %v8638_v50  ;;  %v3098_v63 = vmul.f32 %v5705_v56, %v3086_v13 }
 0xb40   : > { %v7651_v36 = vpop.eup %7650  ;;  %v3097_v30 = vmul.f32 %v5705_v56, %v3085_v54  ;;  %7034 = vmatpush3.bf16.msra.mxu1 %v7031_v20 }
 0xb41   : > { %v7653_v16 = vpop.eup %7652  ;;  %v8650_v10 = vadd.f32 %v5706_v42, %v3098_v63  ;;  %v3088_v24 = vmul.f32 %v7651_v36, %v8573_v34  ;;  %7036 = vmatprep.subr.bf16.mxu1 %v7035_v51 }
 0xb42   : > { %v8653_v22 = vadd.f32 %v5706_v42, %v3097_v30  ;;  %v3087_v19 = vmul.f32 %v7653_v16, %v8582_v8 }
 0xb43   : > { %v3100_v55 = vmul.f32 %v5705_v56, %v3088_v24 }
 0xb44   : > { %6535 = vmatprep.mubr.msk.f32.mxu1 %vm510_vm1, %v8653_v22  ;;  %v3099_v60 = vmul.f32 %v5705_v56, %v3087_v19  ;;  %7038 = vmatpush3.bf16.msra.mxu1 %v7035_v51 }
 0xb45   : > { %6536 = vmatmul.mubr.msk.f32.gmra.mrb[50].mxu1 %vm510_vm1, %v8650_v10  ;;  %v8660_v35 = vadd.f32 %v5706_v42, %v3100_v55  ;;  %7040 = vmatprep.subr.bf16.mxu1 %v7039_v11 }
 0xb46   : > { %v8662_v38 = vadd.f32 %v5706_v42, %v3099_v60 }
 0xb48   : > { %6538 = vmatprep.mubr.msk.f32.mxu1 %vm510_vm1, %v8662_v38  ;;  %7042 = vmatpush3.bf16.msra.mxu1 %v7039_v11 }
 0xb49   : > { %6539 = vmatmul.mubr.msk.f32.gmra.mrb[52].mxu1 %vm510_vm1, %v8660_v35 }
 0xb5a   : > { %v3058_v34 = vpop.xlane.xlu1 %3057 }
 0xb5b   : > { %v3066_v8 = vmul.f32 0.03125, %v3058_v34  ;;  %v3055_v18 = vpop.xlane.xlu0 %3054 }
 0xb5c   : > { %v3065_v3 = vmul.f32 0.03125, %v3055_v18 }
 0xb5d   : > { %v3074_v27 = vadd.f32 1e-05, %v3066_v8 }
 0xb5e   : > { %v3073_v48 = vadd.f32 1e-05, %v3065_v3 }
 0xb5f   : > { %7654 = vrsqrt.f32 %v3074_v27 }
 0xb60   : > { %7656 = vrsqrt.f32 %v3073_v48 }
 0xb69   : > { %v7655_v44 = vpop.eup %7654 }
 0xb6a   : > { %v7657_v46 = vpop.eup %7656  ;;  %v3090_v47 = vmul.f32 %v7655_v44, %v8604_v1  ;;  %v3127_v1 = vld [vmem:[%s9220_s2 + $0xc8] sm:$0xff] }
 0xb6b   : > { %v3089_v25 = vmul.f32 %v7657_v46, %v8606_v21  ;;  %v7043_v21 = vpack.c.bf16 %v3127_v1, %v3126_v62 }
 0xb6c   : > { %v3102_v20 = vmul.f32 %v5705_v56, %v3090_v47 }
 0xb6d   : > { %v3101_v53 = vmul.f32 %v5705_v56, %v3089_v25  ;;  %7044 = vmatprep.subr.bf16.mxu1 %v7043_v21 }
 0xb6e   : > { %v8672_v49 = vadd.f32 %v5706_v42, %v3102_v20  ;;  %7046 = vmatpush3.bf16.msra.mxu1 %v7043_v21 }
 0xb6f   : > { %v8670_v41 = vadd.f32 %v5706_v42, %v3101_v53 }
 0xb71   : > { %6541 = vmatprep.mubr.msk.f32.mxu1 %vm510_vm1, %v8670_v41 }
 0xb72   : > { %6542 = vmatmul.mubr.msk.f32.gmra.mrb[54].mxu1 %vm510_vm1, %v8672_v49 }
 0xc12   : > { %v6534_v52 = vpop.f32.mrb[48].mxu1 }
 0xc13   : > { %v3229_v4 = vadd.f32 %v6534_v52, %v5707_v58  ;;  %v3223_v61 = vpop.f32.mrb[49].mxu1 }
 0xc14   : > { %v3224_v14 = vadd.f32 %v5707_v58, %v3223_v61 }
 0xc15   : > { %v3263_v43 = vmax.f32 %v3229_v4, 0.0 }
 0xc16   : > { %v3262_v40 = vmax.f32 %v3224_v14, 0.0 }
 0xc18   : > { %v6537_v2 = vpop.f32.mrb[50].mxu1  ;;  %6560 = vmatprep.mubr.msk.f32.mxu1 %vm952_vm3, %v3262_v40 }
 0xc19   : > { %v3239_v17 = vadd.f32 %v6537_v2, %v5707_v58  ;;  %v3233_v5 = vpop.f32.mrb[51].mxu1  ;;  %6561 = vmatmul.mubr.msk.f32.vlgmr.msra.gmra.mrb[56].mxu1 %vm952_vm3, %v3263_v43 }
 0xc1a   : > { %v3234_v57 = vadd.f32 %v5707_v58, %v3233_v5 }
 0xc1b   : > { %v3265_v56 = vmax.f32 %v3239_v17, 0.0 }
 0xc1c   : > { %v3264_v45 = vmax.f32 %v3234_v57, 0.0  ;;  %v6540_v26 = vpop.f32.mrb[52].mxu1 }
 0xc1d   : > { %v3249_v15 = vadd.f32 %v6540_v26, %v5707_v58  ;;  %v3243_v59 = vpop.f32.mrb[53].mxu1 }
 0xc1e   : > { %v3244_v28 = vadd.f32 %v5707_v58, %v3243_v59  ;;  %6563 = vmatprep.mubr.msk.f32.mxu1 %vm952_vm3, %v3264_v45 }
 0xc1f   : > { %6564 = vmatmul.mubr.msk.f32.gmra.mrb[58].mxu1 %vm952_vm3, %v3265_v56  ;;  %v3267_v39 = vmax.f32 %v3249_v15, 0.0 }
 0xc20   : > { %v3266_v42 = vmax.f32 %v3244_v28, 0.0 }
 0xc22   : > { %6566 = vmatprep.mubr.msk.f32.mxu1 %vm952_vm3, %v3266_v42 }
 0xc23   : > { %6567 = vmatmul.mubr.msk.f32.gmra.mrb[60].mxu1 %vm952_vm3, %v3267_v39 }
 0xc45   : > { %v6543_v33 = vpop.f32.mrb[54].mxu1 }
 0xc46   : > { %v3259_v12 = vadd.f32 %v6543_v33, %v5707_v58  ;;  %v3253_v37 = vpop.f32.mrb[55].mxu1 }
 0xc47   : > { %v3254_v23 = vadd.f32 %v5707_v58, %v3253_v37 }
 0xc48   : > { %v3269_v31 = vmax.f32 %v3259_v12, 0.0 }
 0xc49   : > { %v3268_v29 = vmax.f32 %v3254_v23, 0.0 }
 0xc4b   : > { %6569 = vmatprep.mubr.msk.f32.mxu1 %vm952_vm3, %v3268_v29 }
 0xc4c   : > { %6570 = vmatmul.mubr.msk.f32.gmra.mrb[62].mxu1 %vm952_vm3, %v3269_v31 }
 0xcec   : > { %v6562_v13 = vpop.f32.mrb[56].mxu1 }
 0xced   : > { %v3370_v51 = vadd.f32 %v6562_v13, %v5716_v0  ;;  %v3364_v54 = vpop.f32.mrb[57].mxu1  ;;  %v3690_v13 = vld [vmem:[%s9220_s2 + $0xf8] sm:$0xff] }
 0xcee   : > { %v3365_v6 = vadd.f32 %v5716_v0, %v3364_v54  ;;  %v3551_v54 = vld [vmem:[%s9220_s2 + $0xd0] sm:$0xff] }
 0xcef   : > { %v3404_v9 = vadd.f32 %v3370_v51, %v8638_v50 }
 0xcf0   : > { %v3403_v63 = vadd.f32 %v3365_v6, %v8628_v32  ;;  %v3552_v6 = vld [vmem:[%s9220_s2 + $0xd8] sm:$0xff] }
 0xcf1   : > { %v3416_v36 = vsel %vm510_vm1, %v3404_v9, 0.0 }
 0xcf2   : > { %v6565_v30 = vpop.f32.mrb[58].mxu1  ;;  %3417 = vadd.xlane.f32.xlu1 %v3416_v36  ;;  %v3413_v16 = vsel %vm510_vm1, %v3403_v63, 0.0  ;;  %v3692_v36 = vld [vmem:[%s9220_s2 + $0x108] sm:$0xff] }
 0xcf3   : > { %v3380_v24 = vadd.f32 %v6565_v30, %v5716_v0  ;;  %v3374_v11 = vpop.f32.mrb[59].mxu1  ;;  %3414 = vadd.xlane.f32.xlu0 %v3413_v16  ;;  %v3553_v16 = vld [vmem:[%s9220_s2 + $0xe0] sm:$0xff] }
 0xcf4   : > { %v3375_v19 = vadd.f32 %v5716_v0, %v3374_v11 }
 0xcf5   : > { %v3406_v55 = vadd.f32 %v3380_v24, %v8650_v10  ;;  %v3554_v24 = vld [vmem:[%s9220_s2 + $0xe8] sm:$0xff] }
 0xcf6   : > { %v3405_v60 = vadd.f32 %v3375_v19, %v8653_v22  ;;  %v6568_v34 = vpop.f32.mrb[60].mxu1  ;;  %v7051_v11 = vpack.c.bf16 %v3554_v24, %v3553_v16 }
 0xcf7   : > { %v3390_v8 = vadd.f32 %v6568_v34, %v5716_v0  ;;  %v3384_v18 = vpop.f32.mrb[61].mxu1  ;;  %v3422_v50 = vsel %vm510_vm1, %v3406_v55, 0.0 }
 0xcf8   : > { %v3385_v32 = vadd.f32 %v5716_v0, %v3384_v18  ;;  %3423 = vadd.xlane.f32.xlu1 %v3422_v50  ;;  %v3419_v3 = vsel %vm510_vm1, %v3405_v60, 0.0 }
 0xcf9   : > { %v3408_v27 = vadd.f32 %v3390_v8, %v8660_v35  ;;  %3420 = vadd.xlane.f32.xlu0 %v3419_v3 }
 0xcfa   : > { %v3407_v48 = vadd.f32 %v3385_v32, %v8662_v38 }
 0xcfb   : > { %v3428_v44 = vsel %vm510_vm1, %v3408_v27, 0.0 }
 0xcfc   : > { %3429 = vadd.xlane.f32.xlu1 %v3428_v44  ;;  %v3425_v10 = vsel %vm510_vm1, %v3407_v48, 0.0 }
 0xcfd   : > { %3426 = vadd.xlane.f32.xlu0 %v3425_v10 }
 0xd1f   : > { %v6571_v22 = vpop.f32.mrb[62].mxu1 }
 0xd20   : > { %v3400_v46 = vadd.f32 %v6571_v22, %v5716_v0  ;;  %v3394_v47 = vpop.f32.mrb[63].mxu1 }
 0xd21   : > { %v3395_v25 = vadd.f32 %v5716_v0, %v3394_v47  ;;  %v3689_v0 = vld [vmem:[%s9220_s2 + $0xf0] sm:$0xff] }
 0xd22   : > { %v8711_v20 = vadd.f32 %v3400_v46, %v8672_v49  ;;  %v7055_v51 = vpack.c.bf16 %v3690_v13, %v3689_v0 }
 0xd23   : > { %v8714_v53 = vadd.f32 %v3395_v25, %v8670_v41 }
 0xd24   : > { %v3434_v35 = vsel %vm510_vm1, %v8711_v20, 0.0  ;;  %7056 = vmatprep.subr.bf16.mxu1 %v7055_v51 }
 0xd25   : > { %3435 = vadd.xlane.f32.xlu1 %v3434_v35  ;;  %v3431_v38 = vsel %vm510_vm1, %v8714_v53, 0.0  ;;  %7058 = vmatpush3.bf16.msra.mxu1 %v7055_v51 }
 0xd26   : > { %3432 = vadd.xlane.f32.xlu0 %v3431_v38 }
 0xd7f   : > { %v3418_v62 = vpop.xlane.xlu1 %3417 }
 0xd80   : > { %v3438_v1 = vmul.f32 0.03125, %v3418_v62  ;;  %v3415_v21 = vpop.xlane.xlu0 %3414 }
 0xd81   : > { %v3437_v58 = vmul.f32 0.03125, %v3415_v21 }
 0xd82   : > { %v8720_v52 = vsub.f32 %v3404_v9, %v3438_v1  ;;  %v7047_v9 = vpack.c.bf16 %v3552_v6, %v3551_v54 }
 0xd83   : > { %v8722_v4 = vsub.f32 %v3403_v63, %v3437_v58  ;;  %v3691_v63 = vld [vmem:[%s9220_s2 + $0x100] sm:$0xff] }
 0xd84   : > { %v3454_v41 = vmul.f32 %v8720_v52, %v8720_v52  ;;  %7048 = vmatprep.subr.bf16.mxu0 %v7047_v9  ;;  %v7059_v30 = vpack.c.bf16 %v3692_v36, %v3691_v63  ;;  %v7702_v63 = vld [vmem:[%s9219_s1 + $0x10] sm:$0xff] }
 0xd85   : > { %v3424_v49 = vpop.xlane.xlu1 %3423  ;;  %v3453_v61 = vmul.f32 %v8722_v4, %v8722_v4  ;;  %7050 = vmatpush3.bf16.msra.mxu0 %v7047_v9 }
 0xd86   : > { %v3440_v14 = vmul.f32 0.03125, %v3424_v49  ;;  %v3421_v40 = vpop.xlane.xlu0 %3420  ;;  %v3464_v43 = vsel %vm510_vm1, %v3454_v41, 0.0  ;;  %7060 = vmatprep.subr.bf16.mxu1 %v7059_v30  ;;  %7052 = vmatprep.subr.bf16.mxu0 %v7051_v11 }
 0xd87   : > { %v3439_v2 = vmul.f32 0.03125, %v3421_v40  ;;  %3465 = vadd.xlane.f32.xlu1 %v3464_v43  ;;  %v3461_v17 = vsel %vm510_vm1, %v3453_v61, 0.0  ;;  %7062 = vmatpush3.bf16.msra.mxu1 %v7059_v30  ;;  %v8789_v40 = vld [vmem:[%s9221_s3 + $0x19] ss:$0 sm:$0xff] }
 0xd88   : > { %v8730_v5 = vsub.f32 %v3406_v55, %v3440_v14  ;;  %3462 = vadd.xlane.f32.xlu0 %v3461_v17  ;;  %v5726_v17 = vld [vmem:[%s9221_s3 + $0x1a] ss:$0 sm:$0xff] }
 0xd89   : > { %v8732_v57 = vsub.f32 %v3405_v60, %v3439_v2  ;;  %v3430_v45 = vpop.xlane.xlu1 %3429  ;;  %7054 = vmatpush3.bf16.msra.mxu0 %v7051_v11  ;;  %v7704_v11 = vld [vmem:[%s9219_s1 + $0x20] sm:$0xff] }
 0xd8a   : > { %v3442_v26 = vmul.f32 0.03125, %v3430_v45  ;;  %v3427_v56 = vpop.xlane.xlu0 %3426  ;;  %v3456_v15 = vmul.f32 %v8730_v5, %v8730_v5 }
 0xd8b   : > { %v3441_v59 = vmul.f32 0.03125, %v3427_v56  ;;  %v3455_v28 = vmul.f32 %v8732_v57, %v8732_v57 }
 0xd8c   : > { %v8738_v42 = vsub.f32 %v3408_v27, %v3442_v26  ;;  %v3470_v39 = vsel %vm510_vm1, %v3456_v15, 0.0 }
 0xd8d   : > { %v8741_v33 = vsub.f32 %v3407_v48, %v3441_v59  ;;  %3471 = vadd.xlane.f32.xlu1 %v3470_v39  ;;  %v3467_v12 = vsel %vm510_vm1, %v3455_v28, 0.0 }
 0xd8e   : > { %3468 = vadd.xlane.f32.xlu0 %v3467_v12  ;;  %v3458_v37 = vmul.f32 %v8738_v42, %v8738_v42 }
 0xd8f   : > { %v3457_v23 = vmul.f32 %v8741_v33, %v8741_v33 }
 0xd90   : > { %v3476_v29 = vsel %vm510_vm1, %v3458_v37, 0.0 }
 0xd91   : > { %3477 = vadd.xlane.f32.xlu1 %v3476_v29  ;;  %v3473_v31 = vsel %vm510_vm1, %v3457_v23, 0.0 }
 0xd92   : > { %3474 = vadd.xlane.f32.xlu0 %v3473_v31 }
 0xdb2   : > { %v3436_v19 = vpop.xlane.xlu1 %3435 }
 0xdb3   : > { %v3444_v55 = vmul.f32 0.03125, %v3436_v19  ;;  %v3433_v60 = vpop.xlane.xlu0 %3432 }
 0xdb4   : > { %v3443_v34 = vmul.f32 0.03125, %v3433_v60 }
 0xdb5   : > { %v8775_v8 = vsub.f32 %v8711_v20, %v3444_v55  ;;  %v7705_v55 = vld [vmem:[%s9219_s1 + $0x28] sm:$0xff] }
 0xdb6   : > { %v8778_v18 = vsub.f32 %v8714_v53, %v3443_v34 }
 0xdb7   : > { %v3460_v50 = vmul.f32 %v8775_v8, %v8775_v8 }
 0xdb8   : > { %v3459_v32 = vmul.f32 %v8778_v18, %v8778_v18 }
 0xdb9   : > { %v3482_v3 = vsel %vm510_vm1, %v3460_v50, 0.0 }
 0xdba   : > { %3483 = vadd.xlane.f32.xlu1 %v3482_v3  ;;  %v3479_v27 = vsel %vm510_vm1, %v3459_v32, 0.0 }
 0xdbb   : > { %3480 = vadd.xlane.f32.xlu0 %v3479_v27 }
 0xe14   : > { %v3466_v48 = vpop.xlane.xlu1 %3465 }
 0xe15   : > { %v3486_v44 = vmul.f32 0.03125, %v3466_v48  ;;  %v3463_v10 = vpop.xlane.xlu0 %3462 }
 0xe16   : > { %v3485_v22 = vmul.f32 0.03125, %v3463_v10 }
 0xe17   : > { %v3494_v46 = vadd.f32 1e-05, %v3486_v44 }
 0xe18   : > { %v3493_v47 = vadd.f32 1e-05, %v3485_v22 }
 0xe19   : > { %7658 = vrsqrt.f32 %v3494_v46 }
 0xe1a   : > { %7660 = vrsqrt.f32 %v3493_v47  ;;  %v3472_v25 = vpop.xlane.xlu1 %3471 }
 0xe1b   : > { %v3488_v20 = vmul.f32 0.03125, %v3472_v25  ;;  %v3469_v53 = vpop.xlane.xlu0 %3468 }
 0xe1c   : > { %v3487_v35 = vmul.f32 0.03125, %v3469_v53 }
 0xe1d   : > { %v3496_v38 = vadd.f32 1e-05, %v3488_v20 }
 0xe1e   : > { %v3495_v62 = vadd.f32 1e-05, %v3487_v35  ;;  %v3478_v1 = vpop.xlane.xlu1 %3477  ;;  %v7706_v35 = vld [vmem:[%s9219_s1 + $0x30] sm:$0xff] }
 0xe1f   : > { %7662 = vrsqrt.f32 %v3496_v38  ;;  %v3490_v21 = vmul.f32 0.03125, %v3478_v1  ;;  %v3475_v58 = vpop.xlane.xlu0 %3474  ;;  %v7725_v1 = vmov 0.0  }
 0xe20   : > { %7664 = vrsqrt.f32 %v3495_v62  ;;  %v3489_v41 = vmul.f32 0.03125, %v3475_v58  ;;  %v7723_v62 = vmov 0.0|0.0   ;;  %5466 = vst [vmem:[%s9184_s30] sm:$0xff] %v7725_v1 }
 0xe21   : > { %v3498_v49 = vadd.f32 1e-05, %v3490_v21  ;;  %7079 = vmatprep.subr.bf16.mxu1 %v7723_v62  ;;  %7063 = vmatprep.subr.bf16.mxu0 %v7723_v62  ;;  %v5736_v21 = vld [vmem:[%s9221_s3 + $0x1c] ss:$0 sm:$0xff] }
 0xe22   : > { %v3497_v61 = vadd.f32 1e-05, %v3489_v41  ;;  %v5727_v41 = vld [vmem:[%s9221_s3 + $0x1b] ss:$0 sm:$0xff] }
 0xe23   : > { %v7659_v14 = vpop.eup %7658  ;;  %7666 = vrsqrt.f32 %v3498_v49 }
 0xe24   : > { %v7661_v43 = vpop.eup %7660  ;;  %v3510_v2 = vmul.f32 %v7659_v14, %v8720_v52  ;;  %7668 = vrsqrt.f32 %v3497_v61  ;;  %v7700_v52 = vld [vmem:[%s9219_s1] sm:$0xff] }
 0xe25   : > { %v3509_v45 = vmul.f32 %v7661_v43, %v8722_v4  ;;  %v7701_v4 = vld [vmem:[%s9219_s1 + $0x8] sm:$0xff] }
 0xe26   : > { %v3522_v26 = vmul.f32 %v8789_v40, %v3510_v2 }
 0xe27   : > { %v3521_v56 = vmul.f32 %v8789_v40, %v3509_v45 }
 0xe28   : > { %v3534_v15 = vadd.f32 %v5726_v17, %v3522_v26 }
 0xe29   : > { %v7663_v59 = vpop.eup %7662  ;;  %v3533_v28 = vadd.f32 %v5726_v17, %v3521_v56 }
 0xe2a   : > { %v7665_v39 = vpop.eup %7664  ;;  %v3512_v12 = vmul.f32 %v7663_v59, %v8730_v5  ;;  %v3544_v29 = vadd.f32 %v7701_v4, %v3534_v15 }
 0xe2b   : > { %6600 = vmatprep.mubr.msk.f32.mxu1 %vm510_vm1, %v3533_v28  ;;  %v3543_v37 = vadd.f32 %v7700_v52, %v3533_v28  ;;  %v3511_v23 = vmul.f32 %v7665_v39, %v8732_v57 }
 0xe2c   : > { %6601 = vmatmul.mubr.msk.f32.vlgmr.msra.gmra.mrb[64].mxu1 %vm510_vm1, %v3534_v15  ;;  %v3524_v31 = vmul.f32 %v8789_v40, %v3512_v12 }
 0xe2d   : > { %v7667_v0 = vpop.eup %7666  ;;  %6580 = vmatprep.mubr.msk.f32.mxu0 %vm510_vm1, %v3543_v37  ;;  %v3523_v5 = vmul.f32 %v8789_v40, %v3511_v23 }
 0xe2e   : > { %v7669_v13 = vpop.eup %7668  ;;  %6581 = vmatmul.mubr.msk.f32.vlgmr.msra.gmra.mrb[56].mxu0 %vm510_vm1, %v3544_v29  ;;  %v3536_v51 = vadd.f32 %v5726_v17, %v3524_v31  ;;  %v3514_v57 = vmul.f32 %v7667_v0, %v8738_v42  ;;  %v7703_v42 = vld [vmem:[%s9219_s1 + $0x18] sm:$0xff] }
 0xe2f   : > { %v3535_v54 = vadd.f32 %v5726_v17, %v3523_v5  ;;  %v3513_v6 = vmul.f32 %v7669_v13, %v8741_v33 }
 0xe30   : > { %v3526_v9 = vmul.f32 %v8789_v40, %v3514_v57  ;;  %v3546_v16 = vadd.f32 %v7703_v42, %v3536_v51 }
 0xe31   : > { %6603 = vmatprep.mubr.msk.f32.mxu1 %vm510_vm1, %v3535_v54  ;;  %v3545_v36 = vadd.f32 %v7702_v63, %v3535_v54  ;;  %v3525_v30 = vmul.f32 %v8789_v40, %v3513_v6 }
 0xe32   : > { %6604 = vmatmul.mubr.msk.f32.gmra.mrb[66].mxu1 %vm510_vm1, %v3536_v51  ;;  %v3538_v24 = vadd.f32 %v5726_v17, %v3526_v9 }
 0xe33   : > { %6583 = vmatprep.mubr.msk.f32.mxu0 %vm510_vm1, %v3545_v36  ;;  %v3537_v33 = vadd.f32 %v5726_v17, %v3525_v30 }
 0xe34   : > { %6584 = vmatmul.mubr.msk.f32.gmra.mrb[58].mxu0 %vm510_vm1, %v3546_v16  ;;  %v3548_v60 = vadd.f32 %v7705_v55, %v3538_v24 }
 0xe35   : > { %6606 = vmatprep.mubr.msk.f32.mxu1 %vm510_vm1, %v3537_v33  ;;  %v3547_v19 = vadd.f32 %v7704_v11, %v3537_v33 }
 0xe36   : > { %6607 = vmatmul.mubr.msk.f32.gmra.mrb[68].mxu1 %vm510_vm1, %v3538_v24 }
 0xe37   : > { %6586 = vmatprep.mubr.msk.f32.mxu0 %vm510_vm1, %v3547_v19 }
 0xe38   : > { %6587 = vmatmul.mubr.msk.f32.gmra.mrb[60].mxu0 %vm510_vm1, %v3548_v60 }
 0xe47   : > { %v3484_v34 = vpop.xlane.xlu1 %3483 }
 0xe48   : > { %v3492_v50 = vmul.f32 0.03125, %v3484_v34  ;;  %v3481_v32 = vpop.xlane.xlu0 %3480 }
 0xe49   : > { %v3491_v3 = vmul.f32 0.03125, %v3481_v32 }
 0xe4a   : > { %v3500_v27 = vadd.f32 1e-05, %v3492_v50 }
 0xe4b   : > { %v3499_v48 = vadd.f32 1e-05, %v3491_v3 }
 0xe4c   : > { %7670 = vrsqrt.f32 %v3500_v27 }
 0xe4d   : > { %7672 = vrsqrt.f32 %v3499_v48 }
 0xe56   : > { %v7671_v44 = vpop.eup %7670 }
 0xe57   : > { %v7673_v10 = vpop.eup %7672  ;;  %v3516_v22 = vmul.f32 %v7671_v44, %v8775_v8  ;;  %v7707_v8 = vld [vmem:[%s9219_s1 + $0x38] sm:$0xff] }
 0xe58   : > { %v3515_v46 = vmul.f32 %v7673_v10, %v8778_v18  ;;  %v8903_v10 = vld [vmem:[%s9221_s3 + $0x8] sm:$0xff] }
 0xe59   : > { %v3528_v47 = vmul.f32 %v8789_v40, %v3516_v22 }
 0xe5a   : > { %v3527_v25 = vmul.f32 %v8789_v40, %v3515_v46 }
 0xe5b   : > { %v3540_v20 = vadd.f32 %v5726_v17, %v3528_v47 }
 0xe5c   : > { %v3539_v53 = vadd.f32 %v5726_v17, %v3527_v25 }
 0xe5d   : > { %v3550_v18 = vadd.f32 %v7707_v8, %v3540_v20 }
 0xe5e   : > { %6609 = vmatprep.mubr.msk.f32.mxu1 %vm510_vm1, %v3539_v53  ;;  %v3549_v38 = vadd.f32 %v7706_v35, %v3539_v53 }
 0xe5f   : > { %6610 = vmatmul.mubr.msk.f32.gmra.mrb[70].mxu1 %vm510_vm1, %v3540_v20 }
 0xe60   : > { %6589 = vmatprep.mubr.msk.f32.mxu0 %vm510_vm1, %v3549_v38  ;;  %6647 = vmatprep.mubr.msk.f32.mxu1 %vm7724_vm4, %v7725_v1 }
 0xe61   : > { %6590 = vmatmul.mubr.msk.f32.gmra.mrb[62].mxu0 %vm510_vm1, %v3550_v18 }
 0xe62   : > { %6628 = vmatprep.mubr.msk.f32.mxu0 %vm7724_vm4, %v7725_v1 }
 0xeff   : > { %v6602_v58 = vpop.f32.mrb[64].mxu1 }
 0xf00   : > { %v3794_v49 = vadd.f32 %v6602_v58, %v5736_v21  ;;  %v3788_v61 = vpop.f32.mrb[65].mxu1 }
 0xf01   : > { %v3789_v14 = vadd.f32 %v5736_v21, %v3788_v61  ;;  %v6582_v40 = vpop.f32.mrb[56].mxu0 }
 0xf02   : > { %v3656_v43 = vadd.f32 %v6582_v40, %v5727_v41  ;;  %v3650_v2 = vpop.f32.mrb[57].mxu0 }
 0xf03   : > { %v3651_v17 = vadd.f32 %v5727_v41, %v3650_v2  ;;  %v7080_v45 = vpack.c.bf16 %v3794_v49, %v3789_v14  ;;  %v8862_v26 = vpack.i.bf16 %v3794_v49, %v3789_v14 }
 0xf05   : > { %v7064_v56 = vpack.c.bf16 %v3656_v43, %v3651_v17  ;;  %v6605_v15 = vpop.f32.mrb[66].mxu1  ;;  %7081 = vmatpush3.bf16.msra.mxu1 %v7080_v45  ;;  %v8864_v59 = vpack.i.bf16 %v3656_v43, %v3651_v17 }
 0xf06   : > { %v3804_v28 = vadd.f32 %v6605_v15, %v5736_v21  ;;  %v3798_v39 = vpop.f32.mrb[67].mxu1  ;;  %7082 = vmatprep.subr.bf16.mxu1 %v7723_v62 }
 0xf07   : > { %v3799_v12 = vadd.f32 %v5736_v21, %v3798_v39  ;;  %v6585_v52 = vpop.f32.mrb[58].mxu0  ;;  %7395 = vrot.lane.b32.xlu1 %v8864_v59, %s7718_s20  ;;  %7066 = vmatpush3.bf16.xpose.msk.msra.mxu0 %vm7952_vm2, %v7064_v56 }
 0xf08   : > { %v3666_v37 = vadd.f32 %v6585_v52, %v5727_v41  ;;  %v3660_v23 = vpop.f32.mrb[59].mxu0  ;;  %7067 = vmatprep.subr.bf16.mxu0 %v7723_v62 }
 0xf09   : > { %v3661_v4 = vadd.f32 %v5727_v41, %v3660_v23  ;;  %v6608_v29 = vpop.f32.mrb[68].mxu1  ;;  %v7083_v31 = vpack.c.bf16 %v3804_v28, %v3799_v12  ;;  %v8872_v0 = vpack.i.bf16 %v3804_v28, %v3799_v12 }
 0xf0a   : > { %v3814_v5 = vadd.f32 %v6608_v29, %v5736_v21  ;;  %v3808_v13 = vpop.f32.mrb[69].mxu1 }
 0xf0b   : > { %v7068_v51 = vpack.c.bf16 %v3666_v37, %v3661_v4  ;;  %v3809_v57 = vadd.f32 %v5736_v21, %v3808_v13  ;;  %v6588_v54 = vpop.f32.mrb[60].mxu0  ;;  %7084 = vmatpush3.bf16.msra.mxu1 %v7083_v31  ;;  %v8874_v6 = vpack.i.bf16 %v3666_v37, %v3661_v4 }
 0xf0c   : > { %v3676_v9 = vadd.f32 %v6588_v54, %v5727_v41  ;;  %v3670_v63 = vpop.f32.mrb[61].mxu0  ;;  %7085 = vmatprep.subr.bf16.mxu1 %v7723_v62 }
 0xf0d   : > { %v3671_v36 = vadd.f32 %v5727_v41, %v3670_v63  ;;  %v7086_v30 = vpack.c.bf16 %v3814_v5, %v3809_v57  ;;  %v8877_v42 = vpack.i.bf16 %v3814_v5, %v3809_v57 }
 0xf0f   : > { %v7072_v16 = vpack.c.bf16 %v3676_v9, %v3671_v36  ;;  %7087 = vmatpush3.bf16.msra.mxu1 %v7086_v30  ;;  %7070 = vmatpush3.bf16.xpose.msk.msra.mxu0 %vm7952_vm2, %v7068_v51  ;;  %v8881_v24 = vpack.i.bf16 %v3676_v9, %v3671_v36 }
 0xf10   : > { %7071 = vmatprep.subr.bf16.mxu0 %v7723_v62  ;;  %7088 = vmatprep.subr.bf16.mxu1 %v7723_v62 }
 0xf11   : > { %7405 = vrot.lane.b32.xlu1 %v8881_v24, %s7718_s20 }
 0xf17   : > { %7074 = vmatpush3.bf16.xpose.msk.msra.mxu0 %vm7952_vm2, %v7072_v16 }
 0xf18   : > { %7075 = vmatprep.subr.bf16.mxu0 %v7723_v62 }
 0xf32   : > { %v6611_v33 = vpop.f32.mrb[70].mxu1 }
 0xf33   : > { %v3824_v11 = vadd.f32 %v6611_v33, %v5736_v21  ;;  %v3818_v19 = vpop.f32.mrb[71].mxu1 }
 0xf34   : > { %v3819_v55 = vadd.f32 %v5736_v21, %v3818_v19  ;;  %v6591_v60 = vpop.f32.mrb[62].mxu0 }
 0xf35   : > { %v3686_v34 = vadd.f32 %v6591_v60, %v5727_v41  ;;  %v3680_v50 = vpop.f32.mrb[63].mxu0 }
 0xf36   : > { %v3681_v32 = vadd.f32 %v5727_v41, %v3680_v50  ;;  %v7089_v3 = vpack.c.bf16 %v3824_v11, %v3819_v55  ;;  %v8890_v27 = vpack.i.bf16 %v3824_v11, %v3819_v55  ;;  %v3827_v50 = vld [vmem:[%s9220_s2 + $0x110] sm:$0xff] }
 0xf38   : > { %v7076_v48 = vpack.c.bf16 %v3686_v34, %v3681_v32  ;;  %7090 = vmatpush3.bf16.msra.mxu1 %v7089_v3  ;;  %v8892_v44 = vpack.i.bf16 %v3686_v34, %v3681_v32 }
 0xf39   : > { %7091 = vmatprep.subr.bf16.mxu1 %v7723_v62 }
 0xf3a   : > { %7410 = vrot.lane.b32.xlu1 %v8892_v44, %s7718_s20  ;;  %7078 = vmatpush3.bf16.xpose.msk.msra.mxu0 %vm7952_vm2, %v7076_v48 }
 0xf3b   : > { %7107 = vmatprep.subr.bf16.mxu0 %v7723_v62 }
 0xf41   : > { %6629 = vmatmul.mubr.msk.f32.vlgmr.msra.gmra.mrb[64].mxu0 %vm220_vm0, %v8903_v10 }
 0xf42   : > { %6685 = vmatprep.mubr.msk.f32.mxu0 %vm7724_vm4, %v7725_v1 }
 0xf79   : > { %v7396_v8 = vpop.permute.xlu1 %7395 }
 0xf7a   : > { %v7398_v21 = vunpack.i.h.bf16 %v7396_v8  ;;  %v7397_v58 = vunpack.i.l.bf16 %v7396_v8 }
 0xf7c   : > { %v7092_v40 = vpack.c.bf16 %v7398_v21, %v7397_v58 }
 0xf83   : > { %v7406_v4 = vpop.permute.xlu1 %7405 }
 0xf84   : > { %v7408_v13 = vunpack.i.h.bf16 %v7406_v4  ;;  %v7407_v51 = vunpack.i.l.bf16 %v7406_v4 }
 0xf86   : > { %v7100_v54 = vpack.c.bf16 %v7408_v13, %v7407_v51 }
 0xfac   : > { %v7411_v9 = vpop.permute.xlu1 %7410 }
 0xfad   : > { %v7413_v63 = vunpack.i.h.bf16 %v7411_v9  ;;  %v7412_v36 = vunpack.i.l.bf16 %v7411_v9 }
 0xfaf   : > { %v7104_v30 = vpack.c.bf16 %v7413_v63, %v7412_v36 }
0x1014   : > { %v3925_v22 = vpop.f32.mrb[64].mxu0 }
0x1015   : > { %v3929_v46 = vmul.f32 0.35355338, %v3925_v22  ;;  %v6630_v47 = vpop.f32.mrb[65].mxu0 }
0x1017   : > { %v3930_v25 = vsel %vm952_vm3, %v3929_v46, -inf }
0x1018   : > { %3931 = vmax.xlane.f32.xlu0 %v3930_v25 }
0x102e   : > { %7400 = vrot.lane.b32.xlu0 %v8874_v6, %s7718_s20 }
0x1032   : > { %4014 = vrot.lane.b32.xlu0 %v8903_v10, %s7718_s20 }
0x1036   : > { %7415 = vrot.lane.b32.xlu0 %v8862_v26, %s7718_s20 }
0x103a   : > { %7420 = vrot.lane.b32.xlu0 %v8872_v0, %s7718_s20 }
0x103e   : > { %7425 = vrot.lane.b32.xlu0 %v8877_v42, %s7718_s20 }
0x1042   : > { %7430 = vrot.lane.b32.xlu0 %v8890_v27, %s7718_s20 }
0x10a5   : > { %v3932_v20 = vpop.xlane.xlu0 %3931 }
0x10a6   : > { %v3933_v53 = vsub.f32 %v3929_v46, %v3932_v20 }
0x10a8   : > { %v3934_v35 = vmul.f32 1.442695, %v3933_v53 }
0x10a9   : > { %v7401_v38 = vpop.permute.xlu0 %7400 }
0x10aa   : > { %7674 = vpow2.f32 %v3934_v35  ;;  %v7403_v56 = vunpack.i.h.bf16 %v7401_v38  ;;  %v7402_v15 = vunpack.i.l.bf16 %v7401_v38 }
0x10ac   : > { %v7096_v37 = vpack.c.bf16 %v7403_v56, %v7402_v15 }
0x10ad   : > { %v4015_v18 = vpop.permute.xlu0 %4014 }
0x10b1   : > { %v7416_v41 = vpop.permute.xlu0 %7415 }
0x10b2   : > { %v7418_v49 = vunpack.i.h.bf16 %v7416_v41  ;;  %v7417_v61 = vunpack.i.l.bf16 %v7416_v41 }
0x10b4   : > { %v7675_v14 = vpop.eup %7674  ;;  %v7108_v43 = vpack.c.bf16 %v7418_v49, %v7417_v61 }
0x10b5   : > { %6648 = vmatmul.mubr.msk.f32.vlgmr.msra.gmra.mrb[72].mxu1 %vm952_vm3, %v7675_v14  ;;  %v7421_v2 = vpop.permute.xlu0 %7420  ;;  %v3936_v34 = vsel %vm952_vm3, %v7675_v14, 0.0 }
0x10b6   : > { %7094 = vmatpush3.bf16.xpose.msk.msra.mxu1 %vm7952_vm2, %v7092_v40  ;;  %v7423_v17 = vunpack.i.h.bf16 %v7421_v2  ;;  %v7422_v45 = vunpack.i.l.bf16 %v7421_v2  ;;  %7109 = vmatpush3.bf16.msra.mxu0 %v7108_v43 }
0x10b7   : > { %7110 = vmatprep.subr.bf16.mxu0 %v7723_v62  ;;  %7095 = vmatprep.subr.bf16.mxu1 %v7723_v62 }
0x10b8   : > { %v7111_v28 = vpack.c.bf16 %v7423_v17, %v7422_v45  ;;  %6666 = vmatprep.mubr.msk.f32.mxu1 %vm7724_vm4, %v7725_v1 }
0x10b9   : > { %v7426_v39 = vpop.permute.xlu0 %7425 }
0x10ba   : > { %v7428_v12 = vunpack.i.h.bf16 %v7426_v39  ;;  %v7427_v52 = vunpack.i.l.bf16 %v7426_v39  ;;  %7112 = vmatpush3.bf16.msra.mxu0 %v7111_v28 }
0x10bb   : > { %7113 = vmatprep.subr.bf16.mxu0 %v7723_v62 }
0x10bc   : > { %v7114_v23 = vpack.c.bf16 %v7428_v12, %v7427_v52 }
0x10bd   : > { %v7431_v29 = vpop.permute.xlu0 %7430 }
0x10be   : > { %v7433_v31 = vunpack.i.h.bf16 %v7431_v29  ;;  %v7432_v5 = vunpack.i.l.bf16 %v7431_v29  ;;  %7098 = vmatpush3.bf16.xpose.msk.msra.mxu1 %vm7952_vm2, %v7096_v37  ;;  %7115 = vmatpush3.bf16.msra.mxu0 %v7114_v23 }
0x10bf   : > { %7116 = vmatprep.subr.bf16.mxu0 %v7723_v62  ;;  %7099 = vmatprep.subr.bf16.mxu1 %v7723_v62 }
0x10c0   : > { %v7117_v57 = vpack.c.bf16 %v7433_v31, %v7432_v5 }
0x10c2   : > { %7118 = vmatpush3.bf16.msra.mxu0 %v7117_v57 }
0x10c3   : > { %6688 = vmatprep.subr.mxu0 %v7725_v1 }
0x10c6   : > { %7102 = vmatpush3.bf16.xpose.msk.msra.mxu1 %vm7952_vm2, %v7100_v54 }
0x10c7   : > { %7103 = vmatprep.subr.bf16.mxu1 %v7723_v62 }
0x10ce   : > { %7106 = vmatpush3.bf16.xpose.msk.msra.mxu1 %vm7952_vm2, %v7104_v30 }
0x10cf   : > { %6693 = vmatprep.subr.mxu1 %v7725_v1 }
0x10d5   : > { %6667 = vmatmul.mubr.msk.f32.vlgmr.msra.gmra.mrb[74].mxu1 %vm220_vm0, %v4015_v18 }
0x10d6   : > { %6695 = vmatprep.mubr.msk.f32.mxu1 %vm7724_vm4, %v7725_v1  ;;  %6694 = vmatpush3.msra.mxu1 %v3827_v50 }
0x10d7   : > { %7135 = vmatprep.subr.bf16.mxu1 %v7723_v62 }
0x1188   : > { %v4008_v16 = vpop.f32.mrb[72].mxu1 }
0x1189   : > { %v6649_v33 = vpop.f32.mrb[73].mxu1 }
0x11a8   : > { %v4116_v11 = vpop.f32.mrb[74].mxu1 }
0x11a9   : > { %v4120_v19 = vmul.f32 0.35355338, %v4116_v11  ;;  %v6668_v55 = vpop.f32.mrb[75].mxu1 }
0x11ab   : > { %v4121_v60 = vsel %vm952_vm3, %v4120_v19, -inf }
0x11ac   : > { %4122 = vmax.xlane.f32.xlu1 %v4121_v60 }
0x11bd   : > { %7435 = vrot.lane.b32.xlu1 %v8864_v59, %s7720_s22 }
0x11c1   : > { %7445 = vrot.lane.b32.xlu1 %v8881_v24, %s7720_s22 }
0x11c5   : > { %7450 = vrot.lane.b32.xlu1 %v8892_v44, %s7720_s22 }
0x11c9   : > { %4383 = vrot.lane.b32.xlu1 %v8903_v10, %s7720_s22 }
0x11ed   : > { %3937 = vadd.xlane.f32.xlu1 %v3936_v34 }
0x11fe   : > { %7455 = vrot.lane.b32.xlu1 %v8862_v26, %s7720_s22 }
0x1202   : > { %7465 = vrot.lane.b32.xlu1 %v8877_v42, %s7720_s22 }
0x1206   : > { %7470 = vrot.lane.b32.xlu1 %v8890_v27, %s7720_s22 }
0x120a   : > { %7475 = vrot.lane.b32.xlu1 %v8864_v59, %s7722_s24 }
0x120e   : > { %7480 = vrot.lane.b32.xlu1 %v8874_v6, %s7722_s24 }
0x1212   : > { %7485 = vrot.lane.b32.xlu1 %v8881_v24, %s7722_s24  ;;  %v3828_v24 = vld [vmem:[%s9220_s2 + $0x118] sm:$0xff] }
0x1216   : > { %7490 = vrot.lane.b32.xlu1 %v8892_v44, %s7722_s24 }
0x121a   : > { %4672 = vrot.lane.b32.xlu1 %v8903_v10, %s7722_s24 }
0x1239   : > { %v4123_v32 = vpop.xlane.xlu1 %4122 }
0x123a   : > { %v4124_v3 = vsub.f32 %v4120_v19, %v4123_v32 }
0x123c   : > { %v4125_v48 = vmul.f32 1.442695, %v4124_v3 }
0x123d   : > { %v7436_v44 = vpop.permute.xlu1 %7435 }
0x123e   : > { %7676 = vpow2.f32 %v4125_v48  ;;  %v7438_v21 = vunpack.i.h.bf16 %v7436_v44  ;;  %v7437_v58 = vunpack.i.l.bf16 %v7436_v44 }
0x1240   : > { %v7120_v40 = vpack.c.bf16 %v7438_v21, %v7437_v58 }
0x1241   : > { %v7446_v10 = vpop.permute.xlu1 %7445 }
0x1242   : > { %v7448_v56 = vunpack.i.h.bf16 %v7446_v10  ;;  %v7447_v15 = vunpack.i.l.bf16 %v7446_v10 }
0x1244   : > { %v7128_v28 = vpack.c.bf16 %v7448_v56, %v7447_v15 }
0x1245   : > { %v7451_v46 = vpop.permute.xlu1 %7450 }
0x1246   : > { %v7453_v39 = vunpack.i.h.bf16 %v7451_v46  ;;  %v7452_v12 = vunpack.i.l.bf16 %v7451_v46 }
0x1248   : > { %v7677_v22 = vpop.eup %7676  ;;  %v7132_v52 = vpack.c.bf16 %v7453_v39, %v7452_v12 }
0x1249   : > { %6686 = vmatmul.mubr.msk.f32.vlgmr.msra.gmra.mrb[66].mxu0 %vm952_vm3, %v7677_v22  ;;  %v4127_v59 = vsel %vm952_vm3, %v7677_v22, 0.0  ;;  %v4384_v47 = vpop.permute.xlu1 %4383 }
0x124a   : > { %4128 = vadd.xlane.f32.xlu0 %v4127_v59  ;;  %6690 = vmatprep.mubr.msk.f32.mxu0 %vm7724_vm4, %v7725_v1  ;;  %v3829_v59 = vld [vmem:[%s9220_s2 + $0x120] sm:$0xff] }
0x124b   : > { %6689 = vmatpush3.msra.mxu0 %v3828_v24 }
0x124c   : > { %7119 = vmatprep.subr.bf16.mxu0 %v7723_v62 }
0x1260   : > { %7440 = vrot.lane.b32.xlu0 %v8874_v6, %s7720_s22 }
0x127a   : > { %v3938_v25 = vpop.xlane.xlu1 %3937 }
0x127b   : > { %7678 = vrcp.f32 %v3938_v25 }
0x127e   : > { %v7456_v20 = vpop.permute.xlu1 %7455 }
0x127f   : > { %v7458_v53 = vunpack.i.h.bf16 %v7456_v20  ;;  %v7457_v35 = vunpack.i.l.bf16 %v7456_v20 }
0x1281   : > { %v7136_v18 = vpack.c.bf16 %v7458_v53, %v7457_v35 }
0x1282   : > { %v7466_v63 = vpop.permute.xlu1 %7465 }
0x1283   : > { %v7468_v11 = vunpack.i.h.bf16 %v7466_v63  ;;  %v7467_v19 = vunpack.i.l.bf16 %v7466_v63 }
0x1285   : > { %v7679_v38 = vpop.eup %7678  ;;  %v7142_v34 = vpack.c.bf16 %v7468_v11, %v7467_v19 }
0x1286   : > { %v4013_v8 = vmul.f32 %v7679_v38, %v4008_v16  ;;  %v7471_v60 = vpop.permute.xlu1 %7470 }
0x1287   : > { %v7473_v50 = vunpack.i.h.bf16 %v7471_v60  ;;  %v7472_v32 = vunpack.i.l.bf16 %v7471_v60 }
0x1288   : > { %6696 = vmatmul.mubr.msk.f32.vlgmr.msra.gmra.mrb[76].mxu1 %vm220_vm0, %v4013_v8 }
0x1289   : > { %7137 = vmatpush3.bf16.msra.mxu1 %v7136_v18  ;;  %6733 = vmatprep.mubr.msk.f32.mxu1 %vm7724_vm4, %v7725_v1  ;;  %v7145_v48 = vpack.c.bf16 %v7473_v50, %v7472_v32  ;;  %v5789_v50 = vld [vmem:[%s9221_s3 + $0x1d] ss:$0 sm:$0xff] }
0x128a   : > { %7138 = vmatprep.subr.bf16.mxu1 %v7723_v62  ;;  %v7476_v8 = vpop.permute.xlu1 %7475 }
0x128b   : > { %v7478_v18 = vunpack.i.h.bf16 %v7476_v8 }
0x12d7   : > { %v4129_v6 = vpop.xlane.xlu0 %4128 }
0x12d8   : > { %7680 = vrcp.f32 %v4129_v6  ;;  %v7477_v6 = vunpack.i.l.bf16 %v7476_v8  ;;  %v4997_v8 = vld [vmem:[%s9220_s2 + $0x150] sm:$0xff] }
0x12db   : > { %v7441_v43 = vpop.permute.xlu0 %7440 }
0x12dc   : > { %v7443_v2 = vunpack.i.h.bf16 %v7441_v43  ;;  %v7442_v17 = vunpack.i.l.bf16 %v7441_v43 }
0x12de   : > { %v7124_v45 = vpack.c.bf16 %v7443_v2, %v7442_v17 }
0x12e2   : > { %v7681_v41 = vpop.eup %7680 }
0x131c   : > { %v4231_v49 = vpop.f32.mrb[66].mxu0 }
0x131d   : > { %v4236_v61 = vmul.f32 %v7681_v41, %v4231_v49  ;;  %v6687_v14 = vpop.f32.mrb[67].mxu0 }
0x131e   : > { %v7481_v14 = vpop.permute.xlu1 %7480 }
0x131f   : > { %6691 = vmatmul.mubr.msk.f32.vlgmr.msra.gmra.mrb[68].mxu0 %vm220_vm0, %v4236_v61  ;;  %v7148_v61 = vpack.c.bf16 %v7478_v18, %v7477_v6  ;;  %v7482_v43 = vunpack.i.l.bf16 %v7481_v14  ;;  %v4998_v18 = vld [vmem:[%s9220_s2 + $0x158] sm:$0xff]  ;;  %v4999_v6 = vld [vmem:[%s9220_s2 + $0x160] sm:$0xff] }
0x1320   : > { %7122 = vmatpush3.bf16.xpose.msk.msra.mxu0 %vm7952_vm2, %v7120_v40  ;;  %6714 = vmatprep.mubr.msk.f32.mxu0 %vm7724_vm4, %v7725_v1  ;;  %v7483_v40 = vunpack.i.h.bf16 %v7481_v14 }
0x1321   : > { %7123 = vmatprep.subr.bf16.mxu0 %v7723_v62 }
0x1322   : > { %v7152_v2 = vpack.c.bf16 %v7483_v40, %v7482_v43  ;;  %v7486_v17 = vpop.permute.xlu1 %7485 }
0x1323   : > { %v7487_v56 = vunpack.i.l.bf16 %v7486_v17 }
0x1328   : > { %7126 = vmatpush3.bf16.xpose.msk.msra.mxu0 %vm7952_vm2, %v7124_v45  ;;  %v7488_v45 = vunpack.i.h.bf16 %v7486_v17 }
0x1329   : > { %7127 = vmatprep.subr.bf16.mxu0 %v7723_v62 }
0x132a   : > { %v7156_v15 = vpack.c.bf16 %v7488_v45, %v7487_v56  ;;  %v5790_v45 = vld [vmem:[%s9221_s3 + $0x23] ss:$0 sm:$0xff] }
0x1330   : > { %7130 = vmatpush3.bf16.xpose.msk.msra.mxu0 %vm7952_vm2, %v7128_v28  ;;  %v7491_v28 = vpop.permute.xlu1 %7490 }
0x1331   : > { %7131 = vmatprep.subr.bf16.mxu0 %v7723_v62  ;;  %v7493_v39 = vunpack.i.h.bf16 %v7491_v28  ;;  %v7492_v12 = vunpack.i.l.bf16 %v7491_v28 }
0x1338   : > { %7134 = vmatpush3.bf16.xpose.msk.msra.mxu0 %vm7952_vm2, %v7132_v52  ;;  %v7160_v52 = vpack.c.bf16 %v7493_v39, %v7492_v12  ;;  %v5003_v12 = vld [vmem:[%s9220_s2 + $0x180] sm:$0xff] }
0x1339   : > { %7163 = vmatprep.subr.bf16.mxu0 %v7723_v62 }
0x133f   : > { %6715 = vmatmul.mubr.msk.f32.vlgmr.msra.gmra.mrb[70].mxu0 %vm220_vm0, %v4384_v47 }
0x1340   : > { %6776 = vmatprep.mubr.msk.f32.mxu0 %vm7724_vm4, %v7725_v1 }
0x135b   : > { %v4379_v37 = vpop.f32.mrb[76].mxu1 }
0x135c   : > { %v6697_v23 = vpop.f32.mrb[77].mxu1 }
0x13f2   : > { %v4306_v4 = vpop.f32.mrb[68].mxu0 }
0x13f3   : > { %v9006_v29 = vadd.f32 %v4379_v37, %v4306_v4  ;;  %v6692_v31 = vpop.f32.mrb[69].mxu0  ;;  %v4673_v37 = vpop.permute.xlu1 %4672 }
0x1412   : > { %v4485_v5 = vpop.f32.mrb[70].mxu0 }
0x1413   : > { %v4489_v13 = vmul.f32 0.35355338, %v4485_v5  ;;  %v6716_v51 = vpop.f32.mrb[71].mxu0 }
0x1415   : > { %v4490_v57 = vsel %vm952_vm3, %v4489_v13, -inf }
0x1416   : > { %4491 = vmax.xlane.f32.xlu0 %v4490_v57 }
0x142c   : > { %7460 = vrot.lane.b32.xlu0 %v8872_v0, %s7720_s22 }
0x14a3   : > { %v4492_v54 = vpop.xlane.xlu0 %4491 }
0x14a4   : > { %v4493_v9 = vsub.f32 %v4489_v13, %v4492_v54 }
0x14a6   : > { %v4494_v36 = vmul.f32 1.442695, %v4493_v9 }
0x14a7   : > { %v7461_v30 = vpop.permute.xlu0 %7460 }
0x14a8   : > { %7682 = vpow2.f32 %v4494_v36  ;;  %v7463_v16 = vunpack.i.h.bf16 %v7461_v30  ;;  %v7462_v33 = vunpack.i.l.bf16 %v7461_v30 }
0x14aa   : > { %v7139_v55 = vpack.c.bf16 %v7463_v16, %v7462_v33 }
0x14ac   : > { %7140 = vmatpush3.bf16.msra.mxu1 %v7139_v55 }
0x14ad   : > { %7141 = vmatprep.subr.bf16.mxu1 %v7723_v62 }
0x14b0   : > { %7143 = vmatpush3.bf16.msra.mxu1 %v7142_v34 }
0x14b1   : > { %7144 = vmatprep.subr.bf16.mxu1 %v7723_v62 }
0x14b2   : > { %v7683_v3 = vpop.eup %7682 }
0x14b3   : > { %v4496_v22 = vsel %vm952_vm3, %v7683_v3, 0.0 }
0x14b4   : > { %4497 = vadd.xlane.f32.xlu0 %v4496_v22  ;;  %7146 = vmatpush3.bf16.msra.mxu1 %v7145_v48  ;;  %v3541_v22 = vld [vmem:[%s9221_s3] sm:$0xff] }
0x14b5   : > { %6736 = vmatprep.subr.mxu1 %v7725_v1 }
0x14b7   : > { %6734 = vmatmul.mubr.msk.f32.vlgmr.msra.gmra.mrb[78].mxu1 %vm952_vm3, %v7683_v3 }
0x14b8   : > { %6738 = vmatprep.mubr.msk.f32.mxu1 %vm7724_vm4, %v7725_v1  ;;  %6737 = vmatpush3.msra.mxu1 %v3829_v59 }
0x14b9   : > { %7147 = vmatprep.subr.bf16.mxu1 %v7723_v62 }
0x14ca   : > { %7495 = vrot.lane.b32.xlu0 %v8862_v26, %s7722_s24 }
0x14ce   : > { %7500 = vrot.lane.b32.xlu0 %v8872_v0, %s7722_s24 }
0x14d2   : > { %7505 = vrot.lane.b32.xlu0 %v8877_v42, %s7722_s24 }
0x1541   : > { %v4498_v24 = vpop.xlane.xlu0 %4497 }
0x1542   : > { %7684 = vrcp.f32 %v4498_v24 }
0x1545   : > { %v7496_v44 = vpop.permute.xlu0 %7495 }
0x1546   : > { %v7498_v10 = vunpack.i.h.bf16 %v7496_v44  ;;  %v7497_v46 = vunpack.i.l.bf16 %v7496_v44 }
0x1548   : > { %v7164_v47 = vpack.c.bf16 %v7498_v10, %v7497_v46 }
0x1549   : > { %v7501_v25 = vpop.permute.xlu0 %7500 }
0x154a   : > { %v7503_v26 = vunpack.i.h.bf16 %v7501_v25  ;;  %v7502_v20 = vunpack.i.l.bf16 %v7501_v25  ;;  %7165 = vmatpush3.bf16.msra.mxu0 %v7164_v47 }
0x154b   : > { %7166 = vmatprep.subr.bf16.mxu0 %v7723_v62 }
0x154c   : > { %v7167_v0 = vpack.c.bf16 %v7503_v26, %v7502_v20  ;;  %v7685_v21 = vpop.eup %7684  ;;  %v4992_v20 = vld [vmem:[%s9220_s2 + $0x130] sm:$0xff] }
0x154d   : > { %v7506_v42 = vpop.permute.xlu0 %7505 }
0x154e   : > { %v7508_v53 = vunpack.i.h.bf16 %v7506_v42  ;;  %v7507_v35 = vunpack.i.l.bf16 %v7506_v42  ;;  %7168 = vmatpush3.bf16.msra.mxu0 %v7167_v0  ;;  %v4993_v0 = vld [vmem:[%s9220_s2 + $0x138] sm:$0xff] }
0x154f   : > { %7169 = vmatprep.subr.bf16.mxu0 %v7723_v62  ;;  %v7176_v42 = vpack.c.bf16 %v4993_v0, %v4992_v20  ;;  %v5215_v20 = vld [vmem:[%s9220_s2 + $0x1a8] sm:$0xff] }
0x1550   : > { %v7170_v38 = vpack.c.bf16 %v7508_v53, %v7507_v35  ;;  %v4994_v53 = vld [vmem:[%s9220_s2 + $0x140] sm:$0xff]  ;;  %v4995_v35 = vld [vmem:[%s9220_s2 + $0x148] sm:$0xff] }
0x1552   : > { %7171 = vmatpush3.bf16.msra.mxu0 %v7170_v38  ;;  %v7179_v38 = vpack.c.bf16 %v4995_v35, %v4994_v53 }
0x1553   : > { %7172 = vmatprep.subr.bf16.mxu0 %v7723_v62 }
0x158a   : > { %v4592_v58 = vpop.f32.mrb[78].mxu1 }
0x158b   : > { %v4597_v41 = vmul.f32 %v7685_v21, %v4592_v58  ;;  %v6735_v49 = vpop.f32.mrb[79].mxu1  ;;  %v7182_v21 = vpack.c.bf16 %v4998_v18, %v4997_v8  ;;  %v5000_v58 = vld [vmem:[%s9220_s2 + $0x168] sm:$0xff]  ;;  %v5798_v8 = vld [vmem:[%s9221_s3 + $0x27] ss:$0 sm:$0xff] }
0x158c   : > { %v5001_v49 = vld [vmem:[%s9220_s2 + $0x170] sm:$0xff] }
0x158d   : > { %6739 = vmatmul.mubr.msk.f32.vlgmr.msra.gmra.mrb[80].mxu1 %vm220_vm0, %v4597_v41  ;;  %v7185_v41 = vpack.c.bf16 %v5000_v58, %v4999_v6  ;;  %v5295_v6 = vld [vmem:[%s9220_s2 + $0x1b0] sm:$0xff]  ;;  %v5799_v58 = vld [vmem:[%s9221_s3 + $0x28] ss:$0 sm:$0xff] }
0x158e   : > { %7150 = vmatpush3.bf16.xpose.msk.msra.mxu1 %vm7952_vm2, %v7148_v61  ;;  %6757 = vmatprep.mubr.msk.f32.mxu1 %vm7724_vm4, %v7725_v1  ;;  %v5002_v61 = vld [vmem:[%s9220_s2 + $0x178] sm:$0xff] }
0x158f   : > { %7151 = vmatprep.subr.bf16.mxu1 %v7723_v62  ;;  %v7188_v14 = vpack.c.bf16 %v5002_v61, %v5001_v49 }
0x1596   : > { %7154 = vmatpush3.bf16.xpose.msk.msra.mxu1 %vm7952_vm2, %v7152_v2 }
0x1597   : > { %7155 = vmatprep.subr.bf16.mxu1 %v7723_v62 }
0x159e   : > { %7158 = vmatpush3.bf16.xpose.msk.msra.mxu1 %vm7952_vm2, %v7156_v15  ;;  %v5791_v15 = vld [vmem:[%s9221_s3 + $0x24] ss:$0 sm:$0xff] }
0x159f   : > { %7159 = vmatprep.subr.bf16.mxu1 %v7723_v62 }
0x15a6   : > { %7162 = vmatpush3.bf16.xpose.msk.msra.mxu1 %vm7952_vm2, %v7160_v52  ;;  %v5004_v52 = vld [vmem:[%s9220_s2 + $0x188] sm:$0xff] }
0x15a7   : > { %7181 = vmatprep.subr.bf16.mxu1 %v7723_v62 }
0x15ad   : > { %6758 = vmatmul.mubr.msk.f32.vlgmr.msra.gmra.mrb[82].mxu1 %vm220_vm0, %v4673_v37  ;;  %v7191_v37 = vpack.c.bf16 %v5004_v52, %v5003_v12  ;;  %v5380_v12 = vld [vmem:[%s9220_s2 + $0x1e0] sm:$0xff] }
0x15ae   : > { %6811 = vmatprep.mubr.msk.f32.mxu1 %vm7724_vm4, %v7725_v1  ;;  %7183 = vmatpush3.bf16.msra.mxu1 %v7182_v21  ;;  %v5296_v21 = vld [vmem:[%s9220_s2 + $0x1b8] sm:$0xff] }
0x15af   : > { %7184 = vmatprep.subr.bf16.mxu1 %v7723_v62  ;;  %v7200_v49 = vpack.c.bf16 %v5296_v21, %v5295_v6 }
0x15b2   : > { %7186 = vmatpush3.bf16.msra.mxu1 %v7185_v41 }
0x15b3   : > { %7187 = vmatprep.subr.bf16.mxu1 %v7723_v62 }
0x15b6   : > { %7189 = vmatpush3.bf16.msra.mxu1 %v7188_v14  ;;  %v5297_v14 = vld [vmem:[%s9220_s2 + $0x1c0] sm:$0xff] }
0x15b7   : > { %7190 = vmatprep.subr.bf16.mxu1 %v7723_v62 }
0x15ba   : > { %7192 = vmatpush3.bf16.msra.mxu1 %v7191_v37 }
0x15bb   : > { %7205 = vmatprep.subr.bf16.mxu1 %v7723_v62 }
0x1660   : > { %v4667_v23 = vpop.f32.mrb[80].mxu1 }
0x1661   : > { %v4671_v4 = vadd.f32 %v4667_v23, %v9006_v29  ;;  %v6740_v31 = vpop.f32.mrb[81].mxu1  ;;  %v5792_v23 = vld [vmem:[%s9221_s3 + $0x1e] ss:$0 sm:$0xff] }
0x1680   : > { %v4774_v5 = vpop.f32.mrb[82].mxu1 }
0x1681   : > { %v4778_v13 = vmul.f32 0.35355338, %v4774_v5  ;;  %v6759_v51 = vpop.f32.mrb[83].mxu1 }
0x1682   : > { %v5794_v51 = vld [vmem:[%s9221_s3 + $0x1f] ss:$0 sm:$0xff] }
0x1683   : > { %v4779_v57 = vsel %vm952_vm3, %v4778_v13, -inf }
0x1684   : > { %4780 = vmax.xlane.f32.xlu1 %v4779_v57 }
0x1695   : > { %7510 = vrot.lane.b32.xlu1 %v8890_v27, %s7722_s24  ;;  %v3830_v27 = vld [vmem:[%s9220_s2 + $0x128] sm:$0xff] }
0x1711   : > { %v4781_v7 = vpop.xlane.xlu1 %4780 }
0x1712   : > { %v4782_v54 = vsub.f32 %v4778_v13, %v4781_v7 }
0x1714   : > { %v4783_v9 = vmul.f32 1.442695, %v4782_v54 }
0x1715   : > { %v7511_v63 = vpop.permute.xlu1 %7510 }
0x1716   : > { %7686 = vpow2.f32 %v4783_v9  ;;  %v7513_v36 = vunpack.i.h.bf16 %v7511_v63  ;;  %v7512_v30 = vunpack.i.l.bf16 %v7511_v63 }
0x1718   : > { %v7173_v16 = vpack.c.bf16 %v7513_v36, %v7512_v30 }
0x171a   : > { %7174 = vmatpush3.bf16.msra.mxu0 %v7173_v16 }
0x171b   : > { %6779 = vmatprep.subr.mxu0 %v7725_v1 }
0x1720   : > { %v7687_v29 = vpop.eup %7686 }
0x1721   : > { %6777 = vmatmul.mubr.msk.f32.vlgmr.msra.gmra.mrb[72].mxu0 %vm952_vm3, %v7687_v29  ;;  %v4785_v33 = vsel %vm952_vm3, %v7687_v29, 0.0 }
0x1722   : > { %4786 = vadd.xlane.f32.xlu0 %v4785_v33  ;;  %6781 = vmatprep.mubr.msk.f32.mxu0 %vm7724_vm4, %v7725_v1 }
0x1723   : > { %6780 = vmatpush3.msra.mxu0 %v3830_v27 }
0x1724   : > { %7175 = vmatprep.subr.bf16.mxu0 %v7723_v62 }
0x17af   : > { %v4787_v11 = vpop.xlane.xlu0 %4786 }
0x17b0   : > { %7688 = vrcp.f32 %v4787_v11 }
0x17ba   : > { %v7689_v19 = vpop.eup %7688 }
0x17f4   : > { %v4881_v55 = vpop.f32.mrb[72].mxu0 }
0x17f5   : > { %v4886_v60 = vmul.f32 %v7689_v19, %v4881_v55  ;;  %v6778_v34 = vpop.f32.mrb[73].mxu0 }
0x17f7   : > { %6782 = vmatmul.mubr.msk.f32.vlgmr.msra.gmra.mrb[74].mxu0 %vm220_vm0, %v4886_v60  ;;  %v5796_v60 = vld [vmem:[%s9221_s3 + $0x25] ss:$0 sm:$0xff] }
0x17f8   : > { %6792 = vmatprep.mubr.msk.f32.mxu0 %vm7724_vm4, %v7725_v1  ;;  %7177 = vmatpush3.bf16.msra.mxu0 %v7176_v42 }
0x17f9   : > { %7178 = vmatprep.subr.bf16.mxu0 %v7723_v62 }
0x17fc   : > { %7180 = vmatpush3.bf16.msra.mxu0 %v7179_v38 }
0x17fd   : > { %7193 = vmatprep.subr.bf16.mxu0 %v7723_v62 }
0x18ca   : > { %v4956_v32 = vpop.f32.mrb[74].mxu0 }
0x18cb   : > { %v4960_v3 = vadd.f32 %v4956_v32, %v4671_v4  ;;  %v6783_v48 = vpop.f32.mrb[75].mxu0 }
0x18cd   : > { %v4965_v59 = vadd.f32 %v5789_v50, %v4960_v3  ;;  %v5797_v50 = vld [vmem:[%s9221_s3 + $0x26] ss:$0 sm:$0xff] }
0x18cf   : > { %v4966_v24 = vadd.f32 %v4965_v59, %v3541_v22 }
0x18d1   : > { %v4969_v44 = vsel %vm510_vm1, %v4966_v24, 0.0 }
0x18d2   : > { %4970 = vadd.xlane.f32.xlu1 %v4969_v44 }
0x195f   : > { %v4971_v10 = vpop.xlane.xlu1 %4970 }
0x1960   : > { %v4972_v46 = vmul.f32 0.03125, %v4971_v10 }
0x1962   : > { %v4973_v47 = vsub.f32 %v4966_v24, %v4972_v46  ;;  %v5212_v46 = vld [vmem:[%s9220_s2 + $0x190] sm:$0xff] }
0x1964   : > { %v4974_v25 = vmul.f32 %v4973_v47, %v4973_v47 }
0x1966   : > { %v4975_v26 = vsel %vm510_vm1, %v4974_v25, 0.0 }
0x1967   : > { %4976 = vadd.xlane.f32.xlu0 %v4975_v26  ;;  %v5214_v26 = vld [vmem:[%s9220_s2 + $0x1a0] sm:$0xff] }
0x1968   : > { %v7197_v0 = vpack.c.bf16 %v5215_v20, %v5214_v26 }
0x19f4   : > { %v4977_v40 = vpop.xlane.xlu0 %4976 }
0x19f5   : > { %v4978_v43 = vmul.f32 0.03125, %v4977_v40  ;;  %v5298_v40 = vld [vmem:[%s9220_s2 + $0x1c8] sm:$0xff] }
0x19f7   : > { %v4979_v2 = vadd.f32 1e-05, %v4978_v43  ;;  %v7203_v43 = vpack.c.bf16 %v5298_v40, %v5297_v14 }
0x19f9   : > { %7690 = vrsqrt.f32 %v4979_v2  ;;  %v5378_v2 = vld [vmem:[%s9220_s2 + $0x1d0] sm:$0xff] }
0x1a03   : > { %v7691_v17 = vpop.eup %7690 }
0x1a04   : > { %v4981_v56 = vmul.f32 %v7691_v17, %v4973_v47  ;;  %v5213_v47 = vld [vmem:[%s9220_s2 + $0x198] sm:$0xff] }
0x1a05   : > { %v7194_v25 = vpack.c.bf16 %v5213_v47, %v5212_v46  ;;  %v5379_v17 = vld [vmem:[%s9220_s2 + $0x1d8] sm:$0xff] }
0x1a06   : > { %v4986_v28 = vmul.f32 %v5790_v45, %v4981_v56  ;;  %v7206_v45 = vpack.c.bf16 %v5379_v17, %v5378_v2  ;;  %v5800_v56 = vld [vmem:[%s9221_s3 + $0x20] ss:$0 sm:$0xff] }
0x1a08   : > { %v4991_v39 = vadd.f32 %v5791_v15, %v4986_v28 }
0x1a0a   : > { %6793 = vmatmul.mubr.msk.f32.vlgmr.msra.gmra.mrb[76].mxu0 %vm510_vm1, %v4991_v39 }
0x1a0b   : > { %6822 = vmatprep.mubr.msk.f32.mxu0 %vm7724_vm4, %v7725_v1  ;;  %7195 = vmatpush3.bf16.msra.mxu0 %v7194_v25 }
0x1a0c   : > { %7196 = vmatprep.subr.bf16.mxu0 %v7723_v62 }
0x1a0f   : > { %7198 = vmatpush3.bf16.msra.mxu0 %v7197_v0 }
0x1a10   : > { %7199 = vmatprep.subr.bf16.mxu0 %v7723_v62 }
0x1add   : > { %v5079_v4 = vpop.f32.mrb[76].mxu0 }
0x1ade   : > { %v5080_v31 = vadd.f32 %v5792_v23, %v5079_v4  ;;  %v6794_v5 = vpop.f32.mrb[77].mxu0  ;;  %v5802_v23 = vld [vmem:[%s9221_s3 + $0x21] ss:$0 sm:$0xff] }
0x1ae0   : > { %v5083_v13 = vmax.f32 %v5080_v31, 0.0 }
0x1ae2   : > { %6812 = vmatmul.mubr.msk.f32.vlgmr.msra.gmra.mrb[84].mxu1 %vm952_vm3, %v5083_v13 }
0x1ae3   : > { %6844 = vmatprep.mubr.msk.f32.mxu1 %vm7724_vm4, %v7725_v1  ;;  %7207 = vmatpush3.bf16.msra.mxu1 %v7206_v45 }
0x1ae4   : > { %7208 = vmatprep.subr.bf16.mxu1 %v7723_v62 }
0x1bb5   : > { %v5157_v57 = vpop.f32.mrb[84].mxu1 }
0x1bb6   : > { %v5158_v7 = vadd.f32 %v5794_v51, %v5157_v57  ;;  %v6813_v54 = vpop.f32.mrb[85].mxu1  ;;  %v5804_v51 = vld [vmem:[%s9221_s3 + $0x22] ss:$0 sm:$0xff] }
0x1bb8   : > { %v5161_v9 = vadd.f32 %v5158_v7, %v4991_v39 }
0x1bba   : > { %v5164_v63 = vsel %vm510_vm1, %v5161_v9, 0.0 }
0x1bbb   : > { %5165 = vadd.xlane.f32.xlu0 %v5164_v63 }
0x1c48   : > { %v5166_v36 = vpop.xlane.xlu0 %5165 }
0x1c49   : > { %v5167_v30 = vmul.f32 0.03125, %v5166_v36 }
0x1c4b   : > { %v5168_v16 = vsub.f32 %v5161_v9, %v5167_v30 }
0x1c4d   : > { %v5169_v29 = vmul.f32 %v5168_v16, %v5168_v16 }
0x1c4f   : > { %v5170_v33 = vsel %vm510_vm1, %v5169_v29, 0.0 }
0x1c50   : > { %5171 = vadd.xlane.f32.xlu0 %v5170_v33 }
0x1cdd   : > { %v5172_v27 = vpop.xlane.xlu0 %5171 }
0x1cde   : > { %v5173_v11 = vmul.f32 0.03125, %v5172_v27 }
0x1ce0   : > { %v5174_v19 = vadd.f32 1e-05, %v5173_v11 }
0x1ce2   : > { %7692 = vrsqrt.f32 %v5174_v19 }
0x1cec   : > { %v7693_v55 = vpop.eup %7692 }
0x1ced   : > { %v5176_v34 = vmul.f32 %v7693_v55, %v5168_v16 }
0x1cef   : > { %v5181_v32 = vmul.f32 %v5796_v60, %v5176_v34 }
0x1cf1   : > { %v5186_v3 = vadd.f32 %v5797_v50, %v5181_v32 }
0x1cf3   : > { %v5189_v48 = vsel %vm510_vm1, %v5186_v3, 0.0 }
0x1cf4   : > { %5190 = vadd.xlane.f32.xlu0 %v5189_v48 }
0x1d81   : > { %v5191_v22 = vpop.xlane.xlu0 %5190 }
0x1d82   : > { %v5192_v59 = vmul.f32 0.03125, %v5191_v22 }
0x1d84   : > { %v5193_v24 = vsub.f32 %v5186_v3, %v5192_v59 }
0x1d86   : > { %v5194_v44 = vmul.f32 %v5193_v24, %v5193_v24 }
0x1d88   : > { %v5195_v10 = vsel %vm510_vm1, %v5194_v44, 0.0 }
0x1d89   : > { %5196 = vadd.xlane.f32.xlu0 %v5195_v10 }
0x1e16   : > { %v5197_v42 = vpop.xlane.xlu0 %5196 }
0x1e17   : > { %v5198_v53 = vmul.f32 0.03125, %v5197_v42 }
0x1e19   : > { %v5199_v35 = vadd.f32 1e-05, %v5198_v53 }
0x1e1b   : > { %7694 = vrsqrt.f32 %v5199_v35 }
0x1e25   : > { %v7695_v38 = vpop.eup %7694 }
0x1e26   : > { %v5201_v18 = vmul.f32 %v7695_v38, %v5193_v24 }
0x1e28   : > { %v5206_v41 = vmul.f32 %v5798_v8, %v5201_v18 }
0x1e2a   : > { %v5211_v61 = vadd.f32 %v5799_v58, %v5206_v41 }
0x1e2c   : > { %6823 = vmatmul.mubr.msk.f32.vlgmr.msra.gmra.mrb[78].mxu0 %vm510_vm1, %v5211_v61 }
0x1e2d   : > { %7201 = vmatpush3.bf16.msra.mxu0 %v7200_v49  ;;  %6833 = vmatprep.mubr.msk.f32.mxu0 %vm7724_vm4, %v7725_v1 }
0x1e2e   : > { %7202 = vmatprep.subr.bf16.mxu0 %v7723_v62  ;;  %v5381_v62 = vld [vmem:[%s9220_s2 + $0x1e8] sm:$0xff] }
0x1e2f   : > { %v7209_v52 = vpack.c.bf16 %v5381_v62, %v5380_v12 }
0x1e31   : > { %7204 = vmatpush3.bf16.msra.mxu0 %v7203_v43  ;;  %7210 = vmatpush3.bf16.msra.mxu1 %v7209_v52 }
0x1eff   : > { %v5290_v15 = vpop.f32.mrb[78].mxu0 }
0x1f00   : > { %v5291_v28 = vadd.f32 %v5800_v56, %v5290_v15  ;;  %v6824_v1 = vpop.f32.mrb[79].mxu0 }
0x1f02   : > { %v5294_v39 = vmax.f32 %v5291_v28, 0.0  ;;  %5468 = vrot.lane.b32.xlu1 %v5291_v28, %s7716_s18 }
0x1f04   : > { %6834 = vmatmul.mubr.msk.f32.vlgmr.msra.gmra.mrb[80].mxu0 %vm510_vm1, %v5294_v39 }
0x1f74   : > { %v5469_v37 = vpop.permute.xlu1 %5468 }
0x1f75   : > { %5472 = vst.msk [vmem:[%s9184_s30] sm:$0xff] %vm5471_vm5, %v5469_v37 }
0x1fd7   : > { %v5373_v4 = vpop.f32.mrb[80].mxu0 }
0x1fd8   : > { %v5374_v31 = vadd.f32 %v5802_v23, %v5373_v4  ;;  %v6835_v5 = vpop.f32.mrb[81].mxu0 }
0x1fda   : > { %v5377_v13 = vmax.f32 %v5374_v31, 0.0 }
0x1fdc   : > { %6845 = vmatmul.mubr.msk.f32.vlgmr.msra.gmra.mrb[86].mxu1 %vm510_vm1, %v5377_v13 }
0x20af   : > { %v5456_v57 = vpop.f32.mrb[86].mxu1 }
0x20b0   : > { %v5457_v7 = vadd.f32 %v5804_v51, %v5456_v57  ;;  %v6846_v54 = vpop.f32.mrb[87].mxu1 }
0x20b2   : > { %v5806_v9 = vmul.f32 -1.442695, %v5457_v7 }
0x20b4   : > { %7696 = vpow2.f32 %v5806_v9 }
0x20be   : > { %v7697_v63 = vpop.eup %7696 }
0x20bf   : > { %v5463_v36 = vadd.f32 1.0, %v7697_v63 }
0x20c1   : > { %7698 = vrcp.f32 %v5463_v36 }
0x20cb   : > { %v7699_v30 = vpop.eup %7698 }
0x20cc   : > { %5474 = vrot.lane.b32.xlu0 %v7699_v30, %s7726_s17 }
0x213e   : > { %v5475_v16 = vpop.permute.xlu0 %5474 }
0x213f   : > { %5478 = vst.msk [vmem:[%s9184_s30] sm:$0xff] %vm5477_vm6, %v5475_v16 }
0x2140 PF: > { %s14_s15 = sadd.s32 1, %s7714_s15  }
0x2141   : > { %p11_p5 = scmp.ge.s32.totalorder %s14_s15, 4  }
0x2143   :  { %13 = sbr.rel (!%p11_p5) target bundleno = 1 (0x1), region = 66 }

</bundles_post_ra>
